<compile_context>
chip_gen: v5e
topology: v5e:2x2
jax: 0.10.0
libtpu: 0.0.40
codegen_flags: <defaults>
</compile_context>

<pallas_src>
import functools

import numpy as np

import jax
import jax.numpy as jnp
from jax.experimental import pallas as pl
from jax.experimental.pallas import tpu as pltpu


# ------------------------------ fused kernel --------------------------------

def _fused_convcnp_kernel(
    x_enc_ref,    # (KE, N)       f32   packed encoder input [y*mc ; mc ; 0-pad]
    mask_ref,     # (9, N)        f32   per-tap zero-padding masks
    gidx_ref,     # (1, m*nt)     int32 global flat target indices
    w_enc_ref,    # (dz, KE)      f32   packed encoder weight (transposed)
    b_enc_ref,    # (dz, 1)       f32
    w_c1_ref,     # (dz, 9*dz)    f32   im2col-packed conv1 weight
    b_c1_ref,     # (dz, 1)       f32
    w_c2_ref,     # (dz, 9*dz)    f32
    b_c2_ref,     # (dz, 1)       f32
    w_d1_ref,     # (dz, dz)      f32   decoder hidden weight (transposed)
    b_d1_ref,     # (dz, 1)       f32
    w_hd_ref,     # (2*dy, dz)    f32   [mean ; raw_std] heads packed (transposed)
    b_hd_ref,     # (2*dy, 1)     f32
    out_ref,      # (2*dy, m*nt)  f32   [mean ; std] packed output
    zpad_ref,     # VMEM (dz, N + 2*pad) f32 scratch: lane-padded halo buffer
    patch_ref,    # VMEM (9*dz, N)       f32 scratch: im2col patch
    *, m, H, W, dy, dz, nt, pad,
):
    HW = H * W
    N = m * HW

    # Zero the halo margins once; the interior is fully overwritten per conv.
    zpad_ref[:, 0:pad] = jnp.zeros((dz, pad), jnp.float32)
    zpad_ref[:, pad + N:pad + N + pad] = jnp.zeros((dz, pad), jnp.float32)

    # --- encoder: Linear(cat([y*mc, repeat(mc, dy)])) as one MXU matmul ------
    z = jnp.dot(w_enc_ref[...], x_enc_ref[...],
                preferred_element_type=jnp.float32) + b_enc_ref[...]   # (dz, N)

    # --- 3x3 "SAME" conv + ReLU: one (dz, 9dz) @ (9dz, N) matmul -------------
    def conv3x3_relu(zin, w_ref, b_ref):
        # aligned store of the activation into the padded interior
        zpad_ref[:, pad:pad + N] = zin
        for t in range(9):
            dh, dw = t // 3 - 1, t % 3 - 1
            if dh == 0 and dw == 0:
                patch_ref[t * dz:(t + 1) * dz, :] = zin
            else:
                off = pad + dh * W + dw              # static lane offset
                patch_ref[t * dz:(t + 1) * dz, :] = (
                    zpad_ref[:, off:off + N] * mask_ref[t:t + 1, :])
        acc = jnp.dot(w_ref[...], patch_ref[...],
                      preferred_element_type=jnp.float32)
        return jnp.maximum(acc + b_ref[...], 0.0)

    h1 = conv3x3_relu(z, w_c1_ref, b_c1_ref)
    h2 = conv3x3_relu(h1, w_c2_ref, b_c2_ref)

    # --- target gather as a one-hot MXU matmul -------------------------------
    pix = jax.lax.broadcasted_iota(jnp.int32, (N, m * nt), 0)
    onehot = (pix == gidx_ref[...]).astype(jnp.float32)          # (N, m*nt)
    zt = jnp.dot(h2, onehot, preferred_element_type=jnp.float32)  # (dz, m*nt)

    # --- decoder MLP + Gaussian likelihood head (fused, transposed) ----------
    hd = jnp.maximum(
        jnp.dot(w_d1_ref[...], zt, preferred_element_type=jnp.float32)
        + b_d1_ref[...], 0.0)
    o = jnp.dot(w_hd_ref[...], hd,
                preferred_element_type=jnp.float32) + b_hd_ref[...]  # (2dy, m*nt)
    # rows [:dy] = mean, rows [dy:] = 0.01 + 0.99 * softplus(raw_std)
    row = jax.lax.broadcasted_iota(jnp.int32, o.shape, 0)
    out_ref[...] = jnp.where(row < dy, o, 0.01 + 0.99 * jax.nn.softplus(o))

    # TODO(synk): for production grid sizes (e.g. 256x256) the conv stage
    # should be row-tiled (grid axis + 2-row halo) so the im2col patch and
    # padded activation stay inside v5e's 16 MiB / v7x's 64 MiB VMEM.


# ------------------------------ full forward --------------------------------

@functools.partial(jax.jit, static_argnames=("nt",))
def gridded_convcnp_forward(params, mc, y, mt, *, nt):
    """mc/mt: (m, n1, n2) bool, y: (m, n1, n2, dy). Returns (mean, std), each
    (m, nt, dy). nt = per-row count of True targets (static, equal across the
    batch, as required by the torch code's torch.stack over z_grid[i][mt[i]];
    rows with fewer targets would silently gather pixel 0 via nonzero padding)."""
    m, H, W = mc.shape
    dy = y.shape[-1]
    dz = params["w_enc_y"].shape[-1]
    HW = H * W
    N = m * HW
    PAD = ((W + 1 + 127) // 128) * 128          # lane-aligned halo margin
    KE = ((dy + 1 + 7) // 8) * 8                # encoder K padded to sublane tile

    # --- target indices -> global flat indices (gather happens in-kernel) ---
    mt_flat = mt.reshape(m, HW)
    idx = jax.vmap(lambda r: jnp.nonzero(r, size=nt)[0])(mt_flat).astype(jnp.int32)
    gidx = (idx + (jnp.arange(m, dtype=jnp.int32) * HW)[:, None]).reshape(1, m * nt)

    # --- encoder input, transposed so pixels sit on lanes --------------------
    mcf = mc.astype(jnp.float32).reshape(m, HW)
    yc = y.astype(jnp.float32).reshape(m, HW, dy) * mcf[..., None]
    enc_rows = [jnp.transpose(yc, (2, 0, 1)).reshape(dy, N), mcf.reshape(1, N)]
    if KE > dy + 1:
        enc_rows.append(jnp.zeros((KE - dy - 1, N), jnp.float32))
    x_enc = jnp.concatenate(enc_rows, axis=0)                      # (KE, N)

    # --- static zero-padding masks for the 9 conv taps (periodic per batch) --
    p = np.arange(HW)
    hh, ww = p // W, p % W
    mask9 = np.zeros((9, HW), np.float32)
    for t in range(9):
        dh, dw = t // 3 - 1, t % 3 - 1
        mask9[t] = ((hh + dh >= 0) & (hh + dh < H) &
                    (ww + dw >= 0) & (ww + dw < W)).astype(np.float32)
    masks = jnp.asarray(np.tile(mask9, (1, m)))                    # (9, N)

    # --- host-side weight repacking (all f32) --------------------------------
    enc_w_rows = [params["w_enc_y"],
                  jnp.sum(params["w_enc_m"], axis=0, keepdims=True)]
    if KE > dy + 1:
        enc_w_rows.append(jnp.zeros((KE - dy - 1, dz), jnp.float32))
    w_enc_T = jnp.concatenate(enc_w_rows, axis=0).T                # (dz, KE)
    b_enc_c = params["b_enc"].reshape(dz, 1)
    w_c1_p = jnp.transpose(params["w_conv1"], (3, 0, 1, 2)).reshape(dz, 9 * dz)
    b_c1_c = params["b_conv1"].reshape(dz, 1)
    w_c2_p = jnp.transpose(params["w_conv2"], (3, 0, 1, 2)).reshape(dz, 9 * dz)
    b_c2_c = params["b_conv2"].reshape(dz, 1)
    w_d1_T = params["w_dec1"].T
    b_d1_c = params["b_dec1"].reshape(dz, 1)
    w_hd_T = jnp.concatenate([params["w_mean"], params["w_std"]], axis=-1).T
    b_hd_c = jnp.concatenate([params["b_mean"], params["b_std"]], axis=-1).reshape(2 * dy, 1)

    kernel = functools.partial(
        _fused_convcnp_kernel, m=m, H=H, W=W, dy=dy, dz=dz, nt=nt, pad=PAD)
    out = pl.pallas_call(
        kernel,
        out_shape=jax.ShapeDtypeStruct((2 * dy, m * nt), jnp.float32),
        scratch_shapes=[
            pltpu.VMEM((dz, N + 2 * PAD), jnp.float32),   # lane-padded halo
            pltpu.VMEM((9 * dz, N), jnp.float32),         # im2col patch
        ],
    )(x_enc, masks, gidx,
      w_enc_T, b_enc_c, w_c1_p, b_c1_c, w_c2_p, b_c2_c,
      w_d1_T, b_d1_c, w_hd_T, b_hd_c)

    o3 = out.reshape(2 * dy, m, nt)
    mean = jnp.transpose(o3[:dy], (1, 2, 0))
    std = jnp.transpose(o3[dy:], (1, 2, 0))
    # TODO(synk): torch.distributions.Normal has no JAX/Pallas-array equivalent;
    # we return the (mean, std) parameter arrays instead.
    return mean, std


# ------------------------- pure-JAX f32 reference ----------------------------

def _reference_forward(params, mc, y, mt, nt):
    m, H, W = mc.shape
    dy = y.shape[-1]
    mc_ = jnp.repeat(mc[..., None].astype(jnp.float32), dy, axis=-1)
    yc = y.astype(jnp.float32) * mc_
    zg = jnp.concatenate([yc, mc_], axis=-1)
    w_enc = jnp.concatenate([params["w_enc_y"], params["w_enc_m"]], axis=0)
    zg = zg @ w_enc + params["b_enc"]
    def conv(x, w, b):
        o = jax.lax.conv_general_dilated(
            x, w, (1, 1), "SAME", dimension_numbers=("NHWC", "HWIO", "NHWC"))
        return jax.nn.relu(o + b)
    zg = conv(zg, params["w_conv1"], params["b_conv1"])
    zg = conv(zg, params["w_conv2"], params["b_conv2"])
    zg = zg.reshape(m, H * W, -1)
    mt_flat = mt.reshape(m, H * W)
    zt = jnp.stack([zg[i][jnp.nonzero(mt_flat[i], size=nt)[0]] for i in range(m)])
    h = jax.nn.relu(zt @ params["w_dec1"] + params["b_dec1"])
    mean = h @ params["w_mean"] + params["b_mean"]
    std = 0.01 + 0.99 * jax.nn.softplus(h @ params["w_std"] + params["b_std"])
    return mean, std


# ------------------------------ parameter init -------------------------------

def init_params(key, dy, dz):
    def lin(k, fan_in, fan_out):
        bound = 1.0 / jnp.sqrt(fan_in)
        kw, kb = jax.random.split(k)
        w = jax.random.uniform(kw, (fan_in, fan_out), jnp.float32, -bound, bound)
        b = jax.random.uniform(kb, (1, fan_out), jnp.float32, -bound, bound)
        return w, b

    ks = jax.random.split(key, 8)
    # z_encoder: Linear(2*dy -> dz); split rows into y-part and mask-part.
    w_enc, b_enc = lin(ks[0], 2 * dy, dz)
    w_enc_y, w_enc_m = w_enc[:dy], w_enc[dy:]
    # conv_net: two Conv2d(dz, dz, 3, padding=1), weights stored (kh, kw, Cin, Cout).
    cbound = 1.0 / jnp.sqrt(9.0 * dz)
    w_conv1 = jax.random.uniform(ks[1], (3, 3, dz, dz), jnp.float32, -cbound, cbound)
    b_conv1 = jax.random.uniform(ks[2], (1, dz), jnp.float32, -cbound, cbound)
    w_conv2 = jax.random.uniform(ks[3], (3, 3, dz, dz), jnp.float32, -cbound, cbound)
    b_conv2 = jax.random.uniform(ks[4], (1, dz), jnp.float32, -cbound, cbound)
    # decoder MLP: dz -> dz (ReLU) -> 2*dy (split into mean / raw-std heads).
    w_dec1, b_dec1 = lin(ks[5], dz, dz)
    w_out, b_out = lin(ks[6], dz, 2 * dy)
    return dict(
        w_enc_y=w_enc_y, w_enc_m=w_enc_m, b_enc=b_enc,
        w_conv1=w_conv1, b_conv1=b_conv1,
        w_conv2=w_conv2, b_conv2=b_conv2,
        w_dec1=w_dec1, b_dec1=b_dec1,
        w_mean=w_out[:, :dy], b_mean=b_out[:, :dy],
        w_std=w_out[:, dy:], b_std=b_out[:, dy:],
    )


# ----------------------------------- main ------------------------------------

if __name__ == "__main__":
    m, H, W, dy, dz, nt = 2, 16, 16, 2, 32, 8

    key = jax.random.PRNGKey(0)
    k_y, k_mc, k_mt, k_p = jax.random.split(key, 4)

    y = jax.random.normal(k_y, (m, H, W, dy), jnp.float32)
    mc = jax.random.bernoulli(k_mc, 0.5, (m, H, W))

    # Target mask with exactly nt True entries per batch element (torch.stack
    # over z_grid[i][mt[i]] requires equal counts).
    rows = []
    for i in range(m):
        ki = jax.random.fold_in(k_mt, i)
        tidx = jax.random.permutation(ki, H * W)[:nt]
        rows.append(jnp.zeros((H * W,), bool).at[tidx].set(True))
    mt = jnp.stack(rows).reshape(m, H, W)

    params = init_params(k_p, dy, dz)

    mean, std = gridded_convcnp_forward(params, mc, y, mt, nt=nt)
    jax.block_until_ready((mean, std))

    ref_mean, ref_std = _reference_forward(params, mc, y, mt, nt)

    assert mean.shape == (m, nt, dy) and std.shape == (m, nt, dy)
    assert bool(jnp.all(std > 0.0))
    assert bool(jnp.allclose(mean, ref_mean, atol=5e-2, rtol=5e-2))
    assert bool(jnp.allclose(std, ref_std, atol=5e-2, rtol=5e-2))
    print("KERNEL_OK")
</pallas_src>

<mosaic_0001>
module attributes {stable_mosaic.version = 11 : i64} {
  func.func @_fused_convcnp_kernel(%arg0: memref<8x512xf32, #tpu.memory_space<vmem>>, %arg1: memref<9x512xf32, #tpu.memory_space<vmem>>, %arg2: memref<1x16xi32, #tpu.memory_space<vmem>>, %arg3: memref<32x8xf32, #tpu.memory_space<vmem>>, %arg4: memref<32x1xf32, #tpu.memory_space<vmem>>, %arg5: memref<32x288xf32, #tpu.memory_space<vmem>>, %arg6: memref<32x1xf32, #tpu.memory_space<vmem>>, %arg7: memref<32x288xf32, #tpu.memory_space<vmem>>, %arg8: memref<32x1xf32, #tpu.memory_space<vmem>>, %arg9: memref<32x32xf32, #tpu.memory_space<vmem>>, %arg10: memref<32x1xf32, #tpu.memory_space<vmem>>, %arg11: memref<4x32xf32, #tpu.memory_space<vmem>>, %arg12: memref<4x1xf32, #tpu.memory_space<vmem>>, %arg13: memref<4x16xf32, #tpu.memory_space<vmem>>, %arg14: memref<32x768xf32, #tpu.memory_space<vmem>>, %arg15: memref<288x512xf32, #tpu.memory_space<vmem>>) attributes {dimension_semantics = [], scalar_prefetch = 0 : i64, scratch_operands = 2 : i64, tpu.core_type = #tpu.core_type<tc>} {
    %cst = arith.constant 0.000000e+00 : f32
    %0 = vector.broadcast %cst : f32 to vector<32x128xf32>
    %c0 = arith.constant 0 : index
    %c0_0 = arith.constant 0 : index
    %1 = vector.load %arg14[%c0, %c0_0] : memref<32x768xf32, #tpu.memory_space<vmem>>, vector<32x128xf32>
    tpu.vector_store %arg14[%c0, %c0_0], %0 {strides = array<i32>} : memref<32x768xf32, #tpu.memory_space<vmem>>, vector<32x128xf32>,
    %cst_1 = arith.constant 0.000000e+00 : f32
    %2 = vector.broadcast %cst_1 : f32 to vector<32x128xf32>
    %c0_2 = arith.constant 0 : index
    %c640 = arith.constant 640 : index
    %3 = vector.load %arg14[%c0_2, %c640] : memref<32x768xf32, #tpu.memory_space<vmem>>, vector<32x128xf32>
    tpu.vector_store %arg14[%c0_2, %c640], %2 {strides = array<i32>} : memref<32x768xf32, #tpu.memory_space<vmem>>, vector<32x128xf32>,
    %c0_3 = arith.constant 0 : index
    %c0_4 = arith.constant 0 : index
    %4 = vector.load %arg3[%c0_3, %c0_4] : memref<32x8xf32, #tpu.memory_space<vmem>>, vector<32x8xf32>
    %c0_5 = arith.constant 0 : index
    %c0_6 = arith.constant 0 : index
    %5 = vector.load %arg0[%c0_5, %c0_6] : memref<8x512xf32, #tpu.memory_space<vmem>>, vector<8x512xf32>
    %cst_7 = arith.constant dense<0.000000e+00> : vector<32x512xf32>
    %6 = tpu.matmul %4, %5, %cst_7 {dimension_numbers = #tpu.dot_dimension_numbers<[1], [0], [0], [1], [0, 0, 1, 1], [], []>} : vector<32x8xf32>, vector<8x512xf32>, vector<32x512xf32> -> vector<32x512xf32>
    %c0_8 = arith.constant 0 : index
    %c0_9 = arith.constant 0 : index
    %7 = vector.load %arg4[%c0_8, %c0_9] : memref<32x1xf32, #tpu.memory_space<vmem>>, vector<32x1xf32>
    %8 = vector.broadcast %7 : vector<32x1xf32> to vector<32x512xf32>
    %9 = arith.addf %6, %8 : vector<32x512xf32>
    %c0_10 = arith.constant 0 : index
    %c128 = arith.constant 128 : index
    %10 = vector.load %arg14[%c0_10, %c128] : memref<32x768xf32, #tpu.memory_space<vmem>>, vector<32x512xf32>
    tpu.vector_store %arg14[%c0_10, %c128], %9 {strides = array<i32>} : memref<32x768xf32, #tpu.memory_space<vmem>>, vector<32x512xf32>,
    %c0_11 = arith.constant 0 : index
    %c111 = arith.constant 111 : index
    %11 = vector.load %arg14[%c0_11, %c111] : memref<32x768xf32, #tpu.memory_space<vmem>>, vector<32x512xf32>
    %c0_12 = arith.constant 0 : index
    %c0_13 = arith.constant 0 : index
    %12 = vector.load %arg1[%c0_12, %c0_13] : memref<9x512xf32, #tpu.memory_space<vmem>>, vector<1x512xf32>
    %13 = vector.broadcast %12 : vector<1x512xf32> to vector<32x512xf32>
    %14 = arith.mulf %11, %13 : vector<32x512xf32>
    %c0_14 = arith.constant 0 : index
    %c0_15 = arith.constant 0 : index
    %15 = vector.load %arg15[%c0_14, %c0_15] : memref<288x512xf32, #tpu.memory_space<vmem>>, vector<32x512xf32>
    tpu.vector_store %arg15[%c0_14, %c0_15], %14 {strides = array<i32>} : memref<288x512xf32, #tpu.memory_space<vmem>>, vector<32x512xf32>,
    %c0_16 = arith.constant 0 : index
    %c112 = arith.constant 112 : index
    %16 = vector.load %arg14[%c0_16, %c112] : memref<32x768xf32, #tpu.memory_space<vmem>>, vector<32x512xf32>
    %c1 = arith.constant 1 : index
    %c0_17 = arith.constant 0 : index
    %17 = vector.load %arg1[%c1, %c0_17] : memref<9x512xf32, #tpu.memory_space<vmem>>, vector<1x512xf32>
    %18 = vector.broadcast %17 : vector<1x512xf32> to vector<32x512xf32>
    %19 = arith.mulf %16, %18 : vector<32x512xf32>
    %c32 = arith.constant 32 : index
    %c0_18 = arith.constant 0 : index
    %20 = vector.load %arg15[%c32, %c0_18] : memref<288x512xf32, #tpu.memory_space<vmem>>, vector<32x512xf32>
    tpu.vector_store %arg15[%c32, %c0_18], %19 {strides = array<i32>} : memref<288x512xf32, #tpu.memory_space<vmem>>, vector<32x512xf32>,
    %c0_19 = arith.constant 0 : index
    %c113 = arith.constant 113 : index
    %21 = vector.load %arg14[%c0_19, %c113] : memref<32x768xf32, #tpu.memory_space<vmem>>, vector<32x512xf32>
    %c2 = arith.constant 2 : index
    %c0_20 = arith.constant 0 : index
    %22 = vector.load %arg1[%c2, %c0_20] : memref<9x512xf32, #tpu.memory_space<vmem>>, vector<1x512xf32>
    %23 = vector.broadcast %22 : vector<1x512xf32> to vector<32x512xf32>
    %24 = arith.mulf %21, %23 : vector<32x512xf32>
    %c64 = arith.constant 64 : index
    %c0_21 = arith.constant 0 : index
    %25 = vector.load %arg15[%c64, %c0_21] : memref<288x512xf32, #tpu.memory_space<vmem>>, vector<32x512xf32>
    tpu.vector_store %arg15[%c64, %c0_21], %24 {strides = array<i32>} : memref<288x512xf32, #tpu.memory_space<vmem>>, vector<32x512xf32>,
    %c0_22 = arith.constant 0 : index
    %c127 = arith.constant 127 : index
    %26 = vector.load %arg14[%c0_22, %c127] : memref<32x768xf32, #tpu.memory_space<vmem>>, vector<32x512xf32>
    %c3 = arith.constant 3 : index
    %c0_23 = arith.constant 0 : index
    %27 = vector.load %arg1[%c3, %c0_23] : memref<9x512xf32, #tpu.memory_space<vmem>>, vector<1x512xf32>
    %28 = vector.broadcast %27 : vector<1x512xf32> to vector<32x512xf32>
    %29 = arith.mulf %26, %28 : vector<32x512xf32>
    %c96 = arith.constant 96 : index
    %c0_24 = arith.constant 0 : index
    %30 = vector.load %arg15[%c96, %c0_24] : memref<288x512xf32, #tpu.memory_space<vmem>>, vector<32x512xf32>
    tpu.vector_store %arg15[%c96, %c0_24], %29 {strides = array<i32>} : memref<288x512xf32, #tpu.memory_space<vmem>>, vector<32x512xf32>,
    %c128_25 = arith.constant 128 : index
    %c0_26 = arith.constant 0 : index
    %31 = vector.load %arg15[%c128_25, %c0_26] : memref<288x512xf32, #tpu.memory_space<vmem>>, vector<32x512xf32>
    tpu.vector_store %arg15[%c128_25, %c0_26], %9 {strides = array<i32>} : memref<288x512xf32, #tpu.memory_space<vmem>>, vector<32x512xf32>,
    %c0_27 = arith.constant 0 : index
    %c129 = arith.constant 129 : index
    %32 = vector.load %arg14[%c0_27, %c129] : memref<32x768xf32, #tpu.memory_space<vmem>>, vector<32x512xf32>
    %c5 = arith.constant 5 : index
    %c0_28 = arith.constant 0 : index
    %33 = vector.load %arg1[%c5, %c0_28] : memref<9x512xf32, #tpu.memory_space<vmem>>, vector<1x512xf32>
    %34 = vector.broadcast %33 : vector<1x512xf32> to vector<32x512xf32>
    %35 = arith.mulf %32, %34 : vector<32x512xf32>
    %c160 = arith.constant 160 : index
    %c0_29 = arith.constant 0 : index
    %36 = vector.load %arg15[%c160, %c0_29] : memref<288x512xf32, #tpu.memory_space<vmem>>, vector<32x512xf32>
    tpu.vector_store %arg15[%c160, %c0_29], %35 {strides = array<i32>} : memref<288x512xf32, #tpu.memory_space<vmem>>, vector<32x512xf32>,
    %c0_30 = arith.constant 0 : index
    %c143 = arith.constant 143 : index
    %37 = vector.load %arg14[%c0_30, %c143] : memref<32x768xf32, #tpu.memory_space<vmem>>, vector<32x512xf32>
    %c6 = arith.constant 6 : index
    %c0_31 = arith.constant 0 : index
    %38 = vector.load %arg1[%c6, %c0_31] : memref<9x512xf32, #tpu.memory_space<vmem>>, vector<1x512xf32>
    %39 = vector.broadcast %38 : vector<1x512xf32> to vector<32x512xf32>
    %40 = arith.mulf %37, %39 : vector<32x512xf32>
    %c192 = arith.constant 192 : index
    %c0_32 = arith.constant 0 : index
    %41 = vector.load %arg15[%c192, %c0_32] : memref<288x512xf32, #tpu.memory_space<vmem>>, vector<32x512xf32>
    tpu.vector_store %arg15[%c192, %c0_32], %40 {strides = array<i32>} : memref<288x512xf32, #tpu.memory_space<vmem>>, vector<32x512xf32>,
    %c0_33 = arith.constant 0 : index
    %c144 = arith.constant 144 : index
    %42 = vector.load %arg14[%c0_33, %c144] : memref<32x768xf32, #tpu.memory_space<vmem>>, vector<32x512xf32>
    %c7 = arith.constant 7 : index
    %c0_34 = arith.constant 0 : index
    %43 = vector.load %arg1[%c7, %c0_34] : memref<9x512xf32, #tpu.memory_space<vmem>>, vector<1x512xf32>
    %44 = vector.broadcast %43 : vector<1x512xf32> to vector<32x512xf32>
    %45 = arith.mulf %42, %44 : vector<32x512xf32>
    %c224 = arith.constant 224 : index
    %c0_35 = arith.constant 0 : index
    %46 = vector.load %arg15[%c224, %c0_35] : memref<288x512xf32, #tpu.memory_space<vmem>>, vector<32x512xf32>
    tpu.vector_store %arg15[%c224, %c0_35], %45 {strides = array<i32>} : memref<288x512xf32, #tpu.memory_space<vmem>>, vector<32x512xf32>,
    %c0_36 = arith.constant 0 : index
    %c145 = arith.constant 145 : index
    %47 = vector.load %arg14[%c0_36, %c145] : memref<32x768xf32, #tpu.memory_space<vmem>>, vector<32x512xf32>
    %c8 = arith.constant 8 : index
    %c0_37 = arith.constant 0 : index
    %48 = vector.load %arg1[%c8, %c0_37] : memref<9x512xf32, #tpu.memory_space<vmem>>, vector<1x512xf32>
    %49 = vector.broadcast %48 : vector<1x512xf32> to vector<32x512xf32>
    %50 = arith.mulf %47, %49 : vector<32x512xf32>
    %c256 = arith.constant 256 : index
    %c0_38 = arith.constant 0 : index
    %51 = vector.load %arg15[%c256, %c0_38] : memref<288x512xf32, #tpu.memory_space<vmem>>, vector<32x512xf32>
    tpu.vector_store %arg15[%c256, %c0_38], %50 {strides = array<i32>} : memref<288x512xf32, #tpu.memory_space<vmem>>, vector<32x512xf32>,
    %c0_39 = arith.constant 0 : index
    %c0_40 = arith.constant 0 : index
    %52 = vector.load %arg5[%c0_39, %c0_40] : memref<32x288xf32, #tpu.memory_space<vmem>>, vector<32x288xf32>
    %c0_41 = arith.constant 0 : index
    %c0_42 = arith.constant 0 : index
    %53 = vector.load %arg15[%c0_41, %c0_42] : memref<288x512xf32, #tpu.memory_space<vmem>>, vector<288x512xf32>
    %cst_43 = arith.constant dense<0.000000e+00> : vector<32x512xf32>
    %54 = tpu.matmul %52, %53, %cst_43 {dimension_numbers = #tpu.dot_dimension_numbers<[1], [0], [0], [1], [0, 0, 1, 1], [], []>} : vector<32x288xf32>, vector<288x512xf32>, vector<32x512xf32> -> vector<32x512xf32>
    %c0_44 = arith.constant 0 : index
    %c0_45 = arith.constant 0 : index
    %55 = vector.load %arg6[%c0_44, %c0_45] : memref<32x1xf32, #tpu.memory_space<vmem>>, vector<32x1xf32>
    %56 = vector.broadcast %55 : vector<32x1xf32> to vector<32x512xf32>
    %57 = arith.addf %54, %56 : vector<32x512xf32>
    %cst_46 = arith.constant 0.000000e+00 : f32
    %58 = vector.broadcast %cst_46 : f32 to vector<32x512xf32>
    %59 = arith.maximumf %57, %58 : vector<32x512xf32>
    %c0_47 = arith.constant 0 : index
    %c128_48 = arith.constant 128 : index
    %60 = vector.load %arg14[%c0_47, %c128_48] : memref<32x768xf32, #tpu.memory_space<vmem>>, vector<32x512xf32>
    tpu.vector_store %arg14[%c0_47, %c128_48], %59 {strides = array<i32>} : memref<32x768xf32, #tpu.memory_space<vmem>>, vector<32x512xf32>,
    %c0_49 = arith.constant 0 : index
    %c111_50 = arith.constant 111 : index
    %61 = vector.load %arg14[%c0_49, %c111_50] : memref<32x768xf32, #tpu.memory_space<vmem>>, vector<32x512xf32>
    %c0_51 = arith.constant 0 : index
    %c0_52 = arith.constant 0 : index
    %62 = vector.load %arg1[%c0_51, %c0_52] : memref<9x512xf32, #tpu.memory_space<vmem>>, vector<1x512xf32>
    %63 = vector.broadcast %62 : vector<1x512xf32> to vector<32x512xf32>
    %64 = arith.mulf %61, %63 : vector<32x512xf32>
    %c0_53 = arith.constant 0 : index
    %c0_54 = arith.constant 0 : index
    %65 = vector.load %arg15[%c0_53, %c0_54] : memref<288x512xf32, #tpu.memory_space<vmem>>, vector<32x512xf32>
    tpu.vector_store %arg15[%c0_53, %c0_54], %64 {strides = array<i32>} : memref<288x512xf32, #tpu.memory_space<vmem>>, vector<32x512xf32>,
    %c0_55 = arith.constant 0 : index
    %c112_56 = arith.constant 112 : index
    %66 = vector.load %arg14[%c0_55, %c112_56] : memref<32x768xf32, #tpu.memory_space<vmem>>, vector<32x512xf32>
    %c1_57 = arith.constant 1 : index
    %c0_58 = arith.constant 0 : index
    %67 = vector.load %arg1[%c1_57, %c0_58] : memref<9x512xf32, #tpu.memory_space<vmem>>, vector<1x512xf32>
    %68 = vector.broadcast %67 : vector<1x512xf32> to vector<32x512xf32>
    %69 = arith.mulf %66, %68 : vector<32x512xf32>
    %c32_59 = arith.constant 32 : index
    %c0_60 = arith.constant 0 : index
    %70 = vector.load %arg15[%c32_59, %c0_60] : memref<288x512xf32, #tpu.memory_space<vmem>>, vector<32x512xf32>
    tpu.vector_store %arg15[%c32_59, %c0_60], %69 {strides = array<i32>} : memref<288x512xf32, #tpu.memory_space<vmem>>, vector<32x512xf32>,
    %c0_61 = arith.constant 0 : index
    %c113_62 = arith.constant 113 : index
    %71 = vector.load %arg14[%c0_61, %c113_62] : memref<32x768xf32, #tpu.memory_space<vmem>>, vector<32x512xf32>
    %c2_63 = arith.constant 2 : index
    %c0_64 = arith.constant 0 : index
    %72 = vector.load %arg1[%c2_63, %c0_64] : memref<9x512xf32, #tpu.memory_space<vmem>>, vector<1x512xf32>
    %73 = vector.broadcast %72 : vector<1x512xf32> to vector<32x512xf32>
    %74 = arith.mulf %71, %73 : vector<32x512xf32>
    %c64_65 = arith.constant 64 : index
    %c0_66 = arith.constant 0 : index
    %75 = vector.load %arg15[%c64_65, %c0_66] : memref<288x512xf32, #tpu.memory_space<vmem>>, vector<32x512xf32>
    tpu.vector_store %arg15[%c64_65, %c0_66], %74 {strides = array<i32>} : memref<288x512xf32, #tpu.memory_space<vmem>>, vector<32x512xf32>,
    %c0_67 = arith.constant 0 : index
    %c127_68 = arith.constant 127 : index
    %76 = vector.load %arg14[%c0_67, %c127_68] : memref<32x768xf32, #tpu.memory_space<vmem>>, vector<32x512xf32>
    %c3_69 = arith.constant 3 : index
    %c0_70 = arith.constant 0 : index
    %77 = vector.load %arg1[%c3_69, %c0_70] : memref<9x512xf32, #tpu.memory_space<vmem>>, vector<1x512xf32>
    %78 = vector.broadcast %77 : vector<1x512xf32> to vector<32x512xf32>
    %79 = arith.mulf %76, %78 : vector<32x512xf32>
    %c96_71 = arith.constant 96 : index
    %c0_72 = arith.constant 0 : index
    %80 = vector.load %arg15[%c96_71, %c0_72] : memref<288x512xf32, #tpu.memory_space<vmem>>, vector<32x512xf32>
    tpu.vector_store %arg15[%c96_71, %c0_72], %79 {strides = array<i32>} : memref<288x512xf32, #tpu.memory_space<vmem>>, vector<32x512xf32>,
    %c128_73 = arith.constant 128 : index
    %c0_74 = arith.constant 0 : index
    %81 = vector.load %arg15[%c128_73, %c0_74] : memref<288x512xf32, #tpu.memory_space<vmem>>, vector<32x512xf32>
    tpu.vector_store %arg15[%c128_73, %c0_74], %59 {strides = array<i32>} : memref<288x512xf32, #tpu.memory_space<vmem>>, vector<32x512xf32>,
    %c0_75 = arith.constant 0 : index
    %c129_76 = arith.constant 129 : index
    %82 = vector.load %arg14[%c0_75, %c129_76] : memref<32x768xf32, #tpu.memory_space<vmem>>, vector<32x512xf32>
    %c5_77 = arith.constant 5 : index
    %c0_78 = arith.constant 0 : index
    %83 = vector.load %arg1[%c5_77, %c0_78] : memref<9x512xf32, #tpu.memory_space<vmem>>, vector<1x512xf32>
    %84 = vector.broadcast %83 : vector<1x512xf32> to vector<32x512xf32>
    %85 = arith.mulf %82, %84 : vector<32x512xf32>
    %c160_79 = arith.constant 160 : index
    %c0_80 = arith.constant 0 : index
    %86 = vector.load %arg15[%c160_79, %c0_80] : memref<288x512xf32, #tpu.memory_space<vmem>>, vector<32x512xf32>
    tpu.vector_store %arg15[%c160_79, %c0_80], %85 {strides = array<i32>} : memref<288x512xf32, #tpu.memory_space<vmem>>, vector<32x512xf32>,
    %c0_81 = arith.constant 0 : index
    %c143_82 = arith.constant 143 : index
    %87 = vector.load %arg14[%c0_81, %c143_82] : memref<32x768xf32, #tpu.memory_space<vmem>>, vector<32x512xf32>
    %c6_83 = arith.constant 6 : index
    %c0_84 = arith.constant 0 : index
    %88 = vector.load %arg1[%c6_83, %c0_84] : memref<9x512xf32, #tpu.memory_space<vmem>>, vector<1x512xf32>
    %89 = vector.broadcast %88 : vector<1x512xf32> to vector<32x512xf32>
    %90 = arith.mulf %87, %89 : vector<32x512xf32>
    %c192_85 = arith.constant 192 : index
    %c0_86 = arith.constant 0 : index
    %91 = vector.load %arg15[%c192_85, %c0_86] : memref<288x512xf32, #tpu.memory_space<vmem>>, vector<32x512xf32>
    tpu.vector_store %arg15[%c192_85, %c0_86], %90 {strides = array<i32>} : memref<288x512xf32, #tpu.memory_space<vmem>>, vector<32x512xf32>,
    %c0_87 = arith.constant 0 : index
    %c144_88 = arith.constant 144 : index
    %92 = vector.load %arg14[%c0_87, %c144_88] : memref<32x768xf32, #tpu.memory_space<vmem>>, vector<32x512xf32>
    %c7_89 = arith.constant 7 : index
    %c0_90 = arith.constant 0 : index
    %93 = vector.load %arg1[%c7_89, %c0_90] : memref<9x512xf32, #tpu.memory_space<vmem>>, vector<1x512xf32>
    %94 = vector.broadcast %93 : vector<1x512xf32> to vector<32x512xf32>
    %95 = arith.mulf %92, %94 : vector<32x512xf32>
    %c224_91 = arith.constant 224 : index
    %c0_92 = arith.constant 0 : index
    %96 = vector.load %arg15[%c224_91, %c0_92] : memref<288x512xf32, #tpu.memory_space<vmem>>, vector<32x512xf32>
    tpu.vector_store %arg15[%c224_91, %c0_92], %95 {strides = array<i32>} : memref<288x512xf32, #tpu.memory_space<vmem>>, vector<32x512xf32>,
    %c0_93 = arith.constant 0 : index
    %c145_94 = arith.constant 145 : index
    %97 = vector.load %arg14[%c0_93, %c145_94] : memref<32x768xf32, #tpu.memory_space<vmem>>, vector<32x512xf32>
    %c8_95 = arith.constant 8 : index
    %c0_96 = arith.constant 0 : index
    %98 = vector.load %arg1[%c8_95, %c0_96] : memref<9x512xf32, #tpu.memory_space<vmem>>, vector<1x512xf32>
    %99 = vector.broadcast %98 : vector<1x512xf32> to vector<32x512xf32>
    %100 = arith.mulf %97, %99 : vector<32x512xf32>
    %c256_97 = arith.constant 256 : index
    %c0_98 = arith.constant 0 : index
    %101 = vector.load %arg15[%c256_97, %c0_98] : memref<288x512xf32, #tpu.memory_space<vmem>>, vector<32x512xf32>
    tpu.vector_store %arg15[%c256_97, %c0_98], %100 {strides = array<i32>} : memref<288x512xf32, #tpu.memory_space<vmem>>, vector<32x512xf32>,
    %c0_99 = arith.constant 0 : index
    %c0_100 = arith.constant 0 : index
    %102 = vector.load %arg7[%c0_99, %c0_100] : memref<32x288xf32, #tpu.memory_space<vmem>>, vector<32x288xf32>
    %c0_101 = arith.constant 0 : index
    %c0_102 = arith.constant 0 : index
    %103 = vector.load %arg15[%c0_101, %c0_102] : memref<288x512xf32, #tpu.memory_space<vmem>>, vector<288x512xf32>
    %cst_103 = arith.constant dense<0.000000e+00> : vector<32x512xf32>
    %104 = tpu.matmul %102, %103, %cst_103 {dimension_numbers = #tpu.dot_dimension_numbers<[1], [0], [0], [1], [0, 0, 1, 1], [], []>} : vector<32x288xf32>, vector<288x512xf32>, vector<32x512xf32> -> vector<32x512xf32>
    %c0_104 = arith.constant 0 : index
    %c0_105 = arith.constant 0 : index
    %105 = vector.load %arg8[%c0_104, %c0_105] : memref<32x1xf32, #tpu.memory_space<vmem>>, vector<32x1xf32>
    %106 = vector.broadcast %105 : vector<32x1xf32> to vector<32x512xf32>
    %107 = arith.addf %104, %106 : vector<32x512xf32>
    %cst_106 = arith.constant 0.000000e+00 : f32
    %108 = vector.broadcast %cst_106 : f32 to vector<32x512xf32>
    %109 = arith.maximumf %107, %108 : vector<32x512xf32>
    %110 = tpu.iota {dimensions = array<i32: 0>} : vector<512x16xi32>
    %c0_107 = arith.constant 0 : index
    %c0_108 = arith.constant 0 : index
    %111 = vector.load %arg2[%c0_107, %c0_108] : memref<1x16xi32, #tpu.memory_space<vmem>>, vector<1x16xi32>
    %112 = vector.broadcast %111 : vector<1x16xi32> to vector<512x16xi32>
    %113 = arith.cmpi eq, %110, %112 : vector<512x16xi32>
    %114 = arith.extui %113 : vector<512x16xi1> to vector<512x16xi32>
    %115 = arith.sitofp %114 : vector<512x16xi32> to vector<512x16xf32>
    %cst_109 = arith.constant dense<0.000000e+00> : vector<32x16xf32>
    %116 = tpu.matmul %109, %115, %cst_109 {dimension_numbers = #tpu.dot_dimension_numbers<[1], [0], [0], [1], [0, 0, 1, 1], [], []>} : vector<32x512xf32>, vector<512x16xf32>, vector<32x16xf32> -> vector<32x16xf32>
    %c0_110 = arith.constant 0 : index
    %c0_111 = arith.constant 0 : index
    %117 = vector.load %arg9[%c0_110, %c0_111] : memref<32x32xf32, #tpu.memory_space<vmem>>, vector<32x32xf32>
    %cst_112 = arith.constant dense<0.000000e+00> : vector<32x16xf32>
    %118 = tpu.matmul %117, %116, %cst_112 {dimension_numbers = #tpu.dot_dimension_numbers<[1], [0], [0], [1], [0, 0, 1, 1], [], []>} : vector<32x32xf32>, vector<32x16xf32>, vector<32x16xf32> -> vector<32x16xf32>
    %c0_113 = arith.constant 0 : index
    %c0_114 = arith.constant 0 : index
    %119 = vector.load %arg10[%c0_113, %c0_114] : memref<32x1xf32, #tpu.memory_space<vmem>>, vector<32x1xf32>
    %120 = vector.broadcast %119 : vector<32x1xf32> to vector<32x16xf32>
    %121 = arith.addf %118, %120 : vector<32x16xf32>
    %cst_115 = arith.constant 0.000000e+00 : f32
    %122 = vector.broadcast %cst_115 : f32 to vector<32x16xf32>
    %123 = arith.maximumf %121, %122 : vector<32x16xf32>
    %c0_116 = arith.constant 0 : index
    %c0_117 = arith.constant 0 : index
    %124 = vector.load %arg11[%c0_116, %c0_117] : memref<4x32xf32, #tpu.memory_space<vmem>>, vector<4x32xf32>
    %cst_118 = arith.constant dense<0.000000e+00> : vector<4x16xf32>
    %125 = tpu.matmul %124, %123, %cst_118 {dimension_numbers = #tpu.dot_dimension_numbers<[1], [0], [0], [1], [0, 0, 1, 1], [], []>} : vector<4x32xf32>, vector<32x16xf32>, vector<4x16xf32> -> vector<4x16xf32>
    %c0_119 = arith.constant 0 : index
    %c0_120 = arith.constant 0 : index
    %126 = vector.load %arg12[%c0_119, %c0_120] : memref<4x1xf32, #tpu.memory_space<vmem>>, vector<4x1xf32>
    %127 = vector.broadcast %126 : vector<4x1xf32> to vector<4x16xf32>
    %128 = arith.addf %125, %127 : vector<4x16xf32>
    %129 = tpu.iota {dimensions = array<i32: 0>} : vector<4x16xi32>
    %c2_i32 = arith.constant 2 : i32
    %130 = vector.broadcast %c2_i32 : i32 to vector<4x16xi32>
    %131 = arith.cmpi slt, %129, %130 : vector<4x16xi32>
    %cst_121 = arith.constant 0.000000e+00 : f32
    %132 = vector.broadcast %cst_121 : f32 to vector<4x16xf32>
    %133 = arith.maximumf %128, %132 : vector<4x16xf32>
    %134 = vector.broadcast %cst_121 : f32 to vector<4x16xf32>
    %135 = arith.subf %128, %134 : vector<4x16xf32>
    %136 = arith.cmpf one, %135, %135 : vector<4x16xf32>
    %137 = vector.broadcast %cst_121 : f32 to vector<4x16xf32>
    %138 = arith.addf %128, %137 : vector<4x16xf32>
    %139 = math.absf %135 : vector<4x16xf32>
    %cst_122 = arith.constant 0.000000e+00 : f32
    %140 = vector.broadcast %cst_122 : f32 to vector<4x16xf32>
    %141 = arith.subf %140, %139 : vector<4x16xf32>
    %142 = math.exp %141 : vector<4x16xf32>
    %143 = math.log1p %142 : vector<4x16xf32>
    %144 = arith.addf %133, %143 : vector<4x16xf32>
    %145 = arith.select %136, %138, %144 : vector<4x16xi1>, vector<4x16xf32>
    %cst_123 = arith.constant 9.900000e-01 : f32
    %146 = vector.broadcast %cst_123 : f32 to vector<4x16xf32>
    %147 = arith.mulf %146, %145 : vector<4x16xf32>
    %cst_124 = arith.constant 0.00999999977 : f32
    %148 = vector.broadcast %cst_124 : f32 to vector<4x16xf32>
    %149 = arith.addf %148, %147 : vector<4x16xf32>
    %150 = arith.select %131, %128, %149 : vector<4x16xi1>, vector<4x16xf32>
    %c0_125 = arith.constant 0 : index
    %c0_126 = arith.constant 0 : index
    %151 = vector.load %arg13[%c0_125, %c0_126] : memref<4x16xf32, #tpu.memory_space<vmem>>, vector<4x16xf32>
    tpu.vector_store %arg13[%c0_125, %c0_126], %150 {strides = array<i32>} : memref<4x16xf32, #tpu.memory_space<vmem>>, vector<4x16xf32>,
    return
  }
}

</mosaic_0001>

<bundles_post_ra>
// kernel: mul.7
= control target key start
LH: loop header
LB: loop body
LE: loop exit
PB: predicated region body
PF: predicated region fallthrough
CT: control target
= control target key end

     0   :  { %s8_s6 = smov 3  ;;  %s11_s7 = smov 12  ;;  %vm13_vm0 = vcmask 1043458   ;;  %vm3_vm1 = vcmask 130048   ;;  %vm17_vm2 = vcmask 1048448   ;;  %vm31_vm3 = vcmask 917248   ;;  %s214_s0 = inlined_call_operand.vmem [shape: f32[2,16,16], index: 0, kind: input, shape index: {}]   ;;  %s215_s1 = inlined_call_operand.vmem [shape: f32[2,256], index: 1, kind: output, shape index: {}]  }
   0x1   :  { %v117_v0 = vld [vmem:[%s214_s0 + $0x7] ss:$16 sm:%s8_s6]   ;;  %v118_v1 = vld [vmem:[%s214_s0 - $0x11] ss:$16 sm:%s11_s7]   ;;  %s36_s12 = smov 3  ;;  %s39_s15 = smov 12 }
   0x2   :  { %v14_v2 = vsel %vm13_vm0, %v118_v1, %v117_v0  ;;  %v121_v3 = vld [vmem:[%s214_s0 + $0x5] ss:$16 sm:%s36_s12]   ;;  %s139_s16 = smov 112   ;;  %v122_v4 = vld [vmem:[%s214_s0 - $0x13] ss:$16 sm:%s39_s15]   ;;  %s22_s19 = smov 3 }
   0x3   :  { %15 = vrot.lane.b32.xlu0 %v14_v2, %s139_s16  ;;  %s25_s20 = smov 12  ;;  %v42_v5 = vsel %vm13_vm0, %v122_v4, %v121_v3  ;;  %v119_v6 = vld [vmem:[%s214_s0 + $0x6] ss:$16 sm:%s22_s19]   ;;  %s50_s23 = smov 3  ;;  %vm45_vm4 = vcmask 786048   ;;  %vm59_vm5 = vcmask 654848  }
   0x4   :  { %s140_s24 = smov 80   ;;  %v120_v7 = vld [vmem:[%s214_s0 - $0x12] ss:$16 sm:%s25_s20]   ;;  %s53_s27 = smov 12  ;;  %v123_v8 = vld [vmem:[%s214_s0 + $0x4] ss:$16 sm:%s50_s23]  }
   0x5   :  { %43 = vrot.lane.b32.xlu1 %v42_v5, %s140_s24  ;;  %v124_v9 = vld [vmem:[%s214_s0 - $0x14] ss:$16 sm:%s53_s27]   ;;  %s92_s3 = smov 3  ;;  %s64_s4 = smov 3  ;;  %v28_v10 = vsel %vm13_vm0, %v120_v7, %v119_v6  ;;  %vm73_vm6 = vcmask 523648   ;;  %vm87_vm7 = vcmask 392448  }
   0x6   :  { %v125_v11 = vld [vmem:[%s214_s0 + $0x3] ss:$16 sm:%s64_s4]   ;;  %s67_s7 = smov 12  ;;  %s95_s8 = smov 12  ;;  %v56_v13 = vsel %vm13_vm0, %v124_v9, %v123_v8  ;;  %v129_v15 = vld [vmem:[%s214_s0 + $0x1] ss:$16 sm:%s92_s3]  }
   0x7   :  { %v126_v12 = vld [vmem:[%s214_s0 - $0x15] ss:$16 sm:%s67_s7]   ;;  %s78_s11 = smov 3  ;;  %s81_s12 = smov 12  ;;  %v130_v16 = vld [vmem:[%s214_s0 - $0x17] ss:$16 sm:%s95_s8]  }
   0x8   :  { %v70_v14 = vsel %vm13_vm0, %v126_v12, %v125_v11  ;;  %s141_s13 = smov 96   ;;  %s142_s16 = smov 48   ;;  %v127_v17 = vld [vmem:[%s214_s0 + $0x2] ss:$16 sm:%s78_s11]   ;;  %v128_v18 = vld [vmem:[%s214_s0 - $0x16] ss:$16 sm:%s81_s12]   ;;  %v98_v19 = vsel %vm13_vm0, %v130_v16, %v129_v15 }
   0x9   :  { %71 = vrot.lane.b32.xlu2 %v70_v14, %s142_s16  ;;  %s143_s21 = smov 64   ;;  %v84_v20 = vsel %vm13_vm0, %v128_v18, %v127_v17  ;;  %s144_s24 = smov 16   ;;  %v2_v21 = vld [vmem:[%s214_s0] ss:$8 sm:$0xf]   ;;  %vm101_vm8 = vcmask 261248  }
   0xa   :  { %s145_s25 = smov 32   ;;  %4 = vst.msk [vmem:[#allocation0] ss:$8 sm:$0x3] %vm3_vm1, %v2_v21  }
   0xb   :  { %29 = vrot.lane.b32.xlu0 %v28_v10, %s141_s13  ;;  %6 = vst.msk [vmem:[#allocation0 - $0xf] ss:$8 sm:$0xc] %vm3_vm1, %v2_v21  }
   0xd   :  { %57 = vrot.lane.b32.xlu1 %v56_v13, %s143_s21 }
  0x11   :  { %85 = vrot.lane.b32.xlu2 %v84_v20, %s145_s25 }
  0x13   :  { %99 = vrot.lane.b32.xlu0 %v98_v19, %s144_s24 }
  0x63   :  { %v72_v22 = vpop.permute.xlu2 %71  }
  0x6b   :  { %v86_v23 = vpop.permute.xlu2 %85  }
  0x75   :  { %v16_v24 = vpop.permute.xlu0 %15  }
  0x76   :  { %18 = vst.msk [vmem:[#allocation0] sm:$0x3] %vm17_vm2, %v16_v24  }
  0x77   :  { %20 = vst.msk [vmem:[#allocation0 + $0x6] sm:$0xc] %vm17_vm2, %v16_v24   ;;  %v44_v25 = vpop.permute.xlu1 %43  }
  0x7d   :  { %v30_v26 = vpop.permute.xlu0 %29  }
  0x7e   :  { %32 = vst.msk [vmem:[#allocation0] sm:$0x3] %vm31_vm3, %v30_v26  }
  0x7f   :  { %34 = vst.msk [vmem:[#allocation0 + $0x6] sm:$0xc] %vm31_vm3, %v30_v26   ;;  %v58_v27 = vpop.permute.xlu1 %57  }
  0x80   :  { %46 = vst.msk [vmem:[#allocation0] sm:$0x3] %vm45_vm4, %v44_v25  }
  0x81   :  { %48 = vst.msk [vmem:[#allocation0 + $0x6] sm:$0xc] %vm45_vm4, %v44_v25  }
  0x82   :  { %60 = vst.msk [vmem:[#allocation0] sm:$0x3] %vm59_vm5, %v58_v27  }
  0x83   :  { %62 = vst.msk [vmem:[#allocation0 + $0x6] sm:$0xc] %vm59_vm5, %v58_v27  }
  0x84   :  { %74 = vst.msk [vmem:[#allocation0] sm:$0x3] %vm73_vm6, %v72_v22  }
  0x85   :  { %76 = vst.msk [vmem:[#allocation0 + $0x6] sm:$0xc] %vm73_vm6, %v72_v22   ;;  %v100_v28 = vpop.permute.xlu0 %99  }
  0x86   :  { %88 = vst.msk [vmem:[#allocation0] sm:$0x3] %vm87_vm7, %v86_v23  }
  0x87   :  { %90 = vst.msk [vmem:[#allocation0 + $0x6] sm:$0xc] %vm87_vm7, %v86_v23  }
  0x88   :  { %102 = vst.msk [vmem:[#allocation0] sm:$0x3] %vm101_vm8, %v100_v28  }
  0x89   :  { %104 = vst.msk [vmem:[#allocation0 + $0x6] sm:$0xc] %vm101_vm8, %v100_v28  }
  0x8f   :  { %v107_v29 = vld [vmem:[#allocation0] sm:$0x3] }
  0x90   :  { %110 = vst [vmem:[%s215_s1] sm:$0x3] %v107_v29  ;;  %v112_v30 = vld [vmem:[#allocation0 + $0x8] sm:$0x3] }
  0x91   :  { %131 = vst [vmem:[%s215_s1 + $0x2] sm:$0x3] %v112_v30 }

// kernel: gridded_convcnp_forward.1
= control target key start
LH: loop header
LB: loop body
LE: loop exit
PB: predicated region body
PF: predicated region fallthrough
CT: control target
= control target key end

     0   :  { %v5654_v0 = vmov 0   ;;  %vm84_vm0 = vcmask 64512   ;;  %s5656_s16 = smov 112   ;;  %s5657_s21 = smov 113   ;;  %vm263_vm1 = vcmask 908288   ;;  %vm436_vm2 = vcmask 916480   ;;  %s8892_s4 = inlined_call_operand.vmem [shape: f32[32,1], index: 4, kind: input, shape index: {}]   ;;  %s8893_s0 = inlined_call_operand.vmem [shape: f32[8,512], index: 0, kind: input, shape index: {}]   ;;  %s8894_s3 = inlined_call_operand.vmem [shape: f32[32,8], index: 3, kind: input, shape index: {}]   ;;  %s8895_s1 = inlined_call_operand.vmem [shape: f32[9,512], index: 1, kind: input, shape index: {}]   ;;  %s8896_s5 = inlined_call_operand.vmem [shape: f32[32,288], index: 5, kind: input, shape index: {}]   ;;  %s8897_s6 = inlined_call_operand.vmem [shape: f32[32,1], index: 6, kind: input, shape index: {}]   ;;  %s8898_s7 = inlined_call_operand.vmem [shape: f32[32,288], index: 7, kind: input, shape index: {}]   ;;  %s8899_s8 = inlined_call_operand.vmem [shape: f32[32,1], index: 8, kind: input, shape index: {}]   ;;  %s8900_s10 = inlined_call_operand.vmem [shape: f32[32,1], index: 10, kind: input, shape index: {}]   ;;  %s8901_s2 = inlined_call_operand.vmem [shape: s32[1,16], index: 2, kind: input, shape index: {}]   ;;  %s8902_s12 = inlined_call_operand.vmem [shape: f32[4,1], index: 12, kind: input, shape index: {}]   ;;  %s8903_s9 = inlined_call_operand.vmem [shape: f32[32,32], index: 9, kind: input, shape index: {}]   ;;  %s8904_s11 = inlined_call_operand.vmem [shape: f32[4,32], index: 11, kind: input, shape index: {}]   ;;  %s8905_s13 = inlined_call_operand.vmem [shape: f32[4,16], index: 13, kind: output, shape index: {}]  }
   0x1   :  { %4845 = vset.pattern.permute.xlu1 %v5654_v0  ;;  %4844 = vset.pattern.permute.xlu0 %v5654_v0  ;;  %v62_v1 = vld [vmem:[%s8892_s4 + $0x10] sm:$0xff]  ;;  %v60_v2 = vld [vmem:[%s8892_s4] sm:$0xff]  ;;  %v57_v4 = vld [vmem:[%s8893_s0 + $0x8] sm:$0xff]  ;;  %s5658_s23 = smov 127   ;;  %s5659_s26 = smov 16   ;;  %vm609_vm3 = vcmask 924672  }
   0x2   :  { %v56_v3 = vld [vmem:[%s8893_s0] sm:$0xff]  ;;  %76 = vperm.xlu1 %4845, %v62_v1   ;;  %66 = vperm.xlu0 %4844, %v60_v2   ;;  %v58_v5 = vld [vmem:[%s8893_s0 + $0x10] sm:$0xff]  ;;  %v59_v6 = vld [vmem:[%s8893_s0 + $0x18] sm:$0xff]  ;;  %s5655_s0 = smov 111   ;;  %s5660_s30 = smov 15   ;;  %vm782_vm4 = vcmask 1039360  }
   0x3   :  { %112 = vmatpush.msra.mxu0 %v56_v3  ;;  %141 = vmatpush.msra.mxu1 %v57_v4  ;;  %v52_v7 = vld [vmem:[%s8894_s3] sm:$0xff]  ;;  %v63_v10 = vld [vmem:[%s8892_s4 + $0x18] sm:$0xff]  ;;  %v61_v11 = vld [vmem:[%s8892_s4 + $0x8] sm:$0xff]  ;;  %s5661_s17 = smov 1   ;;  %s5662_s18 = smov 17   ;;  %vm525_vm5 = vcmask 130048  }
   0x4   :  { %v249_v8 = vld [vmem:[%s8895_s1] ss:$8 sm:$0xf]  ;;  %170 = vmatpush.msra.mxu2 %v58_v5  ;;  %199 = vmatpush.msra.mxu3 %v59_v6  ;;  %v4647_v16 = vld [vmem:[%s8895_s1 + $0x1] ss:$8 sm:$0xf] }
   0x5   :  { %v251_v9 = vperm.slane %v249_v8, 0  ;;  %4631 = vmatmul.msk.f32.vlgmr.msra.gmra.mxu0 %vm84_vm0, %v52_v7  ;;  %4635 = vmatmul.msk.f32.vlgmr.msra.gmra.mxu1 %vm84_vm0, %v52_v7  ;;  %v53_v12 = vld [vmem:[%s8894_s3 + $0x8] sm:$0xff]  ;;  %v252_v13 = vperm.slane %v249_v8, 1  ;;  %v254_v14 = vperm.slane %v249_v8, 3  ;;  %v253_v15 = vperm.slane %v249_v8, 2  ;;  %v54_v17 = vld [vmem:[%s8894_s3 + $0x10] sm:$0xff] }
   0x6   :  { %4639 = vmatmul.msk.f32.vlgmr.msra.gmra.mxu2 %vm84_vm0, %v52_v7  ;;  %4643 = vmatmul.msk.f32.vlgmr.msra.gmra.mxu3 %vm84_vm0, %v52_v7  ;;  %v426_v18 = vperm.slane %v4647_v16, 2  ;;  %v425_v19 = vperm.slane %v4647_v16, 1  ;;  %v424_v20 = vperm.slane %v4647_v16, 0  ;;  %v4648_v21 = vld [vmem:[%s8895_s1 + $0x2] ss:$8 sm:$0xf] }
   0x7   :  { %255 = vrot.lane.b32.xlu2 %v251_v9, %s5655_s0  ;;  %v55_v22 = vld [vmem:[%s8894_s3 + $0x18] sm:$0xff]  ;;  %v597_v23 = vperm.slane %v4648_v21, 0  ;;  %v599_v24 = vperm.slane %v4648_v21, 2  ;;  %v427_v25 = vperm.slane %v4647_v16, 3  ;;  %v600_v26 = vperm.slane %v4648_v21, 3 }
   0x8   :  { %5246 = vset.pattern.permute.xlu2 %v5654_v0  ;;  %v4649_v27 = vld [vmem:[%s8895_s1 + $0x3] ss:$8 sm:$0xf]  ;;  %v598_v29 = vperm.slane %v4648_v21, 1  ;;  %vm698_vm6 = vcmask 121856   ;;  %vm871_vm7 = vcmask 7168  }
   0x9   :  { %v770_v28 = vperm.slane %v4649_v27, 0  ;;  %v771_v30 = vperm.slane %v4649_v27, 1  ;;  %v4652_v31 = vld [vmem:[%s8895_s1 + $0x7] ss:$8 sm:$0xf]  ;;  %v772_v33 = vperm.slane %v4649_v27, 2 }
   0xa   :  { %81 = vperm.xlu1 %4845, %v63_v10   ;;  %71 = vperm.xlu0 %4844, %v61_v11   ;;  %v1301_v32 = vperm.slane %v4652_v31, 0  ;;  %v1302_v34 = vperm.slane %v4652_v31, 1  ;;  %v4651_v35 = vld [vmem:[%s8895_s1 + $0x6] ss:$8 sm:$0xf]  ;;  %v1303_v44 = vperm.slane %v4652_v31, 2 }
   0xb   :  { %v1131_v36 = vperm.slane %v4651_v35, 1  ;;  %v1130_v37 = vperm.slane %v4651_v35, 0  ;;  %v5824_v38 = vld [vmem:[%s8895_s1 + $0x5] ss:$8 sm:$0xf]  ;;  %v773_v45 = vperm.slane %v4649_v27, 3 }
   0xc   :  { %v959_v39 = vperm.slane %v5824_v38, 0  ;;  %v5832_v40 = vld [vmem:[%s8895_s1 + $0x20] ss:$8 sm:$0xf]  ;;  %v960_v42 = vperm.slane %v5824_v38, 1  ;;  %v1304_v46 = vperm.slane %v4652_v31, 3 }
   0xd   :  { %4632 = vmatmul.msk.f32.gmra.mxu0 %vm84_vm0, %v53_v12  ;;  %4636 = vmatmul.msk.f32.gmra.mxu1 %vm84_vm0, %v53_v12  ;;  %v1472_v41 = vperm.slane %v5832_v40, 0  ;;  %v1473_v43 = vperm.slane %v5832_v40, 1  ;;  %v1133_v47 = vperm.slane %v4651_v35, 3  ;;  %v1132_v48 = vperm.slane %v4651_v35, 2 }
   0xe   :  { %4640 = vmatmul.msk.f32.gmra.mxu2 %vm84_vm0, %v53_v12  ;;  %4644 = vmatmul.msk.f32.gmra.mxu3 %vm84_vm0, %v53_v12  ;;  %vm352_vm8 = vcmask 138240   ;;  %vm1800_vm9 = vcmask 261120  }
   0xf   :  { %257 = vrot.lane.b32.xlu2 %v252_v13, %s5655_s0 }
  0x12   :  { %261 = vrot.lane.b32.xlu1 %v254_v14, %s5655_s0  ;;  %259 = vrot.lane.b32.xlu0 %v253_v15, %s5655_s0 }
  0x15   :  { %4633 = vmatmul.msk.f32.gmra.mxu0 %vm84_vm0, %v54_v17  ;;  %4637 = vmatmul.msk.f32.gmra.mxu1 %vm84_vm0, %v54_v17 }
  0x16   :  { %4641 = vmatmul.msk.f32.gmra.mxu2 %vm84_vm0, %v54_v17  ;;  %4645 = vmatmul.msk.f32.gmra.mxu3 %vm84_vm0, %v54_v17 }
  0x17   :  { %432 = vrot.lane.b32.xlu2 %v426_v18, %s5656_s16 }
  0x1a   :  { %430 = vrot.lane.b32.xlu1 %v425_v19, %s5656_s16  ;;  %428 = vrot.lane.b32.xlu0 %v424_v20, %s5656_s16 }
  0x1d   :  { %4634 = vmatmul.msk.f32.gmra.mxu0 %vm84_vm0, %v55_v22  ;;  %4638 = vmatmul.msk.f32.gmra.mxu1 %vm84_vm0, %v55_v22 }
  0x1e   :  { %4642 = vmatmul.msk.f32.gmra.mxu2 %vm84_vm0, %v55_v22  ;;  %4646 = vmatmul.msk.f32.gmra.mxu3 %vm84_vm0, %v55_v22 }
  0x1f   :  { %601 = vrot.lane.b32.xlu2 %v597_v23, %s5657_s21 }
  0x22   :  { %605 = vrot.lane.b32.xlu1 %v599_v24, %s5657_s21  ;;  %434 = vrot.lane.b32.xlu0 %v427_v25, %s5656_s16 }
  0x27   :  { %607 = vrot.lane.b32.xlu2 %v600_v26, %s5657_s21 }
  0x2a   :  { %774 = vrot.lane.b32.xlu1 %v770_v28, %s5658_s23  ;;  %603 = vrot.lane.b32.xlu0 %v598_v29, %s5657_s21 }
  0x2f   :  { %776 = vrot.lane.b32.xlu2 %v771_v30, %s5658_s23 }
  0x32   :  { %1305 = vrot.lane.b32.xlu1 %v1301_v32, %s5659_s26  ;;  %778 = vrot.lane.b32.xlu0 %v772_v33, %s5658_s23 }
  0x37   :  { %1307 = vrot.lane.b32.xlu2 %v1302_v34, %s5659_s26 }
  0x3a   :  { %1136 = vrot.lane.b32.xlu1 %v1131_v36, %s5660_s30  ;;  %1134 = vrot.lane.b32.xlu0 %v1130_v37, %s5660_s30 }
  0x3f   :  { %963 = vrot.lane.b32.xlu2 %v959_v39, %s5661_s17 }
  0x42   :  { %1476 = vrot.lane.b32.xlu1 %v1472_v41, %s5662_s18  ;;  %965 = vrot.lane.b32.xlu0 %v960_v42, %s5661_s17 }
  0x47   :  { %1478 = vrot.lane.b32.xlu2 %v1473_v43, %s5662_s18 }
  0x4a   :  { %1309 = vrot.lane.b32.xlu1 %v1303_v44, %s5659_s26  ;;  %780 = vrot.lane.b32.xlu0 %v773_v45, %s5658_s23 }
  0x4f   :  { %1311 = vrot.lane.b32.xlu2 %v1304_v46, %s5659_s26 }
  0x52   :  { %1140 = vrot.lane.b32.xlu1 %v1133_v47, %s5660_s30  ;;  %1138 = vrot.lane.b32.xlu0 %v1132_v48, %s5660_s30 }
  0x61   :  { %v256_v49 = vpop.permute.xlu2 %255 }
  0x62   :  { %v5858_v58 = vmul.f32 0.0, %v256_v49 }
  0x69   :  { %v5848_v52 = vpop.permute.xlu2 %257 }
  0x6a   :  { %v5856_v55 = vsel %vm263_vm1, %v256_v49, %v5848_v52 }
  0x71   :  { %v433_v63 = vpop.permute.xlu2 %432 }
  0x74   :  { %v5846_v50 = vpop.permute.xlu1 %76  ;;  %v67_v51 = vpop.permute.xlu0 %66 }
  0x79   :  { %v602_v9 = vpop.permute.xlu2 %601 }
  0x7a   :  { %v5909_v30 = vmul.f32 0.0, %v602_v9 }
  0x7c   :  { %v5850_v53 = vpop.permute.xlu1 %81  ;;  %v5852_v54 = vpop.permute.xlu0 %71 }
  0x81   :  { %v5901_v26 = vpop.permute.xlu2 %607 }
  0x82   :  { %v114_v56 = vpop.f32.mrf.mxu0  ;;  %v143_v57 = vpop.f32.mrf.mxu1 }
  0x83   :  { %v5860_v59 = vadd.f32 %v114_v56, %v67_v51  ;;  %v5884_v16 = vadd.f32 %v143_v57, %v67_v51 }
  0x84   :  { %v5862_v60 = vpop.permute.xlu1 %261  ;;  %v260_v61 = vpop.permute.xlu0 %259 }
  0x85   :  { %v273_v62 = vmul.f32 %v5856_v55, %v5860_v59  ;;  %9032 = vst [vmem:[#allocation4_spill] sm:$0xff] %v5884_v16  ;;  %v265_v49 = vsel %vm263_vm1, %v5848_v52, %v260_v61 }
  0x87   :  { %v4846_v0 = vpack.i.bf16 %v273_v62, %v5858_v58 }
  0x89   :  { %4847 = vrot.lane.b32.xlu2 %v4846_v0, %s5662_s18  ;;  %v201_v5 = vpop.f32.mrf.mxu3  ;;  %v172_v12 = vpop.f32.mrf.mxu2 }
  0x8a   :  { %v117_v1 = vpop.f32.mrf.mxu0  ;;  %v146_v2 = vpop.f32.mrf.mxu1  ;;  %v5875_v10 = vadd.f32 %v201_v5, %v67_v51  ;;  %v5886_v17 = vadd.f32 %v172_v12, %v67_v51  ;;  %v5953_v51 = vsel %vm263_vm1, %v260_v61, %v5862_v60 }
  0x8b   :  { %v5932_v42 = vadd.f32 %v117_v1, %v5852_v54  ;;  %v5936_v45 = vadd.f32 %v146_v2, %v5852_v54  ;;  %v274_v1 = vmul.f32 %v265_v49, %v5884_v16 }
  0x8c   :  { %v431_v3 = vpop.permute.xlu1 %430  ;;  %v429_v4 = vpop.permute.xlu0 %428  ;;  %v276_v19 = vmul.f32 %v5862_v60, %v5875_v10  ;;  %v622_v32 = vmul.f32 %v5901_v26, %v5875_v10  ;;  %v275_v62 = vmul.f32 %v5953_v51, %v5886_v17 }
  0x8d   :  { %v5869_v6 = vsel %vm436_vm2, %v429_v4, %v431_v3  ;;  %v5871_v7 = vmul.f32 0.0, %v429_v4  ;;  %v5880_v14 = vsel %vm436_vm2, %v431_v3, %v433_v63  ;;  %9034 = vst [vmem:[#allocation6_spill] sm:$0xff] %v5936_v45  ;;  %v278_v52 = vmul.f32 %v5856_v55, %v5932_v42 }
  0x8e   :  { %v446_v8 = vmul.f32 %v5869_v6, %v5860_v59  ;;  %v447_v21 = vmul.f32 %v5880_v14, %v5884_v16  ;;  %v4866_v24 = vpack.i.bf16 %v5858_v58, %v276_v19  ;;  %v4886_v46 = vpack.i.bf16 %v5909_v30, %v622_v32 }
  0x8f   :  { %v452_v0 = vmul.f32 %v5880_v14, %v5936_v45  ;;  %v279_v61 = vmul.f32 %v265_v49, %v5936_v45  ;;  %v4861_v4 = vpack.i.bf16 %v275_v62, %v274_v1 }
  0x90   :  { %v4851_v11 = vpack.i.bf16 %v446_v8, %v5871_v7  ;;  %v777_v8 = vpop.permute.xlu2 %776 }
  0x91   :  { %v175_v56 = vpop.f32.mrf.mxu2 }
  0x92   :  { %v120_v13 = vpop.f32.mrf.mxu0  ;;  %4852 = vrot.lane.b32.xlu1 %v4851_v11, %s5659_s26  ;;  %v5882_v15 = vpop.f32.mrf.mxu1  ;;  %v4891_v11 = vpack.i.bf16 %v279_v61, %v278_v52 }
  0x93   :  { %v5969_v2 = vadd.f32 %v120_v13, %v5846_v50 }
  0x94   :  { %v5888_v18 = vpop.permute.xlu0 %434  ;;  %v606_v23 = vpop.permute.xlu1 %605 }
  0x95   :  { %v5894_v20 = vsel %vm436_vm2, %v433_v63, %v5888_v18  ;;  %v5907_v28 = vsel %vm609_vm3, %v606_v23, %v5901_v26  ;;  %v451_v63 = vmul.f32 %v5869_v6, %v5932_v42 }
  0x96   :  { %v448_v22 = vmul.f32 %v5894_v20, %v5886_v17  ;;  %v621_v41 = vmul.f32 %v5907_v28, %v5886_v17 }
  0x97   :  { %v4896_v5 = vpack.i.bf16 %v452_v0, %v451_v63 }
  0x98   :  { %v4871_v25 = vpack.i.bf16 %v448_v22, %v447_v21  ;;  %v449_v22 = vmul.f32 %v5888_v18, %v5875_v10 }
  0x9a   :  { %v123_v27 = vpop.f32.mrf.mxu0  ;;  %4867 = vrot.lane.b32.xlu1 %v4866_v24, %s5662_s18  ;;  %4872 = vrot.lane.b32.xlu2 %v4871_v25, %s5659_s26  ;;  %v152_v29 = vpop.f32.mrf.mxu1 }
  0x9b   :  { %v5914_v33 = vadd.f32 %v123_v27, %v5850_v53  ;;  %v5917_v34 = vadd.f32 %v152_v29, %v5850_v53  ;;  %v204_v24 = vpop.f32.mrf.mxu3  ;;  %v178_v25 = vpop.f32.mrf.mxu2 }
  0x9c   :  { %v604_v31 = vpop.permute.xlu0 %603 }
  0x9d   :  { %9033 = vst [vmem:[#allocation5_spill] sm:$0xff] %v5917_v34  ;;  %v5920_v35 = vsel %vm609_vm3, %v602_v9, %v604_v31  ;;  %v5923_v36 = vsel %vm609_vm3, %v604_v31, %v606_v23  ;;  %v5941_v47 = vmul.f32 %v5869_v6, %v5914_v33  ;;  %v5945_v48 = vmul.f32 %v5880_v14, %v5917_v34  ;;  %v5973_v9 = vpop.permute.xlu1 %774 }
  0x9e   :  { %v619_v37 = vmul.f32 %v5920_v35, %v5860_v59  ;;  %v620_v39 = vmul.f32 %v5923_v36, %v5884_v16  ;;  %v5977_v12 = vmul.f32 %v5920_v35, %v5969_v2  ;;  %v5988_v13 = vmul.f32 %v5923_v36, %v5917_v34 }
  0x9f   :  { %v4956_v57 = vpack.i.bf16 %v5945_v48, %v5941_v47  ;;  %v5992_v21 = vsel %vm782_vm4, %v5973_v9, %v777_v8  ;;  %v283_v23 = vmul.f32 %v5856_v55, %v5969_v2  ;;  %v6003_v31 = vadd.f32 %v175_v56, %v5852_v54 }
  0xa0   :  { %v4856_v43 = vpack.i.bf16 %v619_v37, %v5909_v30  ;;  %v4881_v44 = vpack.i.bf16 %v621_v41, %v620_v39  ;;  %v5006_v29 = vpack.i.bf16 %v5977_v12, %v5988_v13  ;;  %v797_v32 = vmul.f32 %v5992_v21, %v5932_v42 }
  0xa1   :  { %v6008_v37 = vadd.f32 %v204_v24, %v5852_v54  ;;  %v6011_v39 = vadd.f32 %v178_v25, %v5846_v50  ;;  %v4876_v41 = vpack.i.bf16 %v5871_v7, %v449_v22  ;;  %v280_v54 = vmul.f32 %v5953_v51, %v6003_v31  ;;  %v6047_v24 = vpop.permute.xlu2 %1307 }
  0xa2   :  { %4857 = vrot.lane.b32.xlu0 %v4856_v43, %s5660_s30  ;;  %4882 = vrot.lane.b32.xlu1 %v4881_v44, %s5660_s30  ;;  %v4916_v43 = vpack.i.bf16 %v283_v23, %v5858_v58  ;;  %v453_v63 = vmul.f32 %v5894_v20, %v6003_v31  ;;  %v962_v47 = vperm.slane %v5824_v38, 3 }
  0xa3   :  { %4887 = vrot.lane.b32.xlu2 %v4886_v46, %s5660_s30  ;;  %v6020_v46 = vadd.f32 %v5882_v15, %v5846_v50  ;;  %v281_v56 = vmul.f32 %v5862_v60, %v6008_v37  ;;  %v458_v62 = vmul.f32 %v5894_v20, %v6011_v39  ;;  %v454_v0 = vmul.f32 %v5888_v18, %v6008_v37 }
  0xa4   :  { %v5971_v3 = vpop.permute.xlu0 %778 }
  0xa5   :  { %v5981_v19 = vsel %vm782_vm4, %v777_v8, %v5971_v3  ;;  %9035 = vst [vmem:[#allocation7_spill] sm:$0xff] %v6020_v46  ;;  %v457_v52 = vmul.f32 %v5880_v14, %v6020_v46  ;;  %v4906_v15 = vpack.i.bf16 %v281_v56, %v280_v54  ;;  %v4911_v1 = vpack.i.bf16 %v454_v0, %v453_v63  ;;  %v6044_v22 = vpop.permute.xlu1 %1305 }
  0xa6   :  { %v798_v27 = vmul.f32 %v5981_v19, %v5936_v45  ;;  %v289_v8 = vmul.f32 %v265_v49, %v5917_v34  ;;  %v285_v14 = vmul.f32 %v5953_v51, %v6011_v39  ;;  %v284_v23 = vmul.f32 %v265_v49, %v6020_v46 }
  0xa7   :  { %v4941_v61 = vpack.i.bf16 %v458_v62, %v457_v52  ;;  %v803_v49 = vmul.f32 %v5981_v19, %v6020_v46  ;;  %v1336_v0 = vmul.f32 %v6044_v22, %v5914_v33 }
  0xa8   :  { %v4901_v44 = vpack.i.bf16 %v798_v27, %v797_v32  ;;  %v6056_v32 = vsel %vm525_vm5, %v6044_v22, %v6047_v24 }
  0xa9   :  { %v1337_v52 = vmul.f32 %v6056_v32, %v5917_v34 }
  0xaa   :  { %4862 = vrot.lane.b32.xlu0 %v4861_v4, %s5662_s18  ;;  %4897 = vrot.lane.b32.xlu1 %v4896_v5, %s5659_s26  ;;  %v456_v4 = vmul.f32 %v5869_v6, %v5969_v2  ;;  %v288_v5 = vmul.f32 %v5856_v55, %v5914_v33  ;;  %v4931_v55 = vpack.i.bf16 %v285_v14, %v284_v23  ;;  %v6091_v23 = vpop.permute.xlu2 %963 }
  0xab   :  { %4892 = vrot.lane.b32.xlu2 %v4891_v11, %s5662_s18  ;;  %v207_v11 = vpop.f32.mrf.mxu3  ;;  %v4986_v14 = vpack.i.bf16 %v1337_v52, %v1336_v0  ;;  %v994_v13 = vmul.f32 %v6091_v23, %v5914_v33 }
  0xac   :  { %v4921_v25 = vpack.i.bf16 %v456_v4, %v5871_v7  ;;  %v4951_v27 = vpack.i.bf16 %v289_v8, %v288_v5  ;;  %v6051_v6 = vadd.f32 %v207_v11, %v5846_v50  ;;  %v1332_v50 = vmul.f32 %v6056_v32, %v6020_v46 }
  0xae   :  { %v286_v63 = vmul.f32 %v5862_v60, %v6051_v6 }
  0xb0   :  { %v4936_v8 = vpack.i.bf16 %v5858_v58, %v286_v63  ;;  %v807_v58 = vmul.f32 %v5992_v21, %v5914_v33 }
  0xb2   :  { %4877 = vrot.lane.b32.xlu0 %v4876_v41, %s5659_s26  ;;  %4917 = vrot.lane.b32.xlu1 %v4916_v43, %s5662_s18  ;;  %v1331_v41 = vmul.f32 %v6044_v22, %v5969_v2  ;;  %v459_v43 = vmul.f32 %v5888_v18, %v6051_v6 }
  0xb3   :  { %4902 = vrot.lane.b32.xlu2 %v4901_v44, %s5661_s17  ;;  %v802_v44 = vmul.f32 %v5992_v21, %v5969_v2 }
  0xb4   :  { %v4971_v56 = vpack.i.bf16 %v1332_v50, %v1331_v41  ;;  %v4946_v62 = vpack.i.bf16 %v5871_v7, %v459_v43  ;;  %v793_v7 = vmul.f32 %v5981_v19, %v5884_v16  ;;  %v6120_v50 = vpop.permute.xlu1 %1136 }
  0xb5   :  { %v4926_v54 = vpack.i.bf16 %v803_v49, %v802_v44  ;;  %v6104_v49 = vpop.permute.xlu2 %1478  ;;  %v1135_v44 = vpop.permute.xlu0 %1134 }
  0xb6   :  { %v1142_v0 = vsel %vm698_vm6, %v1135_v44, %v6120_v50  ;;  %v1165_v52 = vmul.f32 %v1135_v44, %v5914_v33 }
  0xb7   :  { %v1151_v12 = vmul.f32 %v1142_v0, %v5884_v16 }
  0xba   :  { %4907 = vrot.lane.b32.xlu0 %v4906_v15, %s5662_s18  ;;  %4942 = vrot.lane.b32.xlu1 %v4941_v61, %s5659_s26  ;;  %v181_v15 = vpop.f32.mrf.mxu2  ;;  %v210_v61 = vpop.f32.mrf.mxu3 }
  0xbb   :  { %4912 = vrot.lane.b32.xlu2 %v4911_v1, %s5659_s26  ;;  %v791_v1 = vmul.f32 0.0, %v5973_v9  ;;  %v6085_v4 = vadd.f32 %v181_v15, %v5850_v53  ;;  %v6088_v5 = vadd.f32 %v210_v61, %v5850_v53  ;;  %v808_v53 = vmul.f32 %v5981_v19, %v5917_v34 }
  0xbc   :  { %v1166_v15 = vmul.f32 %v1142_v0, %v5917_v34  ;;  %v1321_v61 = vmul.f32 %v6044_v22, %v5860_v59 }
  0xbd   :  { %v4976_v11 = vpack.i.bf16 %v791_v1, %v793_v7  ;;  %v463_v9 = vmul.f32 %v5894_v20, %v6085_v4  ;;  %v634_v20 = vmul.f32 %v5920_v35, %v5914_v33  ;;  %v290_v19 = vmul.f32 %v5953_v51, %v6085_v4  ;;  %v6126_v43 = vpop.permute.xlu2 %1311 }
  0xbe   :  { %v291_v41 = vmul.f32 %v5862_v60, %v6088_v5  ;;  %v1326_v60 = vmul.f32 %v6044_v22, %v5932_v42  ;;  %v1327_v51 = vmul.f32 %v6056_v32, %v5936_v45  ;;  %v1322_v7 = vmul.f32 %v6056_v32, %v5884_v16 }
  0xbf   :  { %v1156_v22 = vmul.f32 %v1142_v0, %v5936_v45 }
  0xc0   :  { %v5001_v63 = vpack.i.bf16 %v1327_v51, %v1326_v60  ;;  %v1161_v60 = vmul.f32 %v1142_v0, %v6020_v46 }
  0xc2   :  { %4922 = vrot.lane.b32.xlu0 %v4921_v25, %s5659_s26  ;;  %4952 = vrot.lane.b32.xlu1 %v4951_v27, %s5662_s18  ;;  %v464_v25 = vmul.f32 %v5888_v18, %v6088_v5  ;;  %v624_v18 = vmul.f32 %v5920_v35, %v5932_v42  ;;  %v792_v35 = vmul.f32 %v5992_v21, %v5860_v59 }
  0xc3   :  { %4932 = vrot.lane.b32.xlu2 %v4931_v55, %s5662_s18  ;;  %v4981_v55 = vpack.i.bf16 %v808_v53, %v807_v58  ;;  %v6157_v53 = vpop.permute.xlu0 %965  ;;  %v5031_v58 = vpack.i.bf16 %v5909_v30, %v5909_v30 }
  0xc4   :  { %v4996_v27 = vpack.i.bf16 %v464_v25, %v463_v9  ;;  %v4961_v48 = vpack.i.bf16 %v634_v20, %v624_v18  ;;  %v1155_v25 = vmul.f32 %v1135_v44, %v5932_v42  ;;  %v630_v18 = vmul.f32 %v5923_v36, %v6020_v46 }
  0xc6   :  { %v5041_v32 = vpack.i.bf16 %v1156_v22, %v1155_v25  ;;  %v1474_v22 = vperm.slane %v5832_v40, 2 }
  0xca   :  { %4927 = vrot.lane.b32.xlu0 %v4926_v54, %s5661_s17  ;;  %4972 = vrot.lane.b32.xlu1 %v4971_v56, %s5656_s16  ;;  %v6134_v54 = vpop.permute.xlu1 %1476  ;;  %v4966_v56 = vpack.i.bf16 %v792_v35, %v791_v1  ;;  %v1160_v35 = vmul.f32 %v1135_v44, %v5969_v2 }
  0xcb   :  { %4947 = vrot.lane.b32.xlu2 %v4946_v62, %s5659_s26  ;;  %v5011_v62 = vpack.i.bf16 %v791_v1, %v791_v1  ;;  %v961_v1 = vperm.slane %v5824_v38, 2  ;;  %v971_v38 = vsel %vm871_vm7, %v6091_v23, %v6157_v53  ;;  %v1507_v51 = vmul.f32 %v6134_v54, %v5914_v33 }
  0xcc   :  { %v995_v20 = vmul.f32 %v971_v38, %v5917_v34  ;;  %v980_v25 = vmul.f32 %v971_v38, %v5884_v16 }
  0xd2   :  { %4937 = vrot.lane.b32.xlu0 %v4936_v8, %s5662_s18  ;;  %4987 = vrot.lane.b32.xlu1 %v4986_v14, %s5656_s16  ;;  %v5026_v8 = vpack.i.bf16 %v1166_v15, %v1165_v52  ;;  %v5016_v14 = vpack.i.bf16 %v1322_v7, %v1321_v61  ;;  %v989_v52 = vmul.f32 %v6091_v23, %v5969_v2 }
  0xd3   :  { %4977 = vrot.lane.b32.xlu2 %v4976_v11, %s5661_s17  ;;  %v1310_v11 = vpop.permute.xlu1 %1309  ;;  %v5036_v15 = vpack.i.bf16 %v1161_v60, %v1160_v35  ;;  %v984_v35 = vmul.f32 %v6091_v23, %v5932_v42 }
  0xda   :  { %4957 = vrot.lane.b32.xlu0 %v4956_v57, %s5659_s26  ;;  %4997 = vrot.lane.b32.xlu1 %v4996_v27, %s5659_s26  ;;  %v4991_v57 = vpack.i.bf16 %v291_v41, %v290_v19  ;;  %v1150_v19 = vmul.f32 %v1135_v44, %v5860_v59  ;;  %v5051_v41 = vpack.i.bf16 %v995_v20, %v994_v13 }
  0xdb   :  { %4982 = vrot.lane.b32.xlu2 %v4981_v55, %s5661_s17  ;;  %v6170_v27 = vpop.permute.xlu1 %1140  ;;  %v625_v55 = vmul.f32 %v5923_v36, %v5936_v45  ;;  %v6186_v36 = vpop.permute.xlu0 %780  ;;  %v985_v13 = vmul.f32 %v971_v38, %v5936_v45 }
  0xdd   :  { %v5061_v60 = vpack.i.bf16 %v985_v13, %v984_v35 }
  0xe2   :  { %4962 = vrot.lane.b32.xlu0 %v4961_v48, %s5660_s30  ;;  %969 = vrot.lane.b32.xlu1 %v962_v47, %s5661_s17  ;;  %v1484_v47 = vsel %vm352_vm8, %v6134_v54, %v6104_v49  ;;  %v5046_v48 = vpack.i.bf16 %v1151_v12, %v1150_v19 }
  0xe3   :  { %4992 = vrot.lane.b32.xlu2 %v4991_v57, %s5662_s18  ;;  %v6141_v21 = vpop.permute.xlu2 %4847  ;;  %v1139_v44 = vpop.permute.xlu0 %1138 }
  0xea   :  { %4967 = vrot.lane.b32.xlu0 %v4966_v56, %s5661_s17  ;;  %5012 = vrot.lane.b32.xlu1 %v5011_v62, %s5661_s17  ;;  %v1508_v56 = vmul.f32 %v1484_v47, %v5917_v34 }
  0xeb   :  { %5002 = vrot.lane.b32.xlu2 %v5001_v63, %s5656_s16  ;;  %v990_v63 = vmul.f32 %v971_v38, %v6020_v46  ;;  %v785_v38 = vsel %vm782_vm4, %v5971_v3, %v6186_v36 }
  0xec   :  { %v5066_v61 = vpack.i.bf16 %v1508_v56, %v1507_v51  ;;  %v794_v3 = vmul.f32 %v785_v38, %v5886_v17  ;;  %v804_v13 = vmul.f32 %v785_v38, %v6011_v39 }
  0xed   :  { %v5056_v7 = vpack.i.bf16 %v990_v63, %v989_v52 }
  0xf2   :  { %967 = vrot.lane.b32.xlu0 %v961_v1, %s5661_s17  ;;  %5027 = vrot.lane.b32.xlu1 %v5026_v8, %s5657_s21  ;;  %v1497_v1 = vmul.f32 %v6134_v54, %v5932_v42  ;;  %v1498_v8 = vmul.f32 %v1484_v47, %v5936_v45 }
  0xf3   :  { %5017 = vrot.lane.b32.xlu2 %v5016_v14, %s5656_s16 }
  0xf4   :  { %v6153_v9 = vpop.permute.xlu2 %4872 }
  0xf5   :  { %9036 = vst [vmem:[#allocation8_spill] sm:$0xff] %v6153_v9 }
  0xfa   :  { %5007 = vrot.lane.b32.xlu0 %v5006_v29, %s5660_s30  ;;  %5042 = vrot.lane.b32.xlu1 %v5041_v32, %s5657_s21  ;;  %v5021_v29 = vpack.i.bf16 %v625_v55, %v630_v18  ;;  %v979_v32 = vmul.f32 %v6091_v23, %v5860_v59  ;;  %v6219_v55 = vsel %vm525_vm5, %v6047_v24, %v1310_v11 }
  0xfb   :  { %5032 = vrot.lane.b32.xlu2 %v5031_v58, %s5660_s30  ;;  %v5081_v58 = vpack.i.bf16 %v1498_v8, %v1497_v1  ;;  %v6223_v18 = vsel %vm525_vm5, %v1310_v11, %v6126_v43  ;;  %v1338_v24 = vmul.f32 %v6219_v55, %v6085_v4  ;;  %v1502_v23 = vmul.f32 %v6134_v54, %v5969_v2 }
  0xfc   :  { %v5071_v20 = vpack.i.bf16 %v980_v25, %v979_v32  ;;  %v1339_v11 = vmul.f32 %v6223_v18, %v6088_v5  ;;  %v799_v8 = vmul.f32 %v785_v38, %v6003_v31  ;;  %v1143_v32 = vsel %vm698_vm6, %v6120_v50, %v1139_v44 }
  0xfd   :  { %v6177_v30 = vpop.permute.xlu2 %4887  ;;  %v1167_v50 = vmul.f32 %v1143_v32, %v6085_v4 }
  0xfe   :  { %9037 = vst [vmem:[#allocation9_spill] sm:$0xff] %v6177_v30  ;;  %v5096_v51 = vpack.i.bf16 %v1339_v11, %v1338_v24  ;;  %v809_v24 = vmul.f32 %v785_v38, %v6085_v4 }
 0x100   :  { %v5091_v35 = vpack.i.bf16 %v804_v13, %v809_v24 }
 0x102   :  { %5022 = vrot.lane.b32.xlu0 %v5021_v29, %s5660_s30  ;;  %5052 = vrot.lane.b32.xlu1 %v5051_v41, %s5658_s23  ;;  %v1492_v41 = vmul.f32 %v6134_v54, %v5860_v59  ;;  %v1144_v54 = vsel %vm698_vm6, %v1139_v44, %v6170_v27 }
 0x103   :  { %5047 = vrot.lane.b32.xlu2 %v5046_v48, %s5657_s21  ;;  %v1493_v48 = vmul.f32 %v1484_v47, %v5884_v16  ;;  %v1168_v11 = vmul.f32 %v1144_v54, %v6088_v5 }
 0x104   :  { %v6191_v57 = vpop.permute.xlu1 %4852 }
 0x105   :  { %v6198_v62 = vpop.permute.xlu2 %4892  ;;  %v5086_v56 = vpack.i.bf16 %v1493_v48, %v1492_v41  ;;  %v636_v41 = vmul.f32 %v5907_v28, %v6085_v4  ;;  %v631_v48 = vmul.f32 %v5907_v28, %v6011_v39 }
 0x10a   :  { %5037 = vrot.lane.b32.xlu0 %v5036_v15, %s5657_s21  ;;  %5067 = vrot.lane.b32.xlu1 %v5066_v61, %s5655_s0  ;;  %v1503_v15 = vmul.f32 %v1484_v47, %v6020_v46  ;;  %v1328_v61 = vmul.f32 %v6219_v55, %v6003_v31  ;;  %v5101_v47 = vpack.i.bf16 %v794_v3, %v799_v8 }
 0x10b   :  { %5057 = vrot.lane.b32.xlu2 %v5056_v7, %s5658_s23  ;;  %v1329_v7 = vmul.f32 %v6223_v18, %v6008_v37  ;;  %v637_v8 = vmul.f32 %v5901_v26, %v6088_v5 }
 0x10c   :  { %v6206_v0 = vpop.permute.xlu1 %4867  ;;  %v5076_v25 = vpack.i.bf16 %v1503_v15, %v1502_v23  ;;  %v1333_v23 = vmul.f32 %v6219_v55, %v6011_v39  ;;  %v1334_v15 = vmul.f32 %v6223_v18, %v6051_v6 }
 0x10d   :  { %9038 = vst [vmem:[#allocation10_spill] sm:$0xff] %v6206_v0  ;;  %v6211_v14 = vpop.permute.xlu2 %4902 }
 0x112   :  { %1480 = vrot.lane.b32.xlu0 %v1474_v22, %s5662_s18  ;;  %5082 = vrot.lane.b32.xlu1 %v5081_v58, %s5655_s0  ;;  %v5111_v22 = vpack.i.bf16 %v1329_v7, %v1328_v61  ;;  %v1157_v61 = vmul.f32 %v1143_v32, %v6003_v31  ;;  %v1158_v7 = vmul.f32 %v1144_v54, %v6008_v37 }
 0x113   :  { %5072 = vrot.lane.b32.xlu2 %v5071_v20, %s5658_s23 }
 0x114   :  { %v6228_v19 = vpop.permute.xlu0 %4857  ;;  %v6230_v12 = vpop.permute.xlu1 %4882 }
 0x115   :  { %v6237_v29 = vpop.permute.xlu2 %4912 }
 0x116   :  { %9039 = vst [vmem:[#allocation11_spill] sm:$0xff] %v6237_v29 }
 0x11a   :  { %5062 = vrot.lane.b32.xlu0 %v5061_v60, %s5658_s23  ;;  %5097 = vrot.lane.b32.xlu1 %v5096_v51, %s5656_s16  ;;  %v5126_v60 = vpack.i.bf16 %v1168_v11, %v1167_v50  ;;  %v5116_v51 = vpack.i.bf16 %v631_v48, %v636_v41  ;;  %v1323_v11 = vmul.f32 %v6219_v55, %v5886_v17 }
 0x11b   :  { %5087 = vrot.lane.b32.xlu2 %v5086_v56, %s5655_s0  ;;  %v1324_v41 = vmul.f32 %v6223_v18, %v5875_v10  ;;  %v1152_v48 = vmul.f32 %v1143_v32, %v5886_v17 }
 0x11c   :  { %v6250_v63 = vpop.permute.xlu0 %4862  ;;  %v6252_v52 = vpop.permute.xlu1 %4897 }
 0x11d   :  { %v6261_v1 = vpop.permute.xlu2 %4932 }
 0x122   :  { %5077 = vrot.lane.b32.xlu0 %v5076_v25, %s5655_s0  ;;  %5112 = vrot.lane.b32.xlu1 %v5111_v22, %s5656_s16  ;;  %v626_v25 = vmul.f32 %v5907_v28, %v6003_v31  ;;  %v5106_v22 = vpack.i.bf16 %v1334_v15, %v1333_v23  ;;  %v5121_v15 = vpack.i.bf16 %v1324_v41, %v1323_v11 }
 0x123   :  { %5102 = vrot.lane.b32.xlu2 %v5101_v47, %s5661_s17  ;;  %v5141_v47 = vpack.i.bf16 %v1158_v7, %v1157_v61  ;;  %v1162_v7 = vmul.f32 %v1143_v32, %v6011_v39 }
 0x124   :  { %v6272_v58 = vpop.permute.xlu0 %4877  ;;  %v6274_v20 = vpop.permute.xlu1 %4917  ;;  %v5131_v13 = vpack.i.bf16 %v637_v8, %v626_v25  ;;  %v1163_v8 = vmul.f32 %v1144_v54, %v6051_v6  ;;  %v8906_v25 = vunpack.i.h.bf16 %v6211_v14 }
 0x125   :  { %9040 = vst [vmem:[#allocation12_spill] sm:$0xff] %v6272_v58  ;;  %v6280_v44 = vpop.permute.xlu2 %4947 }
 0x126   :  { %9041 = vst [vmem:[#allocation13_spill] sm:$0xff] %v6280_v44 }
 0x12a   :  { %5092 = vrot.lane.b32.xlu0 %v5091_v35, %s5661_s17  ;;  %5127 = vrot.lane.b32.xlu1 %v5126_v60, %s5657_s21  ;;  %v1153_v35 = vmul.f32 %v1144_v54, %v5875_v10 }
 0x12b   :  { %5117 = vrot.lane.b32.xlu2 %v5116_v51, %s5660_s30 }
 0x12c   :  { %v6289_v56 = vpop.permute.xlu0 %4907  ;;  %v6291_v38 = vpop.permute.xlu1 %4942  ;;  %v5146_v55 = vpack.i.bf16 %v1153_v35, %v1152_v48  ;;  %v5136_v48 = vpack.i.bf16 %v1163_v8, %v1162_v7  ;;  %v1475_v8 = vperm.slane %v5832_v40, 3 }
 0x12d   :  { %9042 = vst [vmem:[#allocation14_spill] sm:$0xff] %v6289_v56  ;;  %v6299_v3 = vpop.permute.xlu2 %4977 }
 0x12e   :  { %v4980_v34 = vunpack.i.h.bf16 %v6299_v3 }
 0x132   :  { %5107 = vrot.lane.b32.xlu0 %v5106_v22, %s5656_s16  ;;  %5142 = vrot.lane.b32.xlu1 %v5141_v47, %s5657_s21  ;;  %v4904_v22 = vunpack.i.l.bf16 %v6211_v14 }
 0x133   :  { %5132 = vrot.lane.b32.xlu2 %v5131_v13, %s5660_s30 }
 0x134   :  { %v6308_v24 = vpop.permute.xlu0 %4922  ;;  %v6310_v50 = vpop.permute.xlu1 %4952  ;;  %v877_v32 = vsel %vm871_vm7, %v4904_v22, %v8906_v25 }
 0x135   :  { %v6316_v28 = vpop.permute.xlu2 %4982 }
 0x136   :  { %v8908_v60 = vunpack.i.h.bf16 %v6316_v28  ;;  %v4984_v51 = vunpack.i.l.bf16 %v6316_v28 }
 0x138   :  { %v885_v23 = vsel %vm871_vm7, %v4984_v51, %v8908_v60 }
 0x139   :  { %1900 = vmatpush.msrb.mxu3 %v885_v23 }
 0x13a   :  { %5122 = vrot.lane.b32.xlu0 %v5121_v15, %s5656_s16 }
 0x13b   :  { %5147 = vrot.lane.b32.xlu2 %v5146_v55, %s5657_s21 }
 0x13c   :  { %v6327_v18 = vpop.permute.xlu0 %4927  ;;  %v6329_v61 = vpop.permute.xlu1 %4972 }
 0x13d   :  { %v8907_v47 = vunpack.i.h.bf16 %v6327_v18  ;;  %v4929_v13 = vunpack.i.l.bf16 %v6327_v18  ;;  %v6337_v11 = vpop.permute.xlu2 %4992  ;;  %v8912_v23 = vunpack.i.h.bf16 %v6329_v61  ;;  %v4974_v15 = vunpack.i.l.bf16 %v6329_v61 }
 0x13e   :  { %9043 = vst [vmem:[#allocation15_spill] sm:$0xff] %v6337_v11 }
 0x13f   :  { %v881_v41 = vsel %vm871_vm7, %v4929_v13, %v8907_v47  ;;  %v1409_v47 = vsel %vm436_vm2, %v4974_v15, %v8912_v23  ;;  %v8923_v23 = vunpack.i.l.bf16 %v6299_v3 }
 0x140   :  { %1901 = vmatpush.msrb.mxu3 %v881_v41 }
 0x142   :  { %5137 = vrot.lane.b32.xlu0 %v5136_v48, %s5657_s21  ;;  %1902 = vmatpush.msrb.mxu3 %v877_v32 }
 0x144   :  { %v6346_v54 = vpop.permute.xlu0 %4937  ;;  %v6348_v35 = vpop.permute.xlu1 %4987 }
 0x145   :  { %9044 = vst [vmem:[#allocation16_spill] sm:$0xff] %v6346_v54  ;;  %v8913_v55 = vunpack.i.h.bf16 %v6348_v35  ;;  %v4989_v41 = vunpack.i.l.bf16 %v6348_v35  ;;  %v6354_v7 = vpop.permute.xlu2 %5002 }
 0x146   :  { %9045 = vst [vmem:[#allocation17_spill] sm:$0xff] %v6354_v7  ;;  %v8911_v25 = vunpack.i.h.bf16 %v6354_v7  ;;  %v5004_v48 = vunpack.i.l.bf16 %v6354_v7 }
 0x147   :  { %v1413_v32 = vsel %vm436_vm2, %v4989_v41, %v8913_v55 }
 0x148   :  { %1842 = vmatpush.msrb.mxu1 %v1413_v32  ;;  %v1405_v40 = vsel %vm436_vm2, %v5004_v48, %v8911_v25 }
 0x14a   :  { %1482 = vrot.lane.b32.xlu0 %v1475_v8, %s5662_s18  ;;  %1843 = vmatpush.msrb.mxu1 %v1409_v47 }
 0x14c   :  { %v6369_v60 = vpop.permute.xlu0 %4957  ;;  %v6371_v16 = vpop.permute.xlu1 %4997  ;;  %1844 = vmatpush.msrb.mxu1 %v1405_v40 }
 0x14d   :  { %9046 = vst [vmem:[#allocation18_spill] sm:$0xff] %v6371_v16  ;;  %v6373_v45 = vpop.permute.xlu2 %5017 }
 0x14e   :  { %9047 = vst [vmem:[#allocation19_spill] sm:$0xff] %v6373_v45  ;;  %v8918_v41 = vunpack.i.h.bf16 %v6373_v45  ;;  %v5019_v32 = vunpack.i.l.bf16 %v6373_v45 }
 0x150   :  { %v1401_v15 = vsel %vm436_vm2, %v5019_v32, %v8918_v41  ;;  %v880_v41 = vsel %vm871_vm7, %v4980_v34, %v4929_v13 }
 0x151   :  { %1845 = vmatpush.msrb.mxu1 %v1401_v15 }
 0x154   :  { %v6380_v47 = vpop.permute.xlu0 %4962  ;;  %v6382_v8 = vpop.permute.xlu1 %969 }
 0x155   :  { %v5033_v40 = vpop.permute.xlu2 %5032  ;;  %v4965_v29 = vunpack.i.h.bf16 %v6380_v47 }
 0x156   :  { %v5034_v45 = vunpack.i.l.bf16 %v5033_v40 }
 0x15c   :  { %v4968_v48 = vpop.permute.xlu0 %4967  ;;  %v5013_v25 = vpop.permute.xlu1 %5012 }
 0x15d   :  { %v4970_v55 = vunpack.i.h.bf16 %v4968_v48  ;;  %v4969_v46 = vunpack.i.l.bf16 %v4968_v48  ;;  %v5014_v56 = vunpack.i.l.bf16 %v5013_v25  ;;  %v5015_v15 = vunpack.i.h.bf16 %v5013_v25 }
 0x15f   :  { %v884_v11 = vsel %vm871_vm7, %v4969_v46, %v4984_v51  ;;  %v873_v32 = vsel %vm871_vm7, %v4970_v55, %v8923_v23  ;;  %v876_v48 = vsel %vm871_vm7, %v5014_v56, %v4904_v22  ;;  %v872_v46 = vsel %vm871_vm7, %v5015_v15, %v4970_v55 }
 0x160   :  { %1813 = vmatpush.msrb.mxu0 %v884_v11  ;;  %1903 = vmatpush.msrb.mxu3 %v873_v32  ;;  %v711_v11 = vsel %vm698_vm6, %v5034_v45, %v4965_v29  ;;  %v1325_v23 = vmul.f32 0.0, %v6126_v43  ;;  %v4860_v43 = vunpack.i.h.bf16 %v6228_v19 }
 0x162   :  { %1814 = vmatpush.msrb.mxu0 %v880_v41  ;;  %v6405_v41 = vpop.permute.xlu2 %5047 }
 0x164   :  { %v968_v16 = vpop.permute.xlu0 %967  ;;  %v6393_v7 = vpop.permute.xlu1 %5027  ;;  %1815 = vmatpush.msrb.mxu0 %v876_v48 }
 0x165   :  { %v972_v51 = vsel %vm871_vm7, %v6157_v53, %v968_v16  ;;  %v973_v25 = vsel %vm871_vm7, %v968_v16, %v6382_v8  ;;  %v8924_v34 = vunpack.i.h.bf16 %v6393_v7  ;;  %v5029_v13 = vunpack.i.l.bf16 %v6393_v7 }
 0x166   :  { %1816 = vmatpush.msrb.mxu0 %v872_v46  ;;  %v996_v56 = vmul.f32 %v972_v51, %v6085_v4  ;;  %v997_v22 = vmul.f32 %v973_v25, %v6088_v5  ;;  %v986_v55 = vmul.f32 %v972_v51, %v6003_v31  ;;  %v987_v16 = vmul.f32 %v973_v25, %v6008_v37 }
 0x167   :  { %v1242_v53 = vsel %vm609_vm3, %v5029_v13, %v8924_v34  ;;  %v991_v32 = vmul.f32 %v972_v51, %v6011_v39  ;;  %v992_v45 = vmul.f32 %v973_v25, %v6051_v6 }
 0x168   :  { %1817 = vmatpush.msrb.mxu0 %v711_v11  ;;  %1846 = vmatpush.msrb.mxu1 %v1242_v53  ;;  %v5151_v15 = vpack.i.bf16 %v997_v22, %v996_v56  ;;  %v5161_v48 = vpack.i.bf16 %v987_v16, %v986_v55  ;;  %v981_v11 = vmul.f32 %v972_v51, %v5886_v17  ;;  %v4964_v22 = vunpack.i.l.bf16 %v6380_v47 }
 0x169   :  { %v5156_v46 = vpack.i.bf16 %v992_v45, %v991_v32  ;;  %v982_v56 = vmul.f32 %v973_v25, %v5875_v10  ;;  %v5035_v53 = vunpack.i.h.bf16 %v5033_v40  ;;  %v4890_v32 = vunpack.i.h.bf16 %v6177_v30 }
 0x16a   :  { %5152 = vrot.lane.b32.xlu1 %v5151_v15, %s5658_s23  ;;  %5162 = vrot.lane.b32.xlu0 %v5161_v48, %s5658_s23  ;;  %v4859_v15 = vunpack.i.l.bf16 %v6228_v19  ;;  %v4959_v40 = vunpack.i.l.bf16 %v6369_v60  ;;  %v6435_v25 = vpop.permute.xlu2 %5057  ;;  %v5176_v48 = vpack.i.bf16 %v1325_v23, %v1325_v23  ;;  %v4950_v19 = vunpack.i.h.bf16 %v6280_v44 }
 0x16b   :  { %5157 = vrot.lane.b32.xlu2 %v5156_v46, %s5658_s23  ;;  %v5166_v47 = vpack.i.bf16 %v982_v56, %v981_v11  ;;  %v703_v46 = vsel %vm698_vm6, %v4890_v32, %v4964_v22  ;;  %v4924_v30 = vunpack.i.l.bf16 %v6308_v24  ;;  %v4880_v23 = vunpack.i.h.bf16 %v6272_v58 }
 0x16c   :  { %v6418_v13 = vpop.permute.xlu0 %5007  ;;  %v6420_v34 = vpop.permute.xlu1 %5042  ;;  %v4940_v32 = vunpack.i.h.bf16 %v6346_v54 }
 0x16d   :  { %v5010_v55 = vunpack.i.h.bf16 %v6418_v13  ;;  %v8926_v16 = vunpack.i.l.bf16 %v6418_v13 }
 0x16f   :  { %v707_v45 = vsel %vm698_vm6, %v5035_v53, %v5010_v55  ;;  %v712_v51 = vsel %vm698_vm6, %v4965_v29, %v8926_v16  ;;  %v4925_v53 = vunpack.i.h.bf16 %v6308_v24  ;;  %v699_v29 = vsel %vm698_vm6, %v4859_v15, %v4860_v43 }
 0x170   :  { %1818 = vmatpush.msrb.mxu0 %v707_v45  ;;  %1904 = vmatpush.msrb.mxu3 %v712_v51  ;;  %v538_v51 = vsel %vm525_vm5, %v4950_v19, %v4959_v40  ;;  %v4854_v24 = vunpack.i.l.bf16 %v6191_v57  ;;  %v1154_v19 = vmul.f32 0.0, %v6170_v27  ;;  %v4870_v27 = vunpack.i.h.bf16 %v6206_v0 }
 0x171   :  { %v534_v16 = vsel %vm525_vm5, %v4924_v30, %v4925_v53 }
 0x172   :  { %5167 = vrot.lane.b32.xlu1 %v5166_v47, %s5658_s23  ;;  %1819 = vmatpush.msrb.mxu0 %v703_v46  ;;  %v4899_v46 = vunpack.i.l.bf16 %v6252_v52 }
 0x173   :  { %5177 = vrot.lane.b32.xlu0 %v5176_v48, %s5656_s16 }
 0x174   :  { %v6444_v11 = vpop.permute.xlu0 %5022  ;;  %v6446_v56 = vpop.permute.xlu1 %5052  ;;  %1820 = vmatpush.msrb.mxu0 %v699_v29 }
 0x175   :  { %v8929_v45 = vunpack.i.l.bf16 %v6444_v11  ;;  %v9048_v15 = vunpack.i.h.bf16 %v6444_v11 }
 0x176   :  { %1821 = vmatpush.msrb.mxu0 %v538_v51  ;;  %v530_v51 = vsel %vm525_vm5, %v4880_v23, %v4899_v46 }
 0x177   :  { %v708_v29 = vsel %vm698_vm6, %v5010_v55, %v8929_v45  ;;  %v704_v47 = vsel %vm698_vm6, %v4964_v22, %v9048_v15  ;;  %v4919_v55 = vunpack.i.l.bf16 %v6274_v20  ;;  %v8932_v45 = vunpack.i.l.bf16 %v6310_v50 }
 0x178   :  { %1822 = vmatpush.msrb.mxu0 %v534_v16  ;;  %1905 = vmatpush.msrb.mxu3 %v708_v29  ;;  %v4849_v16 = vunpack.i.l.bf16 %v6141_v21  ;;  %v6473_v29 = vpop.permute.xlu2 %5072  ;;  %v9049_v22 = vunpack.i.h.bf16 %v6191_v57  ;;  %v9050_v15 = vunpack.i.l.bf16 %v6230_v12 }
 0x17a   :  { %1823 = vmatpush.msrb.mxu0 %v530_v51  ;;  %1906 = vmatpush.msrb.mxu3 %v704_v47  ;;  %v526_v23 = vsel %vm525_vm5, %v4854_v24, %v9049_v22  ;;  %v700_v30 = vsel %vm698_vm6, %v4860_v43, %v9050_v15  ;;  %v5044_v47 = vunpack.i.l.bf16 %v6420_v34  ;;  %v9051_v24 = vunpack.i.h.bf16 %v6369_v60 }
 0x17b   :  { %5192 = vrot.lane.b32.xlu0 %v5176_v48, %s5656_s16  ;;  %v365_v48 = vsel %vm352_vm8, %v4940_v32, %v8932_v45  ;;  %v9052_v32 = vunpack.i.h.bf16 %v6274_v20  ;;  %v5049_v45 = vunpack.i.l.bf16 %v6405_v41 }
 0x17c   :  { %v6484_v51 = vpop.permute.xlu0 %5037  ;;  %v6486_v58 = vpop.permute.xlu1 %5067  ;;  %1824 = vmatpush.msrb.mxu0 %v526_v23  ;;  %1907 = vmatpush.msrb.mxu3 %v700_v30  ;;  %v539_v22 = vsel %vm525_vm5, %v4959_v40, %v9051_v24  ;;  %v4944_v23 = vunpack.i.l.bf16 %v6291_v38  ;;  %v5054_v24 = vunpack.i.l.bf16 %v6446_v56 }
 0x17d   :  { %v8935_v43 = vunpack.i.h.bf16 %v6484_v51  ;;  %v5039_v15 = vunpack.i.l.bf16 %v6484_v51  ;;  %v5069_v0 = vunpack.i.l.bf16 %v6486_v58  ;;  %v361_v40 = vsel %vm352_vm8, %v4919_v55, %v9052_v32 }
 0x17e   :  { %1825 = vmatpush.msrb.mxu0 %v365_v48  ;;  %1908 = vmatpush.msrb.mxu3 %v539_v22  ;;  %v9053_v54 = vunpack.i.h.bf16 %v6486_v58  ;;  %v535_v48 = vsel %vm525_vm5, %v4925_v53, %v4944_v23  ;;  %v9054_v55 = vunpack.i.l.bf16 %v6198_v62  ;;  %v8933_v32 = vunpack.i.h.bf16 %v6446_v56 }
 0x17f   :  { %v1238_v44 = vsel %vm609_vm3, %v5039_v15, %v8935_v43  ;;  %v6520_v15 = vpack.i.bf16 %v1154_v19, %v1154_v19  ;;  %v8934_v53 = vunpack.i.h.bf16 %v6310_v50  ;;  %v9057_v19 = vunpack.i.h.bf16 %v6141_v21 }
 0x180   :  { %v1584_v30 = vsel %vm263_vm1, %v5069_v0, %v9053_v54  ;;  %1826 = vmatpush.msrb.mxu0 %v361_v40  ;;  %1847 = vmatpush.msrb.mxu1 %v1238_v44  ;;  %v357_v22 = vsel %vm352_vm8, %v4870_v27, %v9054_v55  ;;  %v9055_v0 = vunpack.i.h.bf16 %v6420_v34  ;;  %v8940_v54 = vunpack.i.l.bf16 %v6153_v9 }
 0x181   :  { %1883 = vmatpush.msrb.mxu2 %v1584_v30  ;;  %1909 = vmatpush.msrb.mxu3 %v535_v48  ;;  %v9056_v27 = vunpack.i.h.bf16 %v6252_v52  ;;  %v8936_v55 = vunpack.i.h.bf16 %v6435_v25  ;;  %v5059_v30 = vunpack.i.l.bf16 %v6435_v25  ;;  %v9058_v48 = vunpack.i.h.bf16 %v6405_v41 }
 0x182   :  { %v1234_v44 = vsel %vm609_vm3, %v5044_v47, %v9055_v0  ;;  %1827 = vmatpush.msrb.mxu0 %v357_v22  ;;  %v353_v47 = vsel %vm352_vm8, %v4849_v16, %v9057_v19  ;;  %v8938_v19 = vunpack.i.l.bf16 %v6261_v1 }
 0x183   :  { %1848 = vmatpush.msrb.mxu1 %v1234_v44  ;;  %v531_v40 = vsel %vm525_vm5, %v4899_v46, %v9056_v27  ;;  %5207 = vrot.lane.b32.xlu0 %v6520_v15, %s5657_s21  ;;  %v1230_v22 = vsel %vm609_vm3, %v5049_v45, %v9058_v48  ;;  %v9059_v46 = vunpack.i.h.bf16 %v6191_v57  ;;  %v1071_v45 = vsel %vm782_vm4, %v5054_v24, %v8933_v32 }
 0x184   :  { %1910 = vmatpush.msrb.mxu3 %v531_v40  ;;  %v6540_v0 = vpop.permute.xlu0 %1480  ;;  %v6542_v44 = vpop.permute.xlu1 %5082  ;;  %1828 = vmatpush.msrb.mxu0 %v353_v47  ;;  %v983_v40 = vmul.f32 0.0, %v6382_v8  ;;  %v9060_v57 = vunpack.i.l.bf16 %v6310_v50  ;;  %v1067_v24 = vsel %vm782_vm4, %v5059_v30, %v8936_v55  ;;  %v6583_v30 = vld [vmem:[%s8896_s5] sm:$0xff] }
 0x185   :  { %1849 = vmatpush.msrb.mxu1 %v1230_v22  ;;  %v527_v27 = vsel %vm525_vm5, %v9059_v46, %v8940_v54  ;;  %v1485_v16 = vsel %vm352_vm8, %v6104_v49, %v6540_v0  ;;  %v6557_v47 = vpop.permute.xlu2 %5087  ;;  %v8937_v22 = vunpack.i.h.bf16 %v6198_v62  ;;  %9062 = vst [vmem:[#allocation20_spill] sm:$0xff] %v6583_v30  ;;  %1829 = vmatmul.f32.vlgmr.msrb.gmra.mxu0 %v6583_v30 }
 0x186   :  { %1911 = vmatpush.msrb.mxu3 %v527_v27  ;;  %v366_v8 = vsel %vm352_vm8, %v9060_v57, %v8934_v53  ;;  %v1494_v48 = vmul.f32 %v1485_v16, %v5886_v17  ;;  %v1499_v49 = vmul.f32 %v1485_v16, %v6003_v31  ;;  %v1504_v46 = vmul.f32 %v1485_v16, %v6011_v39 }
 0x187   :  { %1850 = vmatpush.msrb.mxu1 %v1071_v45  ;;  %v1509_v27 = vmul.f32 %v1485_v16, %v6085_v4  ;;  %v8939_v45 = vunpack.i.l.bf16 %v6250_v63  ;;  %v9061_v57 = vunpack.i.h.bf16 %v6274_v20  ;;  %v795_v16 = vmul.f32 %v6186_v36, %v5875_v10 }
 0x188   :  { %1912 = vmatpush.msrb.mxu3 %v366_v8  ;;  %v5181_v53 = vpack.i.bf16 %v1494_v48, %v1499_v49  ;;  %v6578_v8 = vpack.i.bf16 %v983_v40, %v983_v40  ;;  %v9063_v20 = vunpack.i.l.bf16 %v6198_v62  ;;  %v800_v40 = vmul.f32 %v6186_v36, %v6008_v37 }
 0x189   :  { %1851 = vmatpush.msrb.mxu1 %v1067_v24  ;;  %v362_v32 = vsel %vm352_vm8, %v9061_v57, %v8938_v19  ;;  %v5171_v43 = vpack.i.bf16 %v1504_v46, %v1509_v27  ;;  %v8949_v48 = vunpack.i.h.bf16 %v6473_v29  ;;  %v5074_v49 = vunpack.i.l.bf16 %v6473_v29 }
 0x18a   :  { %1913 = vmatpush.msrb.mxu3 %v362_v32  ;;  %5182 = vrot.lane.b32.xlu1 %v5181_v53, %s5655_s0  ;;  %v358_v32 = vsel %vm352_vm8, %v9063_v20, %v8937_v22  ;;  %v805_v53 = vmul.f32 %v6186_v36, %v6051_v6  ;;  %v9064_v46 = vunpack.i.h.bf16 %v6141_v21  ;;  %v810_v57 = vmul.f32 %v6186_v36, %v6088_v5 }
 0x18b   :  { %5222 = vrot.lane.b32.xlu0 %v6578_v8, %s5658_s23  ;;  %5172 = vrot.lane.b32.xlu2 %v5171_v43, %s5655_s0  ;;  %v9065_v21 = vunpack.i.h.bf16 %v6348_v35  ;;  %v5196_v54 = vpack.i.bf16 %v795_v16, %v800_v40  ;;  %v6637_v35 = vld [vmem:[%s8896_s5 + $0x18] sm:$0xff]  ;;  %v632_v16 = vmul.f32 %v5901_v26, %v6051_v6  ;;  %v8946_v40 = vunpack.i.h.bf16 %v6542_v44 }
 0x18c   :  { %1914 = vmatpush.msrb.mxu3 %v358_v32  ;;  %v6603_v24 = vpop.permute.xlu0 %5062  ;;  %v6605_v43 = vpop.permute.xlu1 %5097  ;;  %v354_v27 = vsel %vm352_vm8, %v9064_v46, %v8939_v45  ;;  %9066 = vst [vmem:[#allocation21_spill] sm:$0xff] %v6637_v35 }
 0x18d   :  { %v8956_v20 = vunpack.i.h.bf16 %v6603_v24  ;;  %v5064_v55 = vunpack.i.l.bf16 %v6603_v24  ;;  %v8948_v22 = vunpack.i.h.bf16 %v6605_v43  ;;  %v5099_v32 = vunpack.i.l.bf16 %v6605_v43  ;;  %v6628_v45 = vpop.permute.xlu2 %5102  ;;  %1832 = vmatmul.f32.gmra.mxu0 %v6637_v35 }
 0x18e   :  { %1915 = vmatpush.msrb.mxu3 %v354_v27  ;;  %v5186_v27 = vpack.i.bf16 %v805_v53, %v810_v57  ;;  %v627_v57 = vmul.f32 %v5901_v26, %v6008_v37  ;;  %v6666_v26 = vld [vmem:[%s8896_s5 + $0x8] sm:$0xff] }
 0x18f   :  { %v1063_v19 = vsel %vm782_vm4, %v5064_v55, %v8956_v20  ;;  %v1414_v46 = vsel %vm436_vm2, %v9065_v21, %v5099_v32  ;;  %v1415_v36 = vsel %vm436_vm2, %v5099_v32, %v8948_v22  ;;  %1916 = vmatmul.f32.vlgmr.msrb.gmra.mxu3 %v6583_v30  ;;  %v1059_v55 = vsel %vm782_vm4, %v5074_v49, %v8949_v48 }
 0x190   :  { %1852 = vmatpush.msrb.mxu1 %v1063_v19  ;;  %1929 = vmatpush.msra.mxu0 %v1414_v46  ;;  %v8943_v32 = vunpack.i.h.bf16 %v6557_v47  ;;  %v5211_v46 = vpack.i.bf16 %v627_v57, %v632_v16  ;;  %v6688_v16 = vld [vmem:[%s8896_s5 + $0x30] sm:$0xff]  ;;  %v9068_v57 = vunpack.i.h.bf16 %v6316_v28  ;;  %v6718_v28 = vld [vmem:[%s8896_s5 + $0x28] sm:$0xff]  ;;  %v8953_v22 = vunpack.i.h.bf16 %v6230_v12 }
 0x191   :  { %2016 = vmatpush.msra.mxu3 %v1415_v36  ;;  %9067 = vst [vmem:[#allocation22_spill] sm:$0xff] %v6688_v16  ;;  %v8961_v20 = vunpack.i.h.bf16 %v6153_v9 }
 0x192   :  { %5197 = vrot.lane.b32.xlu1 %v5196_v54, %s5661_s17  ;;  %1853 = vmatpush.msrb.mxu1 %v1059_v55  ;;  %v5084_v54 = vunpack.i.l.bf16 %v6542_v44 }
 0x193   :  { %5187 = vrot.lane.b32.xlu2 %v5186_v27, %s5661_s17 }
 0x194   :  { %v6641_v19 = vpop.permute.xlu0 %5077  ;;  %1854 = vmatpush.msrb.mxu1 %v5914_v33  ;;  %v5089_v33 = vunpack.i.l.bf16 %v6557_v47 }
 0x195   :  { %v8947_v53 = vunpack.i.h.bf16 %v6641_v19  ;;  %v5079_v49 = vunpack.i.l.bf16 %v6641_v19  ;;  %v6668_v36 = vpop.permute.xlu2 %5117  ;;  %1835 = vmatmul.f32.gmra.mxu0 %v6688_v16 }
 0x196   :  { %1855 = vmatpush.msrb.mxu1 %v5969_v2  ;;  %v1576_v2 = vsel %vm263_vm1, %v5084_v54, %v8946_v40  ;;  %v1572_v27 = vsel %vm263_vm1, %v5089_v33, %v8943_v32 }
 0x197   :  { %v1580_v21 = vsel %vm263_vm1, %v5079_v49, %v8947_v53  ;;  %1919 = vmatmul.f32.gmra.mxu3 %v6637_v35  ;;  %v8945_v49 = vunpack.i.l.bf16 %v6628_v45 }
 0x198   :  { %1856 = vmatpush.msrb.mxu1 %v5932_v42  ;;  %1884 = vmatpush.msrb.mxu2 %v1580_v21  ;;  %v6674_v42 = vld [vmem:[%s8896_s5 + $0x10] sm:$0xff]  ;;  %v8944_v21 = vunpack.i.h.bf16 %v6628_v45 }
 0x19a   :  { %5212 = vrot.lane.b32.xlu1 %v5211_v46, %s5660_s30  ;;  %1885 = vmatpush.msrb.mxu2 %v1576_v2  ;;  %v9069_v46 = vunpack.i.h.bf16 %v6327_v18  ;;  %v9070_v18 = vunpack.i.h.bf16 %v6211_v14 }
 0x19b   :  { %5202 = vrot.lane.b32.xlu2 %v6520_v15, %s5657_s21  ;;  %1857 = vmatpush.msrb.mxu1 %v5860_v59  ;;  %v6695_v59 = vpop.permute.xlu1 %5112 }
 0x19c   :  { %v6682_v55 = vpop.permute.xlu0 %5092  ;;  %1886 = vmatpush.msrb.mxu2 %v1572_v27  ;;  %1858 = vmatmul.f32.vlgmr.msrb.gmra.mxu1 %v6666_v26  ;;  %v6713_v27 = vld [vmem:[%s8896_s5 + $0x20] sm:$0xff]  ;;  %v5114_v32 = vunpack.i.l.bf16 %v6695_v59 }
 0x19d   :  { %v8941_v54 = vunpack.i.h.bf16 %v6682_v55  ;;  %v8942_v15 = vunpack.i.l.bf16 %v6682_v55  ;;  %4654 = vmatmul.msk.f32.vlgmr.msrb.gmra.mxu2 %vm1800_vm9, %v6674_v42 }
 0x19f   :  { %v886_v33 = vsel %vm871_vm7, %v9068_v57, %v8942_v15  ;;  %1922 = vmatmul.f32.gmra.mxu3 %v6688_v16  ;;  %v882_v2 = vsel %vm871_vm7, %v9069_v46, %v8941_v54  ;;  %v8951_v57 = vunpack.i.l.bf16 %v6668_v36  ;;  %v6728_v46 = vpop.permute.xlu2 %5132 }
 0x1a0   :  { %1987 = vmatpush.msra.mxu2 %v886_v33  ;;  %v878_v33 = vsel %vm871_vm7, %v9070_v18, %v8945_v49  ;;  %v9073_v49 = vunpack.i.l.bf16 %v6418_v13  ;;  %v9076_v13 = vunpack.i.l.bf16 %v6444_v11 }
 0x1a2   :  { %1988 = vmatpush.msra.mxu2 %v882_v2  ;;  %v9071_v2 = vunpack.i.l.bf16 %v6299_v3  ;;  %v8952_v3 = vunpack.i.l.bf16 %v6728_v46  ;;  %v713_v40 = vsel %vm698_vm6, %v9073_v49, %v8951_v57 }
 0x1a3   :  { %5217 = vrot.lane.b32.xlu2 %v6578_v8, %s5658_s23  ;;  %v8950_v8 = vunpack.i.h.bf16 %v6668_v36  ;;  %v6758_v48 = vpop.permute.xlu1 %5127 }
 0x1a4   :  { %v6730_v54 = vpop.permute.xlu0 %5107  ;;  %1989 = vmatpush.msra.mxu2 %v878_v33  ;;  %v874_v15 = vsel %vm871_vm7, %v9071_v2, %v8944_v21  ;;  %1861 = vmatmul.f32.gmra.mxu1 %v6713_v27  ;;  %v8954_v33 = vunpack.i.h.bf16 %v6695_v59  ;;  %v9072_v2 = vunpack.i.h.bf16 %v6329_v61  ;;  %v9074_v61 = vld [vmem:[#allocation17_spill] sm:$0xff] }
 0x1a5   :  { %v8955_v14 = vunpack.i.h.bf16 %v6730_v54  ;;  %v5109_v18 = vunpack.i.l.bf16 %v6730_v54  ;;  %4655 = vmatmul.msk.f32.gmra.mxu2 %vm1800_vm9, %v6718_v28  ;;  %v709_v49 = vsel %vm698_vm6, %v9076_v13, %v8950_v8  ;;  %v8957_v8 = vunpack.i.h.bf16 %v6291_v38 }
 0x1a6   :  { %1990 = vmatpush.msra.mxu2 %v874_v15  ;;  %v9075_v15 = vunpack.i.h.bf16 %v9074_v61 }
 0x1a7   :  { %v1410_v21 = vsel %vm436_vm2, %v9072_v2, %v5109_v18  ;;  %v1411_v53 = vsel %vm436_vm2, %v5109_v18, %v8955_v14  ;;  %v6771_v18 = vld [vmem:[%s8896_s5 + $0x38] sm:$0xff] }
 0x1a8   :  { %1930 = vmatpush.msra.mxu0 %v1410_v21  ;;  %1991 = vmatpush.msra.mxu2 %v713_v40  ;;  %v1406_v2 = vsel %vm436_vm2, %v9075_v15, %v5114_v32  ;;  %v1407_v40 = vsel %vm436_vm2, %v5114_v32, %v8954_v33  ;;  %v9077_v21 = vld [vmem:[#allocation18_spill] sm:$0xff]  ;;  %v9078_v15 = vunpack.i.h.bf16 %v6444_v11  ;;  %v9079_v32 = vunpack.i.l.bf16 %v6230_v12 }
 0x1a9   :  { %2017 = vmatpush.msra.mxu3 %v1411_v53  ;;  %v6779_v53 = vld [vmem:[%s8896_s5 + $0x40] sm:$0xff]  ;;  %v8958_v61 = vunpack.i.l.bf16 %v9077_v21 }
 0x1aa   :  { %1931 = vmatpush.msra.mxu0 %v1406_v2  ;;  %1992 = vmatpush.msra.mxu2 %v709_v49  ;;  %v705_v13 = vsel %vm698_vm6, %v9078_v15, %v8952_v3  ;;  %v701_v49 = vsel %vm698_vm6, %v9079_v32, %v8953_v22  ;;  %v9082_v22 = vunpack.i.h.bf16 %v6369_v60  ;;  %v9083_v15 = vld [vmem:[#allocation11_spill] sm:$0xff]  ;;  %v536_v60 = vsel %vm525_vm5, %v4944_v23, %v8957_v8 }
 0x1ab   :  { %2018 = vmatpush.msra.mxu3 %v1407_v40  ;;  %v5129_v40 = vunpack.i.l.bf16 %v6758_v48  ;;  %v9088_v23 = vunpack.i.h.bf16 %v6252_v52  ;;  %v9092_v8 = vunpack.i.h.bf16 %v6310_v50  ;;  %v9096_v50 = vunpack.i.l.bf16 %v6261_v1 }
 0x1ac   :  { %v6787_v2 = vpop.permute.xlu0 %5122  ;;  %1993 = vmatpush.msra.mxu2 %v705_v13  ;;  %1864 = vmatmul.f32.gmra.mxu1 %v6771_v18  ;;  %v9080_v13 = vld [vmem:[#allocation19_spill] sm:$0xff]  ;;  %v540_v33 = vsel %vm525_vm5, %v9082_v22, %v8958_v61  ;;  %v6823_v22 = vpop.permute.xlu1 %5142 }
 0x1ad   :  { %v8960_v57 = vunpack.i.h.bf16 %v6787_v2  ;;  %v5124_v11 = vunpack.i.l.bf16 %v6787_v2  ;;  %4656 = vmatmul.msk.f32.gmra.mxu2 %vm1800_vm9, %v6779_v53  ;;  %v9081_v3 = vunpack.i.h.bf16 %v9080_v13  ;;  %v9084_v13 = vunpack.i.h.bf16 %v6393_v7  ;;  %v6831_v7 = vld [vmem:[%s8896_s5 + $0x58] sm:$0xff] }
 0x1ae   :  { %1994 = vmatpush.msra.mxu2 %v701_v49  ;;  %v8959_v49 = vunpack.i.l.bf16 %v9083_v15  ;;  %9086 = vst [vmem:[#allocation17_spill] sm:$0xff] %v6831_v7 }
 0x1af   :  { %v1402_v32 = vsel %vm436_vm2, %v9081_v3, %v5124_v11  ;;  %v1403_v14 = vsel %vm436_vm2, %v5124_v11, %v8960_v57  ;;  %v1243_v3 = vsel %vm609_vm3, %v9084_v13, %v5129_v40  ;;  %v9085_v11 = vunpack.i.h.bf16 %v6758_v48 }
 0x1b0   :  { %1932 = vmatpush.msra.mxu0 %v1402_v32  ;;  %1995 = vmatpush.msra.mxu2 %v540_v33  ;;  %v532_v13 = vsel %vm525_vm5, %v9088_v23, %v8959_v49  ;;  %v9090_v23 = vld [vmem:[#allocation14_spill] sm:$0xff] }
 0x1b1   :  { %2019 = vmatpush.msra.mxu3 %v1403_v14  ;;  %v1244_v33 = vsel %vm609_vm3, %v5129_v40, %v9085_v11  ;;  %v9087_v14 = vld [vmem:[#allocation15_spill] sm:$0xff]  ;;  %v9089_v40 = vunpack.i.l.bf16 %v6153_v9 }
 0x1b2   :  { %1933 = vmatpush.msra.mxu0 %v1243_v3  ;;  %1996 = vmatpush.msra.mxu2 %v536_v60  ;;  %v8965_v32 = vunpack.i.l.bf16 %v9087_v14  ;;  %v6839_v3 = vpop.permute.xlu2 %5147 }
 0x1b3   :  { %2020 = vmatpush.msra.mxu3 %v1244_v33  ;;  %v528_v11 = vsel %vm525_vm5, %v9089_v40, %v8961_v20  ;;  %v5144_v33 = vunpack.i.l.bf16 %v6823_v22  ;;  %v5149_v57 = vunpack.i.l.bf16 %v6839_v3  ;;  %v9091_v40 = vunpack.i.h.bf16 %v6484_v51 }
 0x1b4   :  { %v6841_v60 = vpop.permute.xlu0 %5137  ;;  %1997 = vmatpush.msra.mxu2 %v532_v13  ;;  %v367_v61 = vsel %vm352_vm8, %v9092_v8, %v8965_v32  ;;  %v8967_v49 = vunpack.i.h.bf16 %v6839_v3  ;;  %v9094_v51 = vunpack.i.h.bf16 %v6420_v34  ;;  %v9095_v13 = vunpack.i.h.bf16 %v6261_v1 }
 0x1b5   :  { %v5139_v52 = vunpack.i.l.bf16 %v6841_v60  ;;  %4657 = vmatmul.msk.f32.gmra.mxu2 %vm1800_vm9, %v6831_v7  ;;  %v9093_v9 = vunpack.i.h.bf16 %v6841_v60  ;;  %v9099_v34 = vunpack.i.l.bf16 %v9090_v23 }
 0x1b6   :  { %1998 = vmatpush.msra.mxu2 %v528_v11  ;;  %v8966_v11 = vunpack.i.h.bf16 %v6250_v63  ;;  %v363_v8 = vsel %vm352_vm8, %v9096_v50, %v9095_v13  ;;  %v1232_v13 = vsel %vm609_vm3, %v5149_v57, %v8967_v49 }
 0x1b7   :  { %v1239_v20 = vsel %vm609_vm3, %v9091_v40, %v5139_v52  ;;  %v1240_v7 = vsel %vm609_vm3, %v5139_v52, %v9093_v9  ;;  %v1235_v40 = vsel %vm609_vm3, %v9094_v51, %v5144_v33  ;;  %v9097_v9 = vunpack.i.h.bf16 %v6823_v22 }
 0x1b8   :  { %1934 = vmatpush.msra.mxu0 %v1239_v20  ;;  %1999 = vmatpush.msra.mxu2 %v367_v61  ;;  %v9098_v61 = vunpack.i.h.bf16 %v6405_v41  ;;  %v9100_v52 = vunpack.i.h.bf16 %v6198_v62  ;;  %v9101_v41 = vunpack.i.l.bf16 %v6250_v63 }
 0x1b9   :  { %2021 = vmatpush.msra.mxu3 %v1240_v7  ;;  %v1236_v20 = vsel %vm609_vm3, %v5144_v33, %v9097_v9 }
 0x1ba   :  { %1935 = vmatpush.msra.mxu0 %v1235_v40  ;;  %2000 = vmatpush.msra.mxu2 %v363_v8  ;;  %v1231_v7 = vsel %vm609_vm3, %v9098_v61, %v5149_v57  ;;  %v359_v51 = vsel %vm352_vm8, %v9100_v52, %v9099_v34  ;;  %v355_v62 = vsel %vm352_vm8, %v9101_v41, %v8966_v11  ;;  %v6910_v61 = vld [vmem:[%s8896_s5 + $0x48] sm:$0xff]  ;;  %v1779_v52 = vld [vmem:[%s8897_s6 + $0x18] sm:$0xff]  ;;  %v6938_v41 = vld [vmem:[%s8896_s5 + $0x50] sm:$0xff] }
 0x1bb   :  { %2022 = vmatpush.msra.mxu3 %v1236_v20  ;;  %9102 = vst [vmem:[#allocation18_spill] sm:$0xff] %v6910_v61  ;;  %1838 = vmatmul.f32.gmra.mxu0 %v6910_v61 }
 0x1bc   :  { %v1483_v32 = vpop.permute.xlu0 %1482  ;;  %1936 = vmatpush.msra.mxu0 %v1231_v7  ;;  %2001 = vmatpush.msra.mxu2 %v359_v51  ;;  %v1778_v7 = vld [vmem:[%s8897_s6 + $0x10] sm:$0xff] }
 0x1bd   :  { %v1486_v33 = vsel %vm352_vm8, %v6540_v0, %v1483_v32  ;;  %v1496_v40 = vmul.f32 0.0, %v1483_v32  ;;  %2023 = vmatpush.msra.mxu3 %v1232_v13  ;;  %v6925_v51 = vld [vmem:[%s8895_s1 + $0x3] ss:$8 sm:$0xf]  ;;  %1867 = vmatmul.f32.gmra.mxu1 %v6938_v41 }
 0x1be   :  { %v1500_v50 = vmul.f32 %v1486_v33, %v6008_v37  ;;  %v1505_v8 = vmul.f32 %v1486_v33, %v6051_v6  ;;  %v1510_v9 = vmul.f32 %v1486_v33, %v6088_v5  ;;  %2002 = vmatpush.msra.mxu2 %v355_v62  ;;  %v1495_v32 = vmul.f32 %v1486_v33, %v5875_v10  ;;  %v1777_v33 = vld [vmem:[%s8897_s6 + $0x8] sm:$0xff] }
 0x1bf   :  { %2003 = vmatmul.f32.vlgmr.msra.gmra.mxu2 %v6583_v30  ;;  %1925 = vmatmul.f32.gmra.mxu3 %v6910_v61  ;;  %v2725_v13 = vperm.slane %v6925_v51, 0  ;;  %v6945_v62 = vld [vmem:[%s8895_s1 + $0x7] ss:$8 sm:$0xf] }
 0x1c0   :  { %v5236_v57 = vpack.i.bf16 %v1496_v40, %v1500_v50  ;;  %v5226_v20 = vpack.i.bf16 %v1496_v40, %v1510_v9  ;;  %v5231_v0 = vpack.i.bf16 %v1496_v40, %v1505_v8  ;;  %v5241_v34 = vpack.i.bf16 %v1496_v40, %v1495_v32  ;;  %v1776_v40 = vld [vmem:[%s8897_s6] sm:$0xff] }
 0x1c1   :  { %v3251_v50 = vperm.slane %v6945_v62, 0  ;;  %v2726_v8 = vperm.slane %v6925_v51, 1  ;;  %v2727_v9 = vperm.slane %v6925_v51, 2 }
 0x1c2   :  { %5237 = vrot.lane.b32.xlu0 %v5236_v57, %s5655_s0  ;;  %5227 = vrot.lane.b32.xlu1 %v5226_v20, %s5655_s0  ;;  %v6959_v20 = vld [vmem:[%s8895_s1 + $0x2] ss:$8 sm:$0xf] }
 0x1c3   :  { %5232 = vrot.lane.b32.xlu2 %v5231_v0, %s5655_s0  ;;  %v2555_v11 = vperm.slane %v6959_v20, 0 }
 0x1c5   :  { %v6953_v57 = vpop.permute.xlu2 %5157 }
 0x1c7   :  { %2006 = vmatmul.f32.gmra.mxu2 %v6637_v35 }
 0x1ca   :  { %1792 = vperm.xlu0 %4844, %v1778_v7   ;;  %5242 = vrot.lane.b32.xlu1 %v5241_v34, %s5655_s0 }
 0x1cb   :  { %1797 = vperm.xlu2 %5246, %v1779_v52   ;;  %v5159_v52 = vunpack.i.l.bf16 %v6953_v57 }
 0x1cf   :  { %2009 = vmatmul.f32.gmra.mxu2 %v6688_v16 }
 0x1d2   :  { %2729 = vrot.lane.b32.xlu0 %v2725_v13, %s5658_s23  ;;  %1787 = vperm.xlu1 %4845, %v1777_v33   ;;  %v2556_v13 = vperm.slane %v6959_v20, 1  ;;  %v3252_v33 = vperm.slane %v6945_v62, 1 }
 0x1d3   :  { %1782 = vperm.xlu2 %5246, %v1776_v40   ;;  %v8969_v40 = vunpack.i.h.bf16 %v6953_v57 }
 0x1d7   :  { %2012 = vmatmul.f32.gmra.mxu2 %v6910_v61 }
 0x1da   :  { %3255 = vrot.lane.b32.xlu0 %v3251_v50, %s5659_s26  ;;  %2731 = vrot.lane.b32.xlu1 %v2726_v8, %s5658_s23  ;;  %v9103_v50 = vunpack.i.h.bf16 %v6446_v56  ;;  %v9104_v56 = vunpack.i.h.bf16 %v6435_v25 }
 0x1db   :  { %2733 = vrot.lane.b32.xlu2 %v2727_v9, %s5658_s23 }
 0x1dc   :  { %v6961_v0 = vpop.permute.xlu1 %5152  ;;  %v6963_v32 = vpop.permute.xlu0 %5162 }
 0x1dd   :  { %v8970_v7 = vunpack.i.h.bf16 %v6961_v0  ;;  %v5154_v34 = vunpack.i.l.bf16 %v6961_v0  ;;  %v5164_v49 = vunpack.i.l.bf16 %v6963_v32  ;;  %v8973_v61 = vunpack.i.h.bf16 %v6963_v32 }
 0x1df   :  { %v1072_v8 = vsel %vm782_vm4, %v9103_v50, %v5154_v34  ;;  %v1073_v9 = vsel %vm782_vm4, %v5154_v34, %v8970_v7  ;;  %v1068_v50 = vsel %vm782_vm4, %v9104_v56, %v5159_v52  ;;  %v1069_v34 = vsel %vm782_vm4, %v5159_v52, %v8969_v40 }
 0x1e0   :  { %1937 = vmatpush.msra.mxu0 %v1072_v8  ;;  %2024 = vmatpush.msra.mxu3 %v1073_v9  ;;  %v6992_v8 = vld [vmem:[%s8895_s1 + $0x6] ss:$8 sm:$0xf]  ;;  %v1065_v52 = vsel %vm782_vm4, %v5164_v49, %v8973_v61  ;;  %v9109_v7 = vunpack.i.h.bf16 %v6605_v43 }
 0x1e2   :  { %2561 = vrot.lane.b32.xlu0 %v2556_v13, %s5657_s21  ;;  %3257 = vrot.lane.b32.xlu1 %v3252_v33, %s5659_s26  ;;  %v9105_v33 = vunpack.i.h.bf16 %v6603_v24  ;;  %v3082_v24 = vperm.slane %v6992_v8, 1 }
 0x1e3   :  { %2559 = vrot.lane.b32.xlu2 %v2555_v11, %s5657_s21  ;;  %1938 = vmatpush.msra.mxu0 %v1068_v50  ;;  %v9106_v11 = vunpack.i.h.bf16 %v6473_v29 }
 0x1e4   :  { %2025 = vmatpush.msra.mxu3 %v1069_v34  ;;  %v6994_v13 = vpop.permute.xlu1 %5167  ;;  %v1064_v25 = vsel %vm782_vm4, %v9105_v33, %v5164_v49  ;;  %v2557_v33 = vperm.slane %v6959_v20, 2  ;;  %v3081_v49 = vperm.slane %v6992_v8, 0 }
 0x1e5   :  { %v5178_v9 = vpop.permute.xlu0 %5177  ;;  %v5169_v56 = vunpack.i.l.bf16 %v6994_v13  ;;  %v7001_v50 = vpop.permute.xlu2 %5172  ;;  %1939 = vmatpush.msra.mxu0 %v1064_v25  ;;  %v9107_v25 = vunpack.i.h.bf16 %v6994_v13 }
 0x1e6   :  { %v5179_v40 = vunpack.i.l.bf16 %v5178_v9  ;;  %v5174_v34 = vunpack.i.l.bf16 %v7001_v50  ;;  %2026 = vmatpush.msra.mxu3 %v1065_v52  ;;  %v5180_v61 = vunpack.i.h.bf16 %v5178_v9  ;;  %v9108_v52 = vunpack.i.h.bf16 %v6486_v58 }
 0x1e7   :  { %v1060_v16 = vsel %vm782_vm4, %v9106_v11, %v5169_v56  ;;  %v1061_v35 = vsel %vm782_vm4, %v5169_v56, %v9107_v25  ;;  %v9111_v9 = vunpack.i.h.bf16 %v7001_v50  ;;  %v9112_v58 = vunpack.i.h.bf16 %v6641_v19  ;;  %v9114_v56 = vld [vmem:[#allocation7_spill] sm:$0xff] }
 0x1e8   :  { %1940 = vmatpush.msra.mxu0 %v1060_v16  ;;  %v1585_v30 = vsel %vm263_vm1, %v9108_v52, %v5174_v34  ;;  %2027 = vmatpush.msra.mxu3 %v1061_v35  ;;  %v1416_v29 = vsel %vm436_vm2, %v9109_v7, %v5179_v40  ;;  %v9110_v16 = vld [vmem:[#allocation5_spill] sm:$0xff] }
 0x1e9   :  { %1970 = vmatpush.msra.mxu1 %v1585_v30  ;;  %2103 = vmatpush.msrb.mxu2 %v1416_v29  ;;  %v1581_v35 = vsel %vm263_vm1, %v9112_v58, %v9111_v9  ;;  %v9113_v30 = vunpack.i.h.bf16 %v6730_v54  ;;  %v7041_v7 = vld [vmem:[%s8895_s1 + $0x1] ss:$8 sm:$0xf] }
 0x1ea   :  { %3087 = vrot.lane.b32.xlu0 %v3082_v24, %s5660_s30  ;;  %2563 = vrot.lane.b32.xlu1 %v2557_v33, %s5657_s21  ;;  %v2387_v54 = vperm.slane %v7041_v7, 2  ;;  %v2385_v25 = vperm.slane %v7041_v7, 0  ;;  %v2386_v52 = vperm.slane %v7041_v7, 1 }
 0x1eb   :  { %3085 = vrot.lane.b32.xlu2 %v3081_v49, %s5660_s30  ;;  %1941 = vmatpush.msra.mxu0 %v9110_v16  ;;  %v1412_v43 = vsel %vm436_vm2, %v9113_v30, %v5180_v61  ;;  %v9116_v61 = vunpack.i.h.bf16 %v6695_v59  ;;  %v9117_v49 = vld [vmem:[#allocation4_spill] sm:$0xff] }
 0x1ec   :  { %1971 = vmatpush.msra.mxu1 %v1581_v35  ;;  %2028 = vmatpush.msra.mxu3 %v6085_v4  ;;  %v9115_v4 = vld [vmem:[#allocation6_spill] sm:$0xff]  ;;  %v9119_v35 = vunpack.i.h.bf16 %v6758_v48 }
 0x1ed   :  { %2104 = vmatpush.msrb.mxu2 %v1412_v43  ;;  %v5193_v40 = vpop.permute.xlu0 %5192  ;;  %v7043_v11 = vpop.permute.xlu2 %5187  ;;  %1942 = vmatpush.msra.mxu0 %v9114_v56  ;;  %v7067_v59 = vld [vmem:[%s8895_s1 + $0x20] ss:$8 sm:$0xf]  ;;  %v7072_v16 = vld [vmem:[%s8895_s1 + $0x5] ss:$8 sm:$0xf] }
 0x1ee   :  { %v5194_v19 = vunpack.i.l.bf16 %v5193_v40  ;;  %2029 = vmatpush.msra.mxu3 %v6011_v39  ;;  %v5195_v24 = vunpack.i.h.bf16 %v5193_v40  ;;  %v3421_v58 = vperm.slane %v7067_v59, 0  ;;  %v2911_v43 = vperm.slane %v7072_v16, 0  ;;  %v7090_v48 = vld [vmem:[%s8895_s1] ss:$8 sm:$0xf] }
 0x1ef   :  { %1943 = vmatpush.msra.mxu0 %v9115_v4  ;;  %v2912_v56 = vperm.slane %v7072_v16, 1 }
 0x1f0   :  { %2030 = vmatpush.msra.mxu3 %v6003_v31  ;;  %v1408_v33 = vsel %vm436_vm2, %v9116_v61, %v5194_v19  ;;  %v9118_v31 = vunpack.i.h.bf16 %v6787_v2 }
 0x1f1   :  { %1944 = vmatpush.msra.mxu0 %v9117_v49  ;;  %2105 = vmatpush.msrb.mxu2 %v1408_v33 }
 0x1f2   :  { %2031 = vmatpush.msra.mxu3 %v5886_v17  ;;  %1945 = vmatmul.f32.vlgmr.msra.gmra.mxu0 %v6666_v26  ;;  %v1404_v39 = vsel %vm436_vm2, %v9118_v31, %v5195_v24  ;;  %v9120_v24 = vunpack.i.h.bf16 %v6841_v60  ;;  %v2216_v31 = vperm.slane %v7090_v48, 1 }
 0x1f3   :  { %2032 = vmatmul.f32.vlgmr.msra.gmra.mxu3 %v6666_v26  ;;  %2393 = vrot.lane.b32.xlu0 %v2387_v54, %s5656_s16 }
 0x1f4   :  { %2389 = vrot.lane.b32.xlu1 %v2385_v25, %s5656_s16  ;;  %2106 = vmatpush.msrb.mxu2 %v1404_v39  ;;  %v9121_v25 = vunpack.i.h.bf16 %v6823_v22  ;;  %v9123_v22 = vunpack.i.h.bf16 %v6542_v44  ;;  %v9125_v44 = vunpack.i.h.bf16 %v6557_v47  ;;  %v9128_v47 = vunpack.i.h.bf16 %v6963_v32 }
 0x1f5   :  { %v5208_v29 = vpop.permute.xlu0 %5207  ;;  %v5203_v17 = vpop.permute.xlu2 %5202  ;;  %2391 = vrot.lane.b32.xlu2 %v2386_v52, %s5656_s16  ;;  %v5135_v32 = vunpack.i.h.bf16 %v6728_v46 }
 0x1f6   :  { %v5204_v2 = vunpack.i.l.bf16 %v5203_v17  ;;  %v5205_v9 = vunpack.i.h.bf16 %v5203_v17  ;;  %v5209_v40 = vunpack.i.l.bf16 %v5208_v29  ;;  %v5210_v19 = vunpack.i.h.bf16 %v5208_v29 }
 0x1f7   :  { %v9122_v17 = vunpack.i.h.bf16 %v6839_v3  ;;  %v5190_v3 = vunpack.i.h.bf16 %v7043_v11 }
 0x1f8   :  { %v1245_v30 = vsel %vm609_vm3, %v9119_v35, %v5204_v2  ;;  %v1241_v4 = vsel %vm609_vm3, %v9120_v24, %v5205_v9  ;;  %v1237_v49 = vsel %vm609_vm3, %v9121_v25, %v5209_v40  ;;  %v3422_v40 = vperm.slane %v7067_v59, 1 }
 0x1f9   :  { %2107 = vmatpush.msrb.mxu2 %v1245_v30  ;;  %v1233_v2 = vsel %vm609_vm3, %v9122_v17, %v5210_v19  ;;  %v5189_v30 = vunpack.i.l.bf16 %v7043_v11  ;;  %v9126_v19 = vunpack.i.h.bf16 %v6953_v57  ;;  %v2215_v11 = vperm.slane %v7090_v48, 0 }
 0x1fa   :  { %1948 = vmatmul.f32.gmra.mxu0 %v6713_v27 }
 0x1fb   :  { %2035 = vmatmul.f32.gmra.mxu3 %v6713_v27  ;;  %3425 = vrot.lane.b32.xlu0 %v3421_v58, %s5662_s18  ;;  %v9124_v58 = vunpack.i.h.bf16 %v6961_v0 }
 0x1fc   :  { %2915 = vrot.lane.b32.xlu1 %v2911_v43, %s5661_s17  ;;  %2108 = vmatpush.msrb.mxu2 %v1241_v4  ;;  %v7093_v54 = vpop.permute.xlu1 %5182 }
 0x1fd   :  { %v5184_v61 = vunpack.i.l.bf16 %v7093_v54  ;;  %v5218_v33 = vpop.permute.xlu2 %5217  ;;  %2917 = vrot.lane.b32.xlu2 %v2912_v56, %s5661_s17  ;;  %v5223_v60 = vpop.permute.xlu0 %5222  ;;  %v5185_v39 = vunpack.i.h.bf16 %v7093_v54 }
 0x1fe   :  { %v5219_v52 = vunpack.i.l.bf16 %v5218_v33  ;;  %2109 = vmatpush.msrb.mxu2 %v1237_v49  ;;  %v5220_v29 = vunpack.i.h.bf16 %v5218_v33  ;;  %v5224_v43 = vunpack.i.l.bf16 %v5223_v60  ;;  %v5225_v56 = vunpack.i.h.bf16 %v5223_v60 }
 0x1ff   :  { %v1577_v9 = vsel %vm263_vm1, %v9123_v22, %v5184_v61  ;;  %v1573_v0 = vsel %vm263_vm1, %v9125_v44, %v5185_v39  ;;  %v9127_v33 = vunpack.i.l.bf16 %v6682_v55  ;;  %v5000_v44 = vunpack.i.h.bf16 %v9077_v21 }
 0x200   :  { %2110 = vmatpush.msrb.mxu2 %v1233_v2  ;;  %1972 = vmatpush.msra.mxu1 %v1577_v9  ;;  %v1074_v35 = vsel %vm782_vm4, %v9124_v58, %v5219_v52  ;;  %v1070_v24 = vsel %vm782_vm4, %v9126_v19, %v5220_v29  ;;  %v1066_v60 = vsel %vm782_vm4, %v9128_v47, %v5224_v43  ;;  %v9129_v52 = vunpack.i.h.bf16 %v6682_v55 }
 0x201   :  { %v887_v25 = vsel %vm871_vm7, %v9127_v33, %v5189_v30  ;;  %v9130_v29 = vunpack.i.h.bf16 %v6994_v13  ;;  %v9131_v2 = vunpack.i.l.bf16 %v6628_v45  ;;  %v3253_v9 = vperm.slane %v6945_v62, 2 }
 0x202   :  { %2111 = vmatpush.msrb.mxu2 %v1074_v35  ;;  %1951 = vmatmul.f32.gmra.mxu0 %v6771_v18  ;;  %v9132_v55 = vunpack.i.h.bf16 %v6628_v45  ;;  %v2217_v58 = vperm.slane %v7090_v48, 2  ;;  %v2728_v35 = vperm.slane %v6925_v51, 3  ;;  %v9134_v45 = vunpack.i.h.bf16 %v6668_v36  ;;  %v1830_v54 = vpop.f32.mrf.mxu0 }
 0x203   :  { %2038 = vmatmul.f32.gmra.mxu3 %v6771_v18  ;;  %2221 = vrot.lane.b32.xlu0 %v2216_v31, %s5655_s0  ;;  %v883_v31 = vsel %vm871_vm7, %v9129_v52, %v5190_v3  ;;  %v1062_v17 = vsel %vm782_vm4, %v9130_v29, %v5225_v56  ;;  %v4995_v47 = vunpack.i.h.bf16 %v9087_v14  ;;  %v9143_v52 = vld [vmem:[#allocation16_spill] sm:$0xff] }
 0x204   :  { %1973 = vmatpush.msra.mxu1 %v1573_v0  ;;  %2112 = vmatpush.msrb.mxu2 %v1070_v24  ;;  %v5198_v4 = vpop.permute.xlu1 %5197  ;;  %v9136_v0 = vunpack.i.l.bf16 %v6728_v46  ;;  %v9139_v46 = vunpack.i.l.bf16 %v9077_v21  ;;  %v9144_v29 = vld [vmem:[#allocation8_spill] sm:$0xff] }
 0x205   :  { %4658 = vmatmul.msk.f32.vlgmr.msra.gmra.mxu1 %vm1800_vm9, %v6674_v42  ;;  %v5199_v49 = vunpack.i.l.bf16 %v5198_v4  ;;  %3427 = vrot.lane.b32.xlu1 %v3422_v40, %s5662_s18  ;;  %v5200_v57 = vunpack.i.h.bf16 %v5198_v4  ;;  %v9133_v40 = vunpack.i.l.bf16 %v6668_v36  ;;  %v9137_v36 = vunpack.i.h.bf16 %v6230_v12  ;;  %v9138_v4 = vld [vmem:[#allocation13_spill] sm:$0xff]  ;;  %v9140_v12 = vld [vmem:[#allocation12_spill] sm:$0xff] }
 0x206   :  { %2074 = vmatpush.msrb.mxu1 %v887_v25  ;;  %2113 = vmatpush.msrb.mxu2 %v1066_v60  ;;  %v4949_v33 = vunpack.i.l.bf16 %v9138_v4  ;;  %v541_v25 = vsel %vm525_vm5, %v9139_v46, %v5000_v44  ;;  %v9142_v60 = vunpack.i.l.bf16 %v9083_v15 }
 0x207   :  { %v879_v22 = vsel %vm871_vm7, %v9131_v2, %v5199_v49  ;;  %2219 = vrot.lane.b32.xlu2 %v2215_v11, %s5655_s0  ;;  %v875_v13 = vsel %vm871_vm7, %v9132_v55, %v5200_v57  ;;  %v714_v3 = vsel %vm698_vm6, %v9133_v40, %v5135_v32  ;;  %v4915_v11 = vunpack.i.h.bf16 %v9083_v15  ;;  %v9153_v40 = vld [vmem:[#allocation21_spill] sm:$0xff] }
 0x208   :  { %2075 = vmatpush.msrb.mxu1 %v883_v31  ;;  %2114 = vmatpush.msrb.mxu2 %v1062_v17  ;;  %v9141_v49 = vunpack.i.h.bf16 %v6291_v38  ;;  %v3254_v57 = vperm.slane %v6945_v62, 3  ;;  %v4939_v31 = vunpack.i.l.bf16 %v9143_v52  ;;  %v9145_v38 = vunpack.i.h.bf16 %v9144_v29 }
 0x209   :  { %v533_v21 = vsel %vm525_vm5, %v9142_v60, %v4915_v11  ;;  %v2388_v2 = vperm.slane %v7041_v7, 3  ;;  %v4910_v15 = vunpack.i.h.bf16 %v9090_v23  ;;  %v9147_v32 = vunpack.i.l.bf16 %v9087_v14  ;;  %v9149_v7 = vld [vmem:[#allocation10_spill] sm:$0xff] }
 0x20a   :  { %2076 = vmatpush.msrb.mxu1 %v879_v22  ;;  %2115 = vmatpush.msrb.mxu2 %v6088_v5  ;;  %v9146_v22 = vld [vmem:[#allocation17_spill] sm:$0xff]  ;;  %v9151_v14 = vunpack.i.h.bf16 %v6250_v63  ;;  %v2913_v63 = vperm.slane %v7072_v16, 2  ;;  %v2914_v11 = vperm.slane %v7072_v16, 3 }
 0x20b   :  { %1954 = vmatmul.f32.gmra.mxu0 %v6938_v41  ;;  %2041 = vmatmul.f32.gmra.mxu3 %v6938_v41  ;;  %v368_v62 = vsel %vm352_vm8, %v9147_v32, %v4995_v47 }
 0x20c   :  { %2077 = vmatpush.msrb.mxu1 %v875_v13  ;;  %2116 = vmatpush.msrb.mxu2 %v6051_v6  ;;  %v5213_v30 = vpop.permute.xlu1 %5212  ;;  %v9135_v6 = vld [vmem:[#allocation9_spill] sm:$0xff]  ;;  %v4869_v13 = vunpack.i.l.bf16 %v9149_v7 }
 0x20d   :  { %4659 = vmatmul.msk.f32.gmra.mxu1 %vm1800_vm9, %v6718_v28  ;;  %v5215_v5 = vunpack.i.h.bf16 %v5213_v30  ;;  %v5214_v43 = vunpack.i.l.bf16 %v5213_v30  ;;  %3259 = vrot.lane.b32.xlu0 %v3253_v9, %s5659_s26  ;;  %v4889_v56 = vunpack.i.l.bf16 %v9135_v6  ;;  %v9148_v9 = vunpack.i.h.bf16 %v6261_v1 }
 0x20e   :  { %2078 = vmatpush.msrb.mxu1 %v714_v3  ;;  %2117 = vmatpush.msrb.mxu2 %v6008_v37  ;;  %v3083_v37 = vperm.slane %v6992_v8, 2  ;;  %v356_v30 = vsel %vm352_vm8, %v9151_v14, %v4869_v13  ;;  %v3084_v1 = vperm.slane %v6992_v8, 3  ;;  %v3423_v8 = vperm.slane %v7067_v59, 2 }
 0x20f   :  { %v710_v51 = vsel %vm698_vm6, %v9134_v45, %v5214_v43  ;;  %2223 = vrot.lane.b32.xlu1 %v2217_v58, %s5655_s0  ;;  %2735 = vrot.lane.b32.xlu2 %v2728_v35, %s5658_s23  ;;  %v706_v19 = vsel %vm698_vm6, %v9136_v0, %v5215_v5  ;;  %v702_v24 = vsel %vm698_vm6, %v9137_v36, %v4889_v56  ;;  %v9150_v58 = vunpack.i.l.bf16 %v9090_v23  ;;  %v9152_v43 = vld [vmem:[#allocation20_spill] sm:$0xff]  ;;  %v9154_v0 = vld [vmem:[#allocation22_spill] sm:$0xff] }
 0x210   :  { %2118 = vmatpush.msrb.mxu2 %v5875_v10  ;;  %2079 = vmatpush.msrb.mxu1 %v710_v51  ;;  %v2558_v10 = vperm.slane %v6959_v20, 3  ;;  %v537_v20 = vsel %vm525_vm5, %v9141_v49, %v4949_v33  ;;  %v364_v55 = vsel %vm352_vm8, %v9148_v9, %v4939_v31  ;;  %v9155_v59 = vunpack.i.h.bf16 %v7001_v50 }
 0x211   :  { %2119 = vmatmul.f32.vlgmr.msrb.gmra.mxu2 %v6666_v26  ;;  %v4879_v26 = vunpack.i.l.bf16 %v9140_v12  ;;  %v360_v35 = vsel %vm352_vm8, %v9150_v58, %v4910_v15 }
 0x212   :  { %2080 = vmatpush.msrb.mxu1 %v706_v19 }
 0x213   :  { %v529_v17 = vsel %vm525_vm5, %v9145_v38, %v4879_v26  ;;  %v9156_v26 = vld [vmem:[#allocation18_spill] sm:$0xff] }
 0x214   :  { %2081 = vmatpush.msrb.mxu1 %v702_v24 }
 0x215   :  { %4660 = vmatmul.msk.f32.gmra.mxu1 %vm1800_vm9, %v6779_v53  ;;  %3089 = vrot.lane.b32.xlu0 %v3083_v37, %s5660_s30 }
 0x216   :  { %2082 = vmatpush.msrb.mxu1 %v541_v25 }
 0x217   :  { %2565 = vrot.lane.b32.xlu2 %v2558_v10, %s5657_s21  ;;  %3261 = vrot.lane.b32.xlu1 %v3254_v57, %s5659_s26 }
 0x218   :  { %2083 = vmatpush.msrb.mxu1 %v537_v20 }
 0x219   :  { %2122 = vmatmul.f32.gmra.mxu2 %v6713_v27  ;;  %v1859_v52 = vpop.f32.mrf.mxu1 }
 0x21a   :  { %2084 = vmatpush.msrb.mxu1 %v533_v21 }
 0x21c   :  { %2085 = vmatpush.msrb.mxu1 %v529_v17 }
 0x21d   :  { %4661 = vmatmul.msk.f32.gmra.mxu1 %vm1800_vm9, %v9146_v22  ;;  %v5233_v27 = vpop.permute.xlu2 %5232 }
 0x21e   :  { %2086 = vmatpush.msrb.mxu1 %v368_v62  ;;  %v5235_v51 = vunpack.i.h.bf16 %v5233_v27  ;;  %v5234_v6 = vunpack.i.l.bf16 %v5233_v27 }
 0x21f   :  { %2395 = vrot.lane.b32.xlu2 %v2388_v2, %s5656_s16  ;;  %3091 = vrot.lane.b32.xlu1 %v3084_v1, %s5660_s30 }
 0x220   :  { %2087 = vmatpush.msrb.mxu1 %v364_v55  ;;  %v1582_v24 = vsel %vm263_vm1, %v9155_v59, %v5234_v6  ;;  %v1583_v10 = vsel %vm263_vm1, %v5234_v6, %v5235_v51  ;;  %v1888_v38 = vpop.f32.mrf.mxu2 }
 0x221   :  { %2125 = vmatmul.f32.gmra.mxu2 %v6771_v18  ;;  %v2218_v18 = vperm.slane %v7090_v48, 3 }
 0x222   :  { %2088 = vmatpush.msrb.mxu1 %v360_v35  ;;  %v1862_v35 = vpop.f32.mrf.mxu1 }
 0x223   :  { %2225 = vrot.lane.b32.xlu0 %v2218_v18, %s5655_s0 }
 0x224   :  { %2089 = vmatpush.msrb.mxu1 %v356_v30 }
 0x225   :  { %v7226_v5 = vpop.permute.xlu2 %1797  ;;  %2090 = vmatmul.f32.vlgmr.msrb.gmra.mxu1 %v9152_v43 }
 0x227   :  { %2919 = vrot.lane.b32.xlu1 %v2913_v63, %s5661_s17  ;;  %2921 = vrot.lane.b32.xlu2 %v2914_v11, %s5661_s17 }
 0x229   :  { %2128 = vmatmul.f32.gmra.mxu2 %v6938_v41 }
 0x22a   :  { %v1865_v18 = vpop.f32.mrf.mxu1 }
 0x22b   :  { %3429 = vrot.lane.b32.xlu0 %v3423_v8, %s5662_s18 }
 0x22d   :  { %v7231_v23 = vpop.permute.xlu2 %1782  ;;  %2093 = vmatmul.f32.gmra.mxu1 %v9153_v40 }
 0x22e   :  { %v1831_v21 = vadd.f32 %v1830_v54, %v7231_v23 }
 0x234   :  { %v5238_v3 = vpop.permute.xlu0 %5237  ;;  %v5228_v45 = vpop.permute.xlu1 %5227 }
 0x235   :  { %v5230_v56 = vunpack.i.h.bf16 %v5228_v45  ;;  %v5229_v41 = vunpack.i.l.bf16 %v5228_v45  ;;  %v7239_v44 = vpop.permute.xlu2 %2733  ;;  %2096 = vmatmul.f32.gmra.mxu1 %v9154_v0  ;;  %v5240_v19 = vunpack.i.h.bf16 %v5238_v3  ;;  %v5239_v48 = vunpack.i.l.bf16 %v5238_v3  ;;  %v1917_v3 = vpop.f32.mrf.mxu3 }
 0x236   :  { %v1891_v0 = vpop.f32.mrf.mxu2 }
 0x237   :  { %v1586_v37 = vsel %vm263_vm1, %v5174_v34, %v5229_v41  ;;  %v1587_v36 = vsel %vm263_vm1, %v5229_v41, %v5230_v56  ;;  %v1578_v34 = vsel %vm263_vm1, %v5184_v61, %v5239_v48  ;;  %v1579_v4 = vsel %vm263_vm1, %v5239_v48, %v5240_v19 }
 0x238   :  { %2057 = vmatpush.msrb.mxu0 %v1586_v37  ;;  %2144 = vmatpush.msrb.mxu3 %v1587_v36  ;;  %v1918_v41 = vadd.f32 %v1917_v3, %v7231_v23 }
 0x23a   :  { %2058 = vmatpush.msrb.mxu0 %v1582_v24  ;;  %2145 = vmatpush.msrb.mxu3 %v1583_v10  ;;  %v1868_v56 = vpop.f32.mrf.mxu1 }
 0x23c   :  { %v7257_v33 = vpop.permute.xlu0 %1792  ;;  %v5243_v46 = vpop.permute.xlu1 %5242  ;;  %2059 = vmatpush.msrb.mxu0 %v1578_v34  ;;  %2146 = vmatpush.msrb.mxu3 %v1579_v4 }
 0x23d   :  { %v5245_v50 = vunpack.i.h.bf16 %v5243_v46  ;;  %v5244_v25 = vunpack.i.l.bf16 %v5243_v46  ;;  %v2560_v12 = vpop.permute.xlu2 %2559  ;;  %2099 = vmatmul.f32.gmra.mxu1 %v9156_v26  ;;  %v1920_v19 = vpop.f32.mrf.mxu3 }
 0x23e   :  { %v7260_v16 = vmul.f32 0.0, %v2560_v12 }
 0x23f   :  { %v1574_v61 = vsel %vm263_vm1, %v5185_v39, %v5244_v25  ;;  %v1575_v49 = vsel %vm263_vm1, %v5244_v25, %v5245_v50 }
 0x240   :  { %v5252_v20 = vpack.i.bf16 %v7260_v16, %v7260_v16  ;;  %2060 = vmatpush.msrb.mxu0 %v1574_v61  ;;  %2147 = vmatpush.msrb.mxu3 %v1575_v49 }
 0x241   :  { %4662 = vmatmul.msk.f32.vlgmr.msrb.gmra.mxu0 %vm1800_vm9, %v6674_v42  ;;  %4666 = vmatmul.msk.f32.vlgmr.msrb.gmra.mxu3 %vm1800_vm9, %v6674_v42  ;;  %v1860_v42 = vadd.f32 %v1859_v52, %v1831_v21 }
 0x242   :  { %5253 = vrot.lane.b32.xlu1 %v5252_v20, %s5660_s30 }
 0x243   :  { %v1889_v17 = vadd.f32 %v1888_v38, %v1860_v42 }
 0x244   :  { %v2730_v47 = vpop.permute.xlu0 %2729  ;;  %v7273_v60 = vpop.permute.xlu1 %1787 }
 0x245   :  { %v7275_v39 = vmul.f32 0.0, %v2730_v47  ;;  %v7291_v2 = vmax.f32 %v1889_v17, 0.0  ;;  %v7308_v55 = vpop.permute.xlu2 %3085  ;;  %v1921_v61 = vadd.f32 %v1920_v19, %v7273_v60 }
 0x247   :  { %v5247_v57 = vpack.i.bf16 %v7275_v39, %v7275_v39  ;;  %v3101_v26 = vmul.f32 %v7308_v55, %v7291_v2 }
 0x249   :  { %4663 = vmatmul.msk.f32.gmra.mxu0 %vm1800_vm9, %v6718_v28  ;;  %4667 = vmatmul.msk.f32.gmra.mxu3 %vm1800_vm9, %v6718_v28 }
 0x24a   :  { %5248 = vrot.lane.b32.xlu2 %v5247_v57, %s5661_s17 }
 0x24c   :  { %v7285_v31 = vpop.permute.xlu0 %3255  ;;  %v2732_v29 = vpop.permute.xlu1 %2731 }
 0x24d   :  { %v7316_v30 = vsel %vm782_vm4, %v2730_v47, %v2732_v29  ;;  %v3271_v3 = vmul.f32 %v7285_v31, %v7291_v2 }
 0x24f   :  { %v7320_v1 = vpop.permute.xlu2 %2391 }
 0x251   :  { %4664 = vmatmul.msk.f32.gmra.mxu0 %vm1800_vm9, %v6779_v53  ;;  %4668 = vmatmul.msk.f32.gmra.mxu3 %vm1800_vm9, %v6779_v53  ;;  %v1833_v53 = vpop.f32.mrf.mxu0 }
 0x252   :  { %v1834_v48 = vadd.f32 %v1833_v53, %v7273_v60 }
 0x254   :  { %v2562_v15 = vpop.permute.xlu0 %2561  ;;  %v7293_v27 = vpop.permute.xlu1 %3257  ;;  %v1863_v46 = vadd.f32 %v1862_v35, %v1834_v48 }
 0x255   :  { %v7296_v28 = vsel %vm609_vm3, %v2560_v12, %v2562_v15  ;;  %v7355_v12 = vsel %vm782_vm4, %v2732_v29, %v7239_v44  ;;  %v7381_v53 = vsel %vm525_vm5, %v7285_v31, %v7293_v27 }
 0x256   :  { %v2576_v32 = vmul.f32 %v7296_v28, %v7291_v2  ;;  %v1892_v54 = vadd.f32 %v1891_v0, %v1863_v46 }
 0x257   :  { %v7330_v45 = vpop.permute.xlu2 %2917 }
 0x258   :  { %v5267_v62 = vpack.i.bf16 %v2576_v32, %v7260_v16  ;;  %v1923_v32 = vpop.f32.mrf.mxu3 }
 0x259   :  { %4665 = vmatmul.msk.f32.gmra.mxu0 %vm1800_vm9, %v9146_v22  ;;  %4669 = vmatmul.msk.f32.gmra.mxu3 %vm1800_vm9, %v9146_v22  ;;  %v1836_v7 = vpop.f32.mrf.mxu0  ;;  %v2746_v22 = vmul.f32 %v7316_v30, %v7291_v2 }
 0x25a   :  { %5268 = vrot.lane.b32.xlu2 %v5267_v62, %s5660_s30 }
 0x25b   :  { %v5262_v40 = vpack.i.bf16 %v2746_v22, %v7275_v39 }
 0x25c   :  { %v7306_v9 = vpop.permute.xlu1 %2563  ;;  %v7340_v11 = vpop.permute.xlu0 %3087 }
 0x25d   :  { %v7345_v4 = vsel %vm698_vm6, %v7308_v55, %v7340_v11  ;;  %v7349_v50 = vsel %vm609_vm3, %v2562_v15, %v7306_v9  ;;  %v1894_v15 = vpop.f32.mrf.mxu2 }
 0x260   :  { %v1926_v46 = vpop.f32.mrf.mxu3 }
 0x261   :  { %v1839_v43 = vpop.f32.mrf.mxu0  ;;  %v7338_v59 = vpop.permute.xlu2 %2219 }
 0x265   :  { %v7404_v19 = vpop.permute.xlu0 %2393 }
 0x266   :  { %v2390_v13 = vpop.permute.xlu1 %2389 }
 0x267   :  { %v7310_v58 = vmul.f32 0.0, %v2390_v13  ;;  %v7325_v63 = vsel %vm436_vm2, %v2390_v13, %v7320_v1 }
 0x268   :  { %v2406_v8 = vmul.f32 %v7325_v63, %v7291_v2 }
 0x269   :  { %v5257_v14 = vpack.i.bf16 %v7310_v58, %v7310_v58  ;;  %v7383_v13 = vpop.permute.xlu2 %2735 }
 0x26a   :  { %v5272_v6 = vpack.i.bf16 %v2406_v8, %v7310_v58  ;;  %v1840_v8 = vadd.f32 %v1839_v43, %v7226_v5  ;;  %v7409_v43 = vsel %vm436_vm2, %v7320_v1, %v7404_v19 }
 0x26b   :  { %5258 = vrot.lane.b32.xlu1 %v5257_v14, %s5659_s26 }
 0x26e   :  { %v7336_v37 = vpop.permute.xlu1 %2915 }
 0x26f   :  { %v1946_v51 = vpop.f32.mrf.mxu0  ;;  %v7370_v42 = vsel %vm871_vm7, %v7336_v37, %v7330_v45 }
 0x270   :  { %v1947_v36 = vadd.f32 %v1946_v51, %v1918_v41 }
 0x273   :  { %5263 = vrot.lane.b32.xlu1 %v5262_v40, %s5661_s17  ;;  %v1924_v40 = vadd.f32 %v1923_v32, %v7257_v33 }
 0x277   :  { %v1949_v24 = vpop.f32.mrf.mxu0  ;;  %v7372_v29 = vpop.permute.xlu1 %3427 }
 0x278   :  { %v1950_v21 = vadd.f32 %v1949_v24, %v1921_v61 }
 0x27b   :  { %5273 = vrot.lane.b32.xlu1 %v5272_v6, %s5659_s26  ;;  %v2931_v6 = vmul.f32 %v7336_v37, %v7291_v2 }
 0x27f   :  { %v1952_v35 = vpop.f32.mrf.mxu0 }
 0x280   :  { %v1953_v48 = vadd.f32 %v1952_v35, %v1924_v40 }
 0x282   :  { %v1975_v10 = vpop.f32.mrf.mxu1 }
 0x283   :  { %v1976_v34 = vadd.f32 %v1975_v10, %v1947_v36 }
 0x285   :  { %v7351_v25 = vmax.f32 %v1976_v34, 0.0 }
 0x287   :  { %9157 = vst [vmem:[#allocation19_spill] sm:$0xff] %v7351_v25  ;;  %v2747_v49 = vmul.f32 %v7355_v12, %v7351_v25  ;;  %v3102_v20 = vmul.f32 %v7345_v4, %v7351_v25  ;;  %v2577_v47 = vmul.f32 %v7349_v50, %v7351_v25  ;;  %v3272_v22 = vmul.f32 %v7381_v53, %v7351_v25 }
 0x289   :  { %v5277_v57 = vpack.i.bf16 %v7275_v39, %v2747_v49  ;;  %v5292_v52 = vpack.i.bf16 %v3102_v20, %v3101_v26  ;;  %v5287_v17 = vpack.i.bf16 %v7260_v16, %v2577_v47  ;;  %v1837_v39 = vadd.f32 %v1836_v7, %v7257_v33  ;;  %v7415_v49 = vpop.permute.xlu2 %2565 }
 0x28a   :  { %v1978_v38 = vpop.f32.mrf.mxu1  ;;  %v7386_v16 = vmax.f32 %v1892_v54, 0.0  ;;  %v2932_v7 = vmul.f32 %v7370_v42, %v7351_v25  ;;  %v5282_v36 = vpack.i.bf16 %v3272_v22, %v3271_v3  ;;  %v1869_v26 = vadd.f32 %v1868_v56, %v1840_v8  ;;  %v1897_v54 = vpop.f32.mrf.mxu2 }
 0x28b   :  { %v1979_v62 = vadd.f32 %v1978_v38, %v1950_v21  ;;  %5278 = vrot.lane.b32.xlu0 %v5277_v57, %s5661_s17  ;;  %5293 = vrot.lane.b32.xlu2 %v5292_v52, %s5657_s21  ;;  %v1866_v0 = vadd.f32 %v1865_v18, %v1837_v39  ;;  %v7413_v18 = vpop.permute.xlu1 %2223  ;;  %v2407_v47 = vmul.f32 %v7409_v43, %v7351_v25  ;;  %v1955_v56 = vpop.f32.mrf.mxu0 }
 0x28c   :  { %5288 = vrot.lane.b32.xlu1 %v5287_v17, %s5660_s30  ;;  %v2581_v51 = vmul.f32 %v7296_v28, %v7386_v16  ;;  %v5302_v24 = vpack.i.bf16 %v2932_v7, %v2931_v6  ;;  %v3106_v57 = vmul.f32 %v7308_v55, %v7386_v16  ;;  %v1927_v52 = vadd.f32 %v1926_v46, %v7226_v5  ;;  %v7438_v8 = vpop.permute.xlu0 %3425 }
 0x28d   :  { %v7388_v14 = vmax.f32 %v1979_v62, 0.0  ;;  %v1895_v20 = vadd.f32 %v1894_v15, %v1866_v0  ;;  %v1898_v38 = vadd.f32 %v1897_v54, %v1869_v26  ;;  %v2936_v15 = vmul.f32 %v7336_v37, %v7386_v16 }
 0x28e   :  { %v1956_v62 = vadd.f32 %v1955_v56, %v1927_v52  ;;  %v5297_v39 = vpack.i.bf16 %v7310_v58, %v2407_v47  ;;  %v7451_v58 = vsel %vm352_vm8, %v7438_v8, %v7372_v29  ;;  %v2751_v46 = vmul.f32 %v7316_v30, %v7386_v16  ;;  %v7481_v52 = vpop.f32.mrf.mxu3 }
 0x28f   :  { %9158 = vst [vmem:[#allocation11_spill] sm:$0xff] %v7388_v14  ;;  %v2582_v41 = vmul.f32 %v7349_v50, %v7388_v14  ;;  %v3107_v1 = vmul.f32 %v7345_v4, %v7388_v14  ;;  %v2937_v21 = vmul.f32 %v7370_v42, %v7388_v14  ;;  %v7431_v32 = vmax.f32 %v1895_v20, 0.0 }
 0x290   :  { %v7440_v3 = vmax.f32 %v1898_v38, 0.0  ;;  %v3446_v26 = vmul.f32 %v7438_v8, %v7386_v16 }
 0x291   :  { %v5317_v10 = vpack.i.bf16 %v2582_v41, %v2581_v51  ;;  %v5322_v35 = vpack.i.bf16 %v3107_v1, %v3106_v57  ;;  %v5332_v7 = vpack.i.bf16 %v2937_v21, %v2936_v15  ;;  %v7436_v40 = vmul.f32 %v7316_v30, %v7431_v32 }
 0x292   :  { %v1981_v34 = vpop.f32.mrf.mxu1  ;;  %v2586_v47 = vmul.f32 %v7296_v28, %v7431_v32  ;;  %v2004_v57 = vpop.f32.mrf.mxu2 }
 0x293   :  { %v1982_v61 = vadd.f32 %v1981_v34, %v1953_v48  ;;  %5283 = vrot.lane.b32.xlu0 %v5282_v36, %s5656_s16  ;;  %5303 = vrot.lane.b32.xlu2 %v5302_v24, %s5658_s23  ;;  %v7454_v41 = vpop.permute.xlu1 %3261  ;;  %v2752_v48 = vmul.f32 %v7355_v12, %v7388_v14  ;;  %v3447_v36 = vmul.f32 %v7451_v58, %v7388_v14 }
 0x294   :  { %5318 = vrot.lane.b32.xlu1 %v5317_v10, %s5660_s30  ;;  %v7464_v10 = vpop.permute.xlu2 %2395 }
 0x295   :  { %v7427_v17 = vmax.f32 %v1982_v61, 0.0  ;;  %v2761_v61 = vmul.f32 %v7316_v30, %v7440_v3  ;;  %v5307_v1 = vpack.i.bf16 %v2752_v48, %v2751_v46  ;;  %v5337_v54 = vpack.i.bf16 %v3447_v36, %v3446_v26 }
 0x296   :  { %v3277_v30 = vmul.f32 %v7381_v53, %v7388_v14 }
 0x297   :  { %9159 = vst [vmem:[#allocation15_spill] sm:$0xff] %v7427_v17  ;;  %v7446_v6 = vmul.f32 %v7355_v12, %v7427_v17  ;;  %v2587_v34 = vmul.f32 %v7349_v50, %v7427_v17  ;;  %v2417_v38 = vmul.f32 %v7409_v43, %v7427_v17  ;;  %v2942_v46 = vmul.f32 %v7370_v42, %v7427_v17 }
 0x299   :  { %v5342_v24 = vpack.i.bf16 %v7446_v6, %v7436_v40  ;;  %v5352_v21 = vpack.i.bf16 %v2587_v34, %v2586_v47  ;;  %v2412_v34 = vmul.f32 %v7409_v43, %v7388_v14  ;;  %v2941_v47 = vmul.f32 %v7336_v37, %v7431_v32 }
 0x29a   :  { %v1984_v22 = vpop.f32.mrf.mxu1 }
 0x29b   :  { %v1985_v51 = vadd.f32 %v1984_v22, %v1956_v62  ;;  %5298 = vrot.lane.b32.xlu0 %v5297_v39, %s5659_s26  ;;  %5323 = vrot.lane.b32.xlu2 %v5322_v35, %s5657_s21  ;;  %v7489_v15 = vpop.permute.xlu1 %3091  ;;  %v3276_v39 = vmul.f32 %v7285_v31, %v7386_v16  ;;  %v3281_v35 = vmul.f32 %v7285_v31, %v7431_v32 }
 0x29c   :  { %5333 = vrot.lane.b32.xlu1 %v5332_v7, %s5658_s23  ;;  %v7491_v62 = vpop.permute.xlu2 %2921  ;;  %v2416_v22 = vmul.f32 %v7325_v63, %v7431_v32 }
 0x29d   :  { %v7456_v0 = vmax.f32 %v1985_v51, 0.0  ;;  %v5312_v7 = vpack.i.bf16 %v3277_v30, %v3276_v39  ;;  %v2222_v51 = vpop.permute.xlu0 %2221 }
 0x29e   :  { %v5362_v6 = vpack.i.bf16 %v2417_v38, %v2416_v22  ;;  %v7504_v48 = vsel %vm263_vm1, %v7338_v59, %v2222_v51  ;;  %v7508_v36 = vsel %vm263_vm1, %v2222_v51, %v7413_v18  ;;  %v5367_v38 = vpack.i.bf16 %v2942_v46, %v2941_v47 }
 0x29f   :  { %9160 = vst [vmem:[#allocation14_spill] sm:$0xff] %v7456_v0  ;;  %v2762_v20 = vmul.f32 %v7355_v12, %v7456_v0  ;;  %v3282_v12 = vmul.f32 %v7381_v53, %v7427_v17  ;;  %v2247_v26 = vmul.f32 %v7508_v36, %v7427_v17  ;;  %v3286_v22 = vmul.f32 %v7285_v31, %v7440_v3 }
 0x2a0   :  { %v3112_v46 = vmul.f32 %v7345_v4, %v7427_v17  ;;  %v2592_v47 = vmul.f32 %v7349_v50, %v7456_v0 }
 0x2a1   :  { %v5382_v56 = vpack.i.bf16 %v2762_v20, %v2761_v61  ;;  %v5347_v40 = vpack.i.bf16 %v3282_v12, %v3281_v35  ;;  %v2007_v61 = vpop.f32.mrf.mxu2  ;;  %v2411_v20 = vmul.f32 %v7325_v63, %v7386_v16  ;;  %v3287_v35 = vmul.f32 %v7381_v53, %v7456_v0 }
 0x2a2   :  { %v3117_v53 = vmul.f32 %v7345_v4, %v7456_v0  ;;  %v2008_v50 = vadd.f32 %v2007_v61, %v7273_v60  ;;  %v2236_v61 = vmul.f32 %v7504_v48, %v7291_v2 }
 0x2a3   :  { %5308 = vrot.lane.b32.xlu0 %v5307_v1, %s5661_s17  ;;  %5338 = vrot.lane.b32.xlu2 %v5337_v54, %s5655_s0  ;;  %v2036_v1 = vpop.f32.mrf.mxu3  ;;  %v2246_v54 = vmul.f32 %v7504_v48, %v7431_v32  ;;  %v5327_v12 = vpack.i.bf16 %v2412_v34, %v2411_v20  ;;  %v5387_v51 = vpack.i.bf16 %v3287_v35, %v3286_v22 }
 0x2a4   :  { %5353 = vrot.lane.b32.xlu1 %v5352_v21, %s5660_s30  ;;  %v7522_v21 = vpop.permute.xlu1 %2919  ;;  %v7524_v30 = vpop.permute.xlu2 %5248 }
 0x2a5   :  { %v5377_v39 = vpack.i.bf16 %v2247_v26, %v2246_v54  ;;  %v2591_v54 = vmul.f32 %v7296_v28, %v7440_v3  ;;  %v2037_v28 = vadd.f32 %v2036_v1, %v2008_v50 }
 0x2a7   :  { %v5392_v35 = vpack.i.bf16 %v2592_v47, %v2591_v54  ;;  %v2091_v47 = vpop.f32.mrf.mxu1 }
 0x2ab   :  { %5313 = vrot.lane.b32.xlu0 %v5312_v7, %s5656_s16  ;;  %5348 = vrot.lane.b32.xlu2 %v5347_v40, %s5656_s16  ;;  %v2010_v7 = vpop.f32.mrf.mxu2  ;;  %v2039_v40 = vpop.f32.mrf.mxu3 }
 0x2ac   :  { %5363 = vrot.lane.b32.xlu1 %v5362_v6, %s5659_s26 }
 0x2b3   :  { %5328 = vrot.lane.b32.xlu0 %v5327_v12, %s5659_s26  ;;  %5368 = vrot.lane.b32.xlu2 %v5367_v38, %s5658_s23  ;;  %v2042_v22 = vpop.f32.mrf.mxu3 }
 0x2b4   :  { %5378 = vrot.lane.b32.xlu1 %v5377_v39, %s5662_s18  ;;  %v7533_v6 = vpop.permute.xlu1 %5253  ;;  %v7535_v34 = vpop.permute.xlu2 %5268 }
 0x2b5   :  { %v5256_v31 = vunpack.i.h.bf16 %v7533_v6  ;;  %v8976_v26 = vunpack.i.h.bf16 %v7535_v34  ;;  %v2013_v39 = vpop.f32.mrf.mxu2 }
 0x2b7   :  { %v7557_v4 = vsel %vm698_vm6, %v5256_v31, %v8976_v26 }
 0x2bb   :  { %5343 = vrot.lane.b32.xlu0 %v5342_v24, %s5661_s17  ;;  %5383 = vrot.lane.b32.xlu2 %v5382_v56, %s5661_s17  ;;  %v3111_v24 = vmul.f32 %v7308_v55, %v7431_v32  ;;  %v3116_v56 = vmul.f32 %v7308_v55, %v7440_v3  ;;  %v2005_v55 = vadd.f32 %v2004_v57, %v7231_v23 }
 0x2bc   :  { %5388 = vrot.lane.b32.xlu1 %v5387_v51, %s5656_s16  ;;  %v3452_v51 = vmul.f32 %v7451_v58, %v7427_v17 }
 0x2bd   :  { %v5357_v12 = vpack.i.bf16 %v3112_v46, %v3111_v24  ;;  %v5397_v38 = vpack.i.bf16 %v3117_v53, %v3116_v56  ;;  %v2947_v46 = vmul.f32 %v7370_v42, %v7456_v0  ;;  %v7569_v53 = vmul.f32 0.0, %v7338_v59 }
 0x2be   :  { %v2062_v20 = vpop.f32.mrf.mxu0  ;;  %v2034_v31 = vadd.f32 %v7481_v52, %v2005_v55  ;;  %v3451_v24 = vmul.f32 %v7438_v8, %v7431_v32  ;;  %v2946_v56 = vmul.f32 %v7336_v37, %v7440_v3  ;;  %v2739_v37 = vsel %vm782_vm4, %v7239_v44, %v7383_v13 }
 0x2bf   :  { %v3457_v55 = vmul.f32 %v7451_v58, %v7456_v0 }
 0x2c0   :  { %v2063_v54 = vadd.f32 %v2062_v20, %v2034_v31  ;;  %v5407_v42 = vpack.i.bf16 %v2947_v46, %v2946_v56  ;;  %v2422_v20 = vmul.f32 %v7409_v43, %v7456_v0  ;;  %v2011_v46 = vadd.f32 %v2010_v7, %v7257_v33 }
 0x2c1   :  { %v3456_v31 = vmul.f32 %v7438_v8, %v7440_v3 }
 0x2c2   :  { %v7583_v52 = vmax.f32 %v2063_v54, 0.0  ;;  %v2014_v54 = vadd.f32 %v2013_v39, %v7226_v5 }
 0x2c3   :  { %5358 = vrot.lane.b32.xlu0 %v5357_v12, %s5657_s21  ;;  %5398 = vrot.lane.b32.xlu2 %v5397_v38, %s5657_s21  ;;  %v5372_v12 = vpack.i.bf16 %v3452_v51, %v3451_v24  ;;  %v2120_v38 = vpop.f32.mrf.mxu2  ;;  %v2040_v24 = vadd.f32 %v2039_v40, %v2011_v46  ;;  %v5412_v43 = vpack.i.bf16 %v3457_v55, %v3456_v31 }
 0x2c4   :  { %5393 = vrot.lane.b32.xlu1 %v5392_v35, %s5660_s30  ;;  %v5427_v35 = vpack.i.bf16 %v2236_v61, %v7569_v53  ;;  %9162 = vst [vmem:[#allocation7_spill] sm:$0xff] %v7583_v52  ;;  %v2149_v50 = vpop.f32.mrf.mxu3  ;;  %v2421_v61 = vmul.f32 %v7325_v63, %v7440_v3  ;;  %v2748_v44 = vmul.f32 %v2739_v37, %v7583_v52 }
 0x2c5   :  { %v2043_v63 = vadd.f32 %v2042_v22, %v2014_v54  ;;  %v3442_v40 = vmul.f32 %v7451_v58, %v7351_v25  ;;  %v2251_v55 = vmul.f32 %v7504_v48, %v7440_v3  ;;  %v3260_v22 = vpop.permute.xlu0 %3259 }
 0x2c6   :  { %v2065_v57 = vpop.f32.mrf.mxu0 }
 0x2c7   :  { %v2066_v1 = vadd.f32 %v2065_v57, %v2037_v28  ;;  %v2094_v57 = vpop.f32.mrf.mxu1 }
 0x2c9   :  { %v7578_v59 = vmax.f32 %v2066_v1, 0.0  ;;  %v5402_v1 = vpack.i.bf16 %v2422_v20, %v2421_v61 }
 0x2cb   :  { %9161 = vst [vmem:[#allocation5_spill] sm:$0xff] %v7578_v59  ;;  %5373 = vrot.lane.b32.xlu0 %v5372_v12, %s5655_s0  ;;  %5408 = vrot.lane.b32.xlu2 %v5407_v42, %s5658_s23  ;;  %v2753_v51 = vmul.f32 %v2739_v37, %v7578_v59  ;;  %v2123_v7 = vpop.f32.mrf.mxu2  ;;  %v2252_v42 = vmul.f32 %v7508_v36, %v7456_v0 }
 0x2cc   :  { %5428 = vrot.lane.b32.xlu1 %v5427_v35, %s5662_s18  ;;  %v3441_v35 = vmul.f32 %v7438_v8, %v7291_v2  ;;  %v2152_v20 = vpop.f32.mrf.mxu3 }
 0x2cd   :  { %v5452_v56 = vpack.i.bf16 %v2748_v44, %v2753_v51  ;;  %v5417_v31 = vpack.i.bf16 %v2252_v42, %v2251_v55  ;;  %v5442_v42 = vpack.i.bf16 %v7569_v53, %v7569_v53  ;;  %v2237_v55 = vmul.f32 %v7508_v36, %v7351_v25 }
 0x2ce   :  { %v2068_v28 = vpop.f32.mrf.mxu0  ;;  %v5432_v44 = vpack.i.bf16 %v3442_v40, %v3441_v35 }
 0x2cf   :  { %v2069_v12 = vadd.f32 %v2068_v28, %v2040_v24  ;;  %v2092_v28 = vadd.f32 %v2091_v47, %v7231_v23  ;;  %v2097_v24 = vpop.f32.mrf.mxu1 }
 0x2d1   :  { %v7613_v51 = vmax.f32 %v2069_v12, 0.0  ;;  %v2121_v58 = vadd.f32 %v2120_v38, %v2092_v28  ;;  %v2241_v12 = vmul.f32 %v7504_v48, %v7386_v16  ;;  %v2095_v38 = vadd.f32 %v2094_v57, %v7273_v60  ;;  %v3090_v48 = vpop.permute.xlu0 %3089 }
 0x2d2   :  { %v3265_v60 = vsel %vm525_vm5, %v3260_v22, %v7454_v41 }
 0x2d3   :  { %5403 = vrot.lane.b32.xlu0 %v5402_v1, %s5659_s26  ;;  %5413 = vrot.lane.b32.xlu2 %v5412_v43, %s5655_s0  ;;  %9163 = vst [vmem:[#allocation6_spill] sm:$0xff] %v7613_v51  ;;  %v2758_v8 = vmul.f32 %v2739_v37, %v7613_v51  ;;  %v2150_v43 = vadd.f32 %v2149_v50, %v2121_v58  ;;  %v2126_v54 = vpop.f32.mrf.mxu2 }
 0x2d4   :  { %5453 = vrot.lane.b32.xlu1 %v5452_v56, %s5661_s17  ;;  %v2242_v56 = vmul.f32 %v7508_v36, %v7388_v14  ;;  %v2569_v50 = vsel %vm609_vm3, %v7306_v9, %v7415_v49 }
 0x2d5   :  { %v7635_v40 = vmax.f32 %v2150_v43, 0.0  ;;  %v2588_v9 = vmul.f32 %v2569_v50, %v7613_v51 }
 0x2d6   :  { %v2071_v39 = vpop.f32.mrf.mxu0  ;;  %v5422_v35 = vpack.i.bf16 %v2242_v56, %v2241_v12  ;;  %v5437_v56 = vpack.i.bf16 %v7569_v53, %v2237_v55  ;;  %v2578_v53 = vmul.f32 %v2569_v50, %v7583_v52 }
 0x2d7   :  { %v2072_v46 = vadd.f32 %v2071_v39, %v2043_v63  ;;  %v2098_v63 = vadd.f32 %v2097_v24, %v7257_v33  ;;  %v2124_v33 = vadd.f32 %v2123_v7, %v2095_v38  ;;  %v2100_v28 = vpop.f32.mrf.mxu1  ;;  %v3274_v7 = vmul.f32 %v3265_v60, %v7635_v40 }
 0x2d8   :  { %v2583_v38 = vmul.f32 %v2569_v50, %v7578_v59 }
 0x2d9   :  { %v7615_v61 = vmax.f32 %v2072_v46, 0.0  ;;  %v2127_v57 = vadd.f32 %v2126_v54, %v2098_v63  ;;  %v2153_v46 = vadd.f32 %v2152_v20, %v2124_v33  ;;  %v7668_v63 = vpop.permute.xlu0 %2225 }
 0x2db   :  { %9164 = vst [vmem:[#allocation4_spill] sm:$0xff] %v7615_v61  ;;  %5418 = vrot.lane.b32.xlu0 %v5417_v31, %s5662_s18  ;;  %5433 = vrot.lane.b32.xlu2 %v5432_v44, %s5655_s0  ;;  %v2763_v1 = vmul.f32 %v2739_v37, %v7615_v61  ;;  %v2155_v37 = vpop.f32.mrf.mxu3  ;;  %v2593_v39 = vmul.f32 %v2569_v50, %v7615_v61  ;;  %v2129_v20 = vpop.f32.mrf.mxu2  ;;  %v7663_v12 = vmax.f32 %v2153_v46, 0.0 }
 0x2dc   :  { %v2156_v31 = vadd.f32 %v2155_v37, %v2127_v57  ;;  %v5477_v57 = vpack.i.bf16 %v2578_v53, %v2583_v38  ;;  %v3094_v53 = vsel %vm698_vm6, %v7340_v11, %v3090_v48  ;;  %v7721_v11 = vsel %vm871_vm7, %v7330_v45, %v7522_v21 }
 0x2dd   :  { %v7621_v23 = vpop.permute.xlu1 %5258  ;;  %v5467_v47 = vpack.i.bf16 %v2758_v8, %v2763_v1  ;;  %v5472_v58 = vpack.i.bf16 %v2588_v9, %v2593_v39  ;;  %v3264_v8 = vsel %vm525_vm5, %v7293_v27, %v3260_v22  ;;  %v5251_v1 = vunpack.i.h.bf16 %v7524_v30 }
 0x2de   :  { %v3273_v36 = vmul.f32 %v3264_v8, %v7583_v52  ;;  %v7665_v27 = vmax.f32 %v2156_v31, 0.0  ;;  %v3279_v9 = vmul.f32 %v3265_v60, %v7663_v12  ;;  %v3278_v46 = vmul.f32 %v3264_v8, %v7578_v59 }
 0x2df   :  { %5468 = vrot.lane.b32.xlu1 %v5467_v47, %s5661_s17  ;;  %v2101_v47 = vadd.f32 %v2100_v28, %v7226_v5  ;;  %v3283_v50 = vmul.f32 %v3264_v8, %v7613_v51  ;;  %v2399_v31 = vsel %vm436_vm2, %v7404_v19, %v7464_v10  ;;  %v3095_v19 = vsel %vm698_vm6, %v3090_v48, %v7489_v15 }
 0x2e0   :  { %v5447_v22 = vpack.i.bf16 %v3274_v7, %v3273_v36  ;;  %v3284_v55 = vmul.f32 %v3265_v60, %v7665_v27  ;;  %v2423_v36 = vmul.f32 %v2399_v31, %v7615_v61  ;;  %v2948_v48 = vmul.f32 %v7721_v11, %v7615_v61 }
 0x2e1   :  { %v2130_v37 = vadd.f32 %v2129_v20, %v2101_v47  ;;  %v2418_v20 = vmul.f32 %v2399_v31, %v7613_v51  ;;  %v3118_v45 = vmul.f32 %v3094_v53, %v7615_v61  ;;  %v2754_v25 = vmul.f32 %v7383_v13, %v7663_v12 }
 0x2e2   :  { %v5462_v47 = vpack.i.bf16 %v3284_v55, %v3283_v50 }
 0x2e3   :  { %5423 = vrot.lane.b32.xlu0 %v5422_v35, %s5662_s18  ;;  %5443 = vrot.lane.b32.xlu2 %v5442_v42, %s5662_s18  ;;  %v2158_v5 = vpop.f32.mrf.mxu3  ;;  %v5261_v42 = vunpack.i.h.bf16 %v7621_v23  ;;  %v5502_v38 = vpack.i.bf16 %v2418_v20, %v2423_v36 }
 0x2e4   :  { %v2159_v35 = vadd.f32 %v2158_v5, %v2130_v37  ;;  %v3114_v37 = vmul.f32 %v3095_v19, %v7665_v27 }
 0x2e5   :  { %v7645_v44 = vpop.permute.xlu1 %5263  ;;  %v7647_v24 = vpop.permute.xlu2 %5293 }
 0x2e6   :  { %v8977_v43 = vunpack.i.h.bf16 %v7645_v44  ;;  %v7692_v7 = vmax.f32 %v2159_v35, 0.0  ;;  %v3113_v35 = vmul.f32 %v3094_v53, %v7613_v51 }
 0x2e7   :  { %5473 = vrot.lane.b32.xlu1 %v5472_v58, %s5660_s30 }
 0x2e8   :  { %v7661_v54 = vsel %vm871_vm7, %v5251_v1, %v8977_v43  ;;  %v5457_v1 = vpack.i.bf16 %v3279_v9, %v3278_v46  ;;  %v3289_v5 = vmul.f32 %v3265_v60, %v7692_v7  ;;  %v5482_v55 = vpack.i.bf16 %v3114_v37, %v3113_v35 }
 0x2e9   :  { %v2938_v37 = vmul.f32 %v7721_v11, %v7578_v59 }
 0x2eb   :  { %5438 = vrot.lane.b32.xlu0 %v5437_v56, %s5662_s18  ;;  %5448 = vrot.lane.b32.xlu2 %v5447_v22, %s5656_s16  ;;  %v7700_v56 = vpop.permute.xlu0 %3429 }
 0x2ec   :  { %9165 = vst [vmem:[#allocation9_spill] sm:$0xff] %v7700_v56 }
 0x2ed   :  { %v7674_v39 = vpop.permute.xlu2 %5303  ;;  %v7676_v33 = vpop.permute.xlu1 %5273 }
 0x2ee   :  { %v5276_v28 = vunpack.i.h.bf16 %v7676_v33 }
 0x2ef   :  { %5478 = vrot.lane.b32.xlu1 %v5477_v57, %s5660_s30  ;;  %v7714_v57 = vsel %vm871_vm7, %v7522_v21, %v7491_v62  ;;  %v3103_v21 = vmul.f32 %v3094_v53, %v7583_v52 }
 0x2f0   :  { %v7690_v58 = vsel %vm525_vm5, %v5261_v42, %v5276_v28  ;;  %v3288_v42 = vmul.f32 %v3264_v8, %v7615_v61  ;;  %v2949_v60 = vmul.f32 %v7714_v57, %v7692_v7 }
 0x2f2   :  { %v5487_v9 = vpack.i.bf16 %v3289_v5, %v3288_v42  ;;  %v5512_v50 = vpack.i.bf16 %v2949_v60, %v2948_v48  ;;  %v2939_v5 = vmul.f32 %v7714_v57, %v7663_v12  ;;  %v2413_v60 = vmul.f32 %v2399_v31, %v7578_v59 }
 0x2f3   :  { %5458 = vrot.lane.b32.xlu0 %v5457_v1, %s5656_s16  ;;  %5463 = vrot.lane.b32.xlu2 %v5462_v47, %s5656_s16  ;;  %v3119_v1 = vmul.f32 %v3095_v19, %v7692_v7  ;;  %v3104_v47 = vmul.f32 %v3095_v19, %v7635_v40 }
 0x2f5   :  { %v7702_v22 = vpop.permute.xlu2 %5323  ;;  %v5492_v20 = vpack.i.bf16 %v3119_v1, %v3118_v45  ;;  %v2408_v1 = vmul.f32 %v2399_v31, %v7583_v52 }
 0x2f7   :  { %5503 = vrot.lane.b32.xlu1 %v5502_v38, %s5659_s26  ;;  %v5507_v38 = vpack.i.bf16 %v3104_v47, %v3103_v21  ;;  %v2229_v47 = vsel %vm263_vm1, %v7413_v18, %v7668_v63  ;;  %v5517_v21 = vpack.i.bf16 %v2408_v1, %v2413_v60 }
 0x2f8   :  { %v2253_v31 = vmul.f32 %v2229_v47, %v7615_v61  ;;  %v2248_v60 = vmul.f32 %v2229_v47, %v7613_v51 }
 0x2fb   :  { %5488 = vrot.lane.b32.xlu0 %v5487_v9, %s5656_s16  ;;  %5483 = vrot.lane.b32.xlu2 %v5482_v55, %s5657_s21  ;;  %v5527_v9 = vpack.i.bf16 %v2939_v5, %v2938_v37  ;;  %v3109_v55 = vmul.f32 %v3095_v19, %v7663_v12  ;;  %v2238_v19 = vmul.f32 %v2229_v47, %v7583_v52 }
 0x2fd   :  { %v7727_v8 = vpop.permute.xlu0 %5278  ;;  %v7729_v46 = vpop.permute.xlu2 %5338 }
 0x2fe   :  { %v7733_v36 = vpop.permute.xlu1 %5288 }
 0x2ff   :  { %5513 = vrot.lane.b32.xlu1 %v5512_v50, %s5658_s23  ;;  %v3108_v50 = vmul.f32 %v3094_v53, %v7578_v59 }
 0x301   :  { %v5497_v45 = vpack.i.bf16 %v3109_v55, %v3108_v50  ;;  %v3434_v50 = vsel %vm352_vm8, %v7372_v29, %v7700_v56 }
 0x303   :  { %5493 = vrot.lane.b32.xlu0 %v5492_v20, %s5657_s21  ;;  %5508 = vrot.lane.b32.xlu2 %v5507_v38, %s5657_s21  ;;  %v2243_v20 = vmul.f32 %v2229_v47, %v7578_v59 }
 0x305   :  { %v7744_v42 = vpop.permute.xlu0 %5283  ;;  %v7746_v35 = vpop.permute.xlu2 %5348  ;;  %v5542_v53 = vpack.i.bf16 %v2238_v19, %v2243_v20  ;;  %v3443_v20 = vmul.f32 %v3434_v50, %v7583_v52 }
 0x306   :  { %v7750_v48 = vpop.permute.xlu1 %5318 }
 0x307   :  { %5528 = vrot.lane.b32.xlu1 %v5527_v9, %s5658_s23  ;;  %v5652_v9 = vld [vmem:[%s8895_s1 + $0x20] ss:$8 sm:$0xf] }
 0x308   :  { %v3424_v55 = vperm.slane %v5652_v9, 3 }
 0x30b   :  { %5498 = vrot.lane.b32.xlu0 %v5497_v45, %s5657_s21  ;;  %5518 = vrot.lane.b32.xlu2 %v5517_v21, %s5659_s26  ;;  %v5532_v45 = vpack.i.bf16 %v2248_v60, %v2253_v31  ;;  %v3448_v21 = vmul.f32 %v3434_v50, %v7578_v59  ;;  %v5265_v31 = vunpack.i.l.bf16 %v7645_v44 }
 0x30d   :  { %v7762_v38 = vpop.permute.xlu0 %5298  ;;  %v7764_v5 = vpop.permute.xlu2 %5368  ;;  %v5557_v29 = vpack.i.bf16 %v3443_v20, %v3448_v21 }
 0x30e   :  { %v8975_v37 = vunpack.i.l.bf16 %v7762_v38  ;;  %v7768_v18 = vpop.permute.xlu1 %5333 }
 0x30f   :  { %5543 = vrot.lane.b32.xlu1 %v5542_v53, %s5662_s18  ;;  %v2944_v53 = vmul.f32 %v7714_v57, %v7665_v27 }
 0x310   :  { %v7783_v1 = vsel %vm525_vm5, %v5276_v28, %v8975_v37  ;;  %v3458_v28 = vmul.f32 %v3434_v50, %v7615_v61 }
 0x313   :  { %3431 = vrot.lane.b32.xlu0 %v3424_v55, %s5662_s18  ;;  %5533 = vrot.lane.b32.xlu2 %v5532_v45, %s5662_s18  ;;  %v2943_v55 = vmul.f32 %v7721_v11, %v7613_v51  ;;  %v3453_v45 = vmul.f32 %v3434_v50, %v7613_v51  ;;  %v2749_v50 = vmul.f32 %v7383_v13, %v7635_v40 }
 0x315   :  { %v7789_v47 = vpop.permute.xlu0 %5308  ;;  %v7791_v19 = vpop.permute.xlu2 %5383  ;;  %v5522_v26 = vpack.i.bf16 %v2944_v53, %v2943_v55  ;;  %v5547_v43 = vpack.i.bf16 %v3453_v45, %v3458_v28  ;;  %v5572_v59 = vpack.i.bf16 %v2749_v50, %v2754_v25  ;;  %v2764_v53 = vmul.f32 %v7383_v13, %v7692_v7 }
 0x316   :  { %v8980_v9 = vunpack.i.h.bf16 %v7791_v19  ;;  %v5385_v60 = vunpack.i.l.bf16 %v7791_v19  ;;  %v7799_v37 = vpop.permute.xlu1 %5353  ;;  %v3105_v55 = vmul.f32 0.0, %v7489_v15  ;;  %v2424_v15 = vmul.f32 %v7464_v10, %v7692_v7 }
 0x317   :  { %5558 = vrot.lane.b32.xlu1 %v5557_v29, %s5655_s0 }
 0x318   :  { %v2837_v21 = vsel %vm871_vm7, %v5265_v31, %v5385_v60  ;;  %v2838_v20 = vsel %vm871_vm7, %v5385_v60, %v8980_v9  ;;  %v2934_v60 = vmul.f32 %v7714_v57, %v7635_v40  ;;  %v3275_v57 = vmul.f32 0.0, %v7454_v41 }
 0x319   :  { %3761 = vmatpush.msra.mxu0 %v2837_v21  ;;  %3848 = vmatpush.msra.mxu3 %v2838_v20  ;;  %v5587_v21 = vpack.i.bf16 %v3105_v55, %v3105_v55  ;;  %v2419_v41 = vmul.f32 %v7464_v10, %v7665_v27 }
 0x31b   :  { %5523 = vrot.lane.b32.xlu0 %v5522_v26, %s5658_s23  ;;  %5548 = vrot.lane.b32.xlu2 %v5547_v43, %s5655_s0  ;;  %v2933_v26 = vmul.f32 %v7721_v11, %v7583_v52  ;;  %v2759_v43 = vmul.f32 %v7383_v13, %v7665_v27  ;;  %v5552_v13 = vpack.i.bf16 %v3275_v57, %v3275_v57 }
 0x31c   :  { %v2584_v11 = vmul.f32 %v7415_v49, %v7663_v12 }
 0x31d   :  { %v7815_v29 = vpop.permute.xlu0 %5313  ;;  %v7817_v31 = vpop.permute.xlu2 %5398  ;;  %v5537_v45 = vpack.i.bf16 %v2934_v60, %v2933_v26  ;;  %v5562_v25 = vpack.i.bf16 %v2759_v43, %v2764_v53  ;;  %v2579_v60 = vmul.f32 %v7415_v49, %v7635_v40  ;;  %v5250_v53 = vunpack.i.l.bf16 %v7524_v30 }
 0x31e   :  { %v7823_v28 = vpop.permute.xlu1 %5363  ;;  %v5281_v26 = vunpack.i.h.bf16 %v7727_v8  ;;  %v5350_v30 = vunpack.i.l.bf16 %v7746_v35  ;;  %v5310_v43 = vunpack.i.l.bf16 %v7789_v47  ;;  %v8990_v0 = vunpack.i.h.bf16 %v7815_v29 }
 0x31f   :  { %5573 = vrot.lane.b32.xlu1 %v5572_v59, %s5661_s17  ;;  %v5592_v57 = vpack.i.bf16 %v2579_v60, %v2584_v11  ;;  %v5315_v17 = vunpack.i.l.bf16 %v7815_v29 }
 0x323   :  { %5538 = vrot.lane.b32.xlu0 %v5537_v45, %s5658_s23  ;;  %5563 = vrot.lane.b32.xlu2 %v5562_v25, %s5661_s17  ;;  %v5602_v25 = vpack.i.bf16 %v2419_v41, %v2424_v15  ;;  %v8991_v15 = vunpack.i.l.bf16 %v7727_v8 }
 0x325   :  { %v7834_v20 = vpop.permute.xlu0 %5328  ;;  %v7836_v59 = vpop.permute.xlu2 %5408 }
 0x326   :  { %v7838_v50 = vpop.permute.xlu1 %5378 }
 0x327   :  { %5588 = vrot.lane.b32.xlu1 %v5587_v21, %s5657_s21 }
 0x32b   :  { %5553 = vrot.lane.b32.xlu0 %v5552_v13, %s5656_s16  ;;  %5578 = vrot.lane.b32.xlu2 %v5587_v21, %s5657_s21 }
 0x32d   :  { %v7854_v55 = vpop.permute.xlu0 %5343  ;;  %v7856_v45 = vpop.permute.xlu2 %5413 }
 0x32e   :  { %v8989_v21 = vunpack.i.h.bf16 %v7854_v55  ;;  %v5345_v9 = vunpack.i.l.bf16 %v7854_v55  ;;  %v8988_v52 = vunpack.i.h.bf16 %v7856_v45  ;;  %v5415_v14 = vunpack.i.l.bf16 %v7856_v45  ;;  %v7862_v51 = vpop.permute.xlu1 %5388 }
 0x32f   :  { %v5390_v61 = vunpack.i.l.bf16 %v7862_v51  ;;  %5603 = vrot.lane.b32.xlu1 %v5602_v25, %s5659_s26  ;;  %v9166_v56 = vunpack.i.h.bf16 %v7862_v51 }
 0x330   :  { %v2833_v11 = vsel %vm871_vm7, %v5281_v26, %v5345_v9  ;;  %v3533_v41 = vsel %vm263_vm1, %v5415_v14, %v8988_v52  ;;  %v2834_v60 = vsel %vm871_vm7, %v5345_v9, %v8989_v21  ;;  %v2594_v26 = vmul.f32 %v7415_v49, %v7692_v7 }
 0x331   :  { %3762 = vmatpush.msra.mxu0 %v2833_v11  ;;  %v3363_v25 = vsel %vm436_vm2, %v5390_v61, %v9166_v56  ;;  %3831 = vmatpush.msra.mxu2 %v3533_v41  ;;  %v2589_v14 = vmul.f32 %v7415_v49, %v7665_v27  ;;  %v8992_v9 = vunpack.i.h.bf16 %v7744_v42  ;;  %v5285_v52 = vunpack.i.l.bf16 %v7744_v42 }
 0x332   :  { %3790 = vmatpush.msra.mxu1 %v3363_v25  ;;  %3849 = vmatpush.msra.mxu3 %v2834_v60  ;;  %v2829_v61 = vsel %vm871_vm7, %v5250_v53, %v5310_v43  ;;  %v9167_v56 = vunpack.i.h.bf16 %v7746_v35  ;;  %v2935_v41 = vmul.f32 0.0, %v7491_v62  ;;  %v5270_v60 = vunpack.i.l.bf16 %v7535_v34 }
 0x333   :  { %5568 = vrot.lane.b32.xlu0 %v5552_v13, %s5656_s16  ;;  %5593 = vrot.lane.b32.xlu2 %v5592_v57, %s5660_s30  ;;  %v9168_v49 = vunpack.i.h.bf16 %v7789_v47  ;;  %v8994_v13 = vunpack.i.h.bf16 %v7817_v31  ;;  %v5400_v57 = vunpack.i.l.bf16 %v7817_v31  ;;  %v3355_v62 = vsel %vm436_vm2, %v5315_v17, %v8990_v0 }
 0x334   :  { %v3359_v11 = vsel %vm436_vm2, %v5350_v30, %v9167_v56  ;;  %3763 = vmatpush.msra.mxu0 %v2829_v61  ;;  %v5582_v30 = vpack.i.bf16 %v2589_v14, %v2594_v26  ;;  %v5325_v56 = vunpack.i.l.bf16 %v7702_v22  ;;  %v5355_v17 = vunpack.i.l.bf16 %v7799_v37 }
 0x335   :  { %3791 = vmatpush.msra.mxu1 %v3359_v11  ;;  %v2830_v25 = vsel %vm871_vm7, %v5310_v43, %v9168_v49  ;;  %v7902_v53 = vpop.permute.xlu0 %5358  ;;  %v7904_v21 = vpop.permute.xlu2 %5433  ;;  %v5291_v43 = vunpack.i.h.bf16 %v7733_v36  ;;  %v9169_v11 = vunpack.i.h.bf16 %v7645_v44  ;;  %v3193_v61 = vsel %vm609_vm3, %v5400_v57, %v8994_v13 }
 0x336   :  { %3850 = vmatpush.msra.mxu3 %v2830_v25  ;;  %3764 = vmatpush.msra.mxu0 %v7661_v54  ;;  %v7918_v25 = vpop.permute.xlu1 %5393  ;;  %v3351_v54 = vsel %vm436_vm2, %v5285_v52, %v8992_v9  ;;  %v5607_v9 = vpack.i.bf16 %v2935_v41, %v2935_v41  ;;  %v5255_v0 = vunpack.i.l.bf16 %v7533_v6  ;;  %v8996_v44 = vunpack.i.h.bf16 %v7647_v24 }
 0x337   :  { %v2826_v49 = vsel %vm871_vm7, %v9169_v11, %v8991_v15  ;;  %3792 = vmatpush.msra.mxu1 %v3355_v62  ;;  %v8995_v26 = vunpack.i.h.bf16 %v7918_v25  ;;  %v5395_v14 = vunpack.i.l.bf16 %v7918_v25  ;;  %v8993_v11 = vunpack.i.h.bf16 %v7902_v53 }
 0x338   :  { %3851 = vmatpush.msra.mxu3 %v2826_v49  ;;  %v5360_v15 = vunpack.i.l.bf16 %v7902_v53  ;;  %v5320_v62 = vunpack.i.l.bf16 %v7750_v48  ;;  %v8998_v57 = vunpack.i.l.bf16 %v7733_v36  ;;  %v9170_v6 = vunpack.i.h.bf16 %v7799_v37 }
 0x339   :  { %3793 = vmatpush.msra.mxu1 %v3351_v54  ;;  %v2667_v49 = vsel %vm698_vm6, %v5270_v60, %v5395_v14  ;;  %v2668_v52 = vsel %vm698_vm6, %v5395_v14, %v8995_v26  ;;  %v5295_v54 = vunpack.i.l.bf16 %v7647_v24  ;;  %v2663_v60 = vsel %vm698_vm6, %v5291_v43, %v5355_v17 }
 0x33a   :  { %3765 = vmatpush.msra.mxu0 %v2667_v49  ;;  %3852 = vmatpush.msra.mxu3 %v2668_v52  ;;  %v3189_v41 = vsel %vm609_vm3, %v5360_v15, %v8993_v11  ;;  %v2254_v14 = vmul.f32 %v7668_v63, %v7692_v7  ;;  %v2659_v49 = vsel %vm698_vm6, %v5255_v0, %v5320_v62  ;;  %v9171_v52 = vunpack.i.h.bf16 %v7702_v22 }
 0x33b   :  { %3794 = vmatpush.msra.mxu1 %v3193_v61  ;;  %5583 = vrot.lane.b32.xlu0 %v5582_v30, %s5660_s30  ;;  %v2664_v61 = vsel %vm698_vm6, %v5355_v17, %v9170_v6  ;;  %v9172_v15 = vunpack.i.h.bf16 %v7750_v48  ;;  %v9002_v17 = vunpack.i.h.bf16 %v7836_v59  ;;  %v5410_v6 = vunpack.i.l.bf16 %v7836_v59 }
 0x33c   :  { %5608 = vrot.lane.b32.xlu2 %v5607_v9, %s5658_s23  ;;  %3766 = vmatpush.msra.mxu0 %v2663_v60  ;;  %v3185_v60 = vsel %vm609_vm3, %v5325_v56, %v9171_v52  ;;  %v9001_v13 = vunpack.i.h.bf16 %v7729_v46  ;;  %v5340_v0 = vunpack.i.l.bf16 %v7729_v46  ;;  %v2249_v52 = vmul.f32 %v7668_v63, %v7665_v27 }
 0x33d   :  { %3795 = vmatpush.msra.mxu1 %v3189_v41  ;;  %3853 = vmatpush.msra.mxu3 %v2664_v61  ;;  %v7953_v30 = vpop.permute.xlu0 %5373  ;;  %v7955_v43 = vpop.permute.xlu2 %5443  ;;  %v2660_v11 = vsel %vm698_vm6, %v5320_v62, %v9172_v15  ;;  %v3181_v62 = vsel %vm609_vm3, %v5295_v54, %v8996_v44  ;;  %v5370_v26 = vunpack.i.l.bf16 %v7764_v5  ;;  %v8999_v54 = vunpack.i.h.bf16 %v7904_v21 }
 0x33e   :  { %v8997_v41 = vunpack.i.h.bf16 %v7953_v30  ;;  %v5375_v61 = vunpack.i.l.bf16 %v7953_v30  ;;  %3767 = vmatpush.msra.mxu0 %v2659_v49  ;;  %v7970_v56 = vpop.permute.xlu1 %5428  ;;  %v9173_v49 = vunpack.i.h.bf16 %v7535_v34  ;;  %v5435_v44 = vunpack.i.l.bf16 %v7904_v21 }
 0x33f   :  { %3796 = vmatpush.msra.mxu1 %v3185_v60  ;;  %3854 = vmatpush.msra.mxu3 %v2660_v11  ;;  %v9000_v15 = vunpack.i.h.bf16 %v7768_v18  ;;  %v3023_v34 = vsel %vm782_vm4, %v5410_v6, %v9002_v17 }
 0x340   :  { %3768 = vmatpush.msra.mxu0 %v7557_v4  ;;  %v2656_v11 = vsel %vm698_vm6, %v9173_v49, %v8998_v57  ;;  %v3529_v60 = vsel %vm263_vm1, %v5375_v61, %v8997_v41  ;;  %v5335_v4 = vunpack.i.l.bf16 %v7768_v18  ;;  %v5622_v49 = vpack.i.bf16 %v2249_v52, %v2254_v14  ;;  %v8008_v14 = vld [vmem:[%s8898_s7 + $0x10] sm:$0xff] }
 0x341   :  { %3797 = vmatpush.msra.mxu1 %v3181_v62  ;;  %3855 = vmatpush.msra.mxu3 %v2656_v11  ;;  %v3525_v61 = vsel %vm263_vm1, %v5340_v0, %v9001_v13  ;;  %v9003_v62 = vunpack.i.h.bf16 %v7674_v39  ;;  %v5305_v11 = vunpack.i.l.bf16 %v7674_v39  ;;  %v9174_v41 = vunpack.i.h.bf16 %v7764_v5 }
 0x342   :  { %3832 = vmatpush.msra.mxu2 %v3529_v60  ;;  %v3521_v0 = vsel %vm263_vm1, %v5435_v44, %v8999_v54  ;;  %v2414_v52 = vmul.f32 %v7464_v10, %v7663_v12  ;;  %v2409_v44 = vmul.f32 %v7464_v10, %v7635_v40  ;;  %v5301_v10 = vunpack.i.h.bf16 %v7762_v38 }
 0x343   :  { %3798 = vmatpush.msra.mxu1 %v3023_v34  ;;  %5598 = vrot.lane.b32.xlu0 %v5607_v9, %s5658_s23  ;;  %v3019_v57 = vsel %vm782_vm4, %v5370_v26, %v9174_v41  ;;  %v2244_v26 = vmul.f32 %v7668_v63, %v7663_v12  ;;  %v5275_v41 = vunpack.i.l.bf16 %v7676_v33  ;;  %v3015_v34 = vsel %vm782_vm4, %v5335_v4, %v9000_v15 }
 0x344   :  { %5623 = vrot.lane.b32.xlu2 %v5622_v49, %s5662_s18  ;;  %3833 = vmatpush.msra.mxu2 %v3525_v61  ;;  %v5365_v49 = vunpack.i.l.bf16 %v7823_v28  ;;  %v2239_v61 = vmul.f32 %v7668_v63, %v7635_v40  ;;  %v5366_v33 = vunpack.i.h.bf16 %v7823_v28  ;;  %v3011_v54 = vsel %vm782_vm4, %v5305_v11, %v9003_v62 }
 0x345   :  { %3799 = vmatpush.msra.mxu1 %v3019_v57  ;;  %v8010_v9 = vpop.permute.xlu0 %5403  ;;  %v8012_v6 = vpop.permute.xlu2 %5448  ;;  %v5612_v15 = vpack.i.bf16 %v2409_v44, %v2414_v52  ;;  %v5331_v13 = vunpack.i.h.bf16 %v7834_v20  ;;  %v5260_v11 = vunpack.i.l.bf16 %v7621_v23  ;;  %v8064_v23 = vld [vmem:[%s8898_s7 + $0x28] sm:$0xff]  ;;  %v9015_v44 = vunpack.i.h.bf16 %v7838_v50 }
 0x346   :  { %v5406_v60 = vunpack.i.h.bf16 %v8010_v9  ;;  %v5405_v57 = vunpack.i.l.bf16 %v8010_v9  ;;  %3834 = vmatpush.msra.mxu2 %v3521_v0  ;;  %v8044_v63 = vpop.permute.xlu1 %5453  ;;  %v5637_v17 = vpack.i.bf16 %v2239_v61, %v2244_v26  ;;  %v5380_v61 = vunpack.i.l.bf16 %v7838_v50 }
 0x347   :  { %3800 = vmatpush.msra.mxu1 %v3015_v34  ;;  %4677 = vmatmul.msk.f32.vlgmr.msra.gmra.mxu2 %vm1800_vm9, %v8008_v14  ;;  %v5330_v34 = vunpack.i.l.bf16 %v7834_v20  ;;  %v9178_v62 = vunpack.i.l.bf16 %v7727_v8 }
 0x348   :  { %v2497_v4 = vsel %vm525_vm5, %v5275_v41, %v5405_v57  ;;  %v2498_v0 = vsel %vm525_vm5, %v5405_v57, %v5406_v60  ;;  %v2493_v41 = vsel %vm525_vm5, %v5301_v10, %v5365_v49 }
 0x349   :  { %3801 = vmatpush.msra.mxu1 %v3011_v54  ;;  %3769 = vmatpush.msra.mxu0 %v2497_v4  ;;  %v2494_v54 = vsel %vm525_vm5, %v5365_v49, %v5366_v33  ;;  %v8076_v49 = vld [vmem:[%s8898_s7 + $0x8] sm:$0xff] }
 0x34a   :  { %3856 = vmatpush.msra.mxu3 %v2498_v0 }
 0x34b   :  { %3802 = vmatpush.msra.mxu1 %v7440_v3  ;;  %5613 = vrot.lane.b32.xlu0 %v5612_v15, %s5659_s26  ;;  %v2489_v3 = vsel %vm525_vm5, %v5260_v11, %v5330_v34  ;;  %v9005_v11 = vunpack.i.l.bf16 %v8044_v63 }
 0x34c   :  { %5638 = vrot.lane.b32.xlu2 %v5637_v17, %s5662_s18  ;;  %3770 = vmatpush.msra.mxu0 %v2493_v41  ;;  %v5430_v17 = vunpack.i.l.bf16 %v7970_v56 }
 0x34d   :  { %3803 = vmatpush.msra.mxu1 %v7431_v32  ;;  %3857 = vmatpush.msra.mxu3 %v2494_v54  ;;  %v8056_v52 = vpop.permute.xlu0 %5418  ;;  %v8058_v26 = vpop.permute.xlu2 %5463  ;;  %v2490_v32 = vsel %vm525_vm5, %v5330_v34, %v5331_v13 }
 0x34e   :  { %v9017_v15 = vunpack.i.h.bf16 %v8056_v52  ;;  %v5420_v57 = vunpack.i.l.bf16 %v8056_v52  ;;  %3771 = vmatpush.msra.mxu0 %v2489_v3 }
 0x34f   :  { %3804 = vmatpush.msra.mxu1 %v7386_v16  ;;  %3858 = vmatpush.msra.mxu3 %v2490_v32  ;;  %v3726_v16 = vld [vmem:[%s8899_s8 + $0x8] sm:$0xff] }
 0x350   :  { %3772 = vmatpush.msra.mxu0 %v7690_v58  ;;  %v2327_v4 = vsel %vm352_vm8, %v5430_v17, %v5420_v57  ;;  %v2328_v0 = vsel %vm352_vm8, %v5420_v57, %v9017_v15  ;;  %4678 = vmatmul.msk.f32.gmra.mxu2 %vm1800_vm9, %v8064_v23  ;;  %v9004_v17 = vunpack.i.h.bf16 %v8044_v63 }
 0x351   :  { %3805 = vmatpush.msra.mxu1 %v7291_v2  ;;  %3859 = vmatpush.msra.mxu3 %v7783_v1  ;;  %v8092_v10 = vpop.permute.xlu1 %5468  ;;  %v2324_v2 = vsel %vm352_vm8, %v5380_v61, %v9015_v44  ;;  %v9175_v1 = vunpack.i.h.bf16 %v7791_v19 }
 0x352   :  { %3773 = vmatpush.msra.mxu0 %v2327_v4  ;;  %v9007_v58 = vunpack.i.h.bf16 %v8092_v10  ;;  %v9009_v34 = vunpack.i.l.bf16 %v8092_v10  ;;  %3806 = vmatmul.f32.vlgmr.msra.gmra.mxu1 %v8076_v49  ;;  %v9176_v4 = vunpack.i.h.bf16 %v7854_v55  ;;  %v4507_v55 = vld [vmem:[%s8900_s10 + $0x18] sm:$0xff] }
 0x353   :  { %3860 = vmatpush.msra.mxu3 %v2328_v0  ;;  %v8121_v0 = vld [vmem:[%s8898_s7 + $0x20] sm:$0xff] }
 0x354   :  { %3736 = vperm.xlu2 %5246, %v3726_v16   ;;  %v2839_v41 = vsel %vm871_vm7, %v9175_v1, %v9009_v34  ;;  %v2835_v19 = vsel %vm871_vm7, %v9176_v4, %v9007_v58 }
 0x355   :  { %3861 = vmatpush.msra.mxu3 %v2324_v2  ;;  %v8106_v54 = vpop.permute.xlu0 %5423  ;;  %v8108_v3 = vpop.permute.xlu2 %5483  ;;  %3935 = vmatpush.msrb.mxu2 %v2839_v41  ;;  %v9177_v2 = vunpack.i.h.bf16 %v7789_v47  ;;  %v2827_v47 = vsel %vm871_vm7, %v9178_v62, %v9004_v17  ;;  %v5431_v17 = vunpack.i.h.bf16 %v7970_v56  ;;  %v5445_v56 = vunpack.i.l.bf16 %v7955_v43 }
 0x356   :  { %v9014_v57 = vunpack.i.h.bf16 %v8106_v54  ;;  %v5425_v32 = vunpack.i.l.bf16 %v8106_v54 }
 0x357   :  { %3936 = vmatpush.msrb.mxu2 %v2835_v19  ;;  %v2831_v1 = vsel %vm871_vm7, %v9177_v2, %v9005_v11  ;;  %v9179_v2 = vunpack.i.h.bf16 %v7918_v25  ;;  %v9180_v25 = vunpack.i.h.bf16 %v7799_v37  ;;  %v4504_v37 = vld [vmem:[%s8900_s10] sm:$0xff] }
 0x358   :  { %v2320_v16 = vsel %vm352_vm8, %v5425_v32, %v9014_v57  ;;  %v9183_v57 = vunpack.i.h.bf16 %v7862_v51 }
 0x359   :  { %3862 = vmatpush.msra.mxu3 %v2320_v16  ;;  %v8134_v41 = vpop.permute.xlu1 %5473  ;;  %3937 = vmatpush.msrb.mxu2 %v2831_v1  ;;  %v8147_v16 = vld [vmem:[%s8898_s7 + $0x40] sm:$0xff] }
 0x35a   :  { %v9008_v4 = vunpack.i.h.bf16 %v8134_v41  ;;  %v9006_v19 = vunpack.i.l.bf16 %v8134_v41  ;;  %3809 = vmatmul.f32.gmra.mxu1 %v8121_v0  ;;  %4679 = vmatmul.msk.f32.gmra.mxu2 %vm1800_vm9, %v8147_v16 }
 0x35b   :  { %3938 = vmatpush.msrb.mxu2 %v2827_v47 }
 0x35c   :  { %4525 = vperm.xlu2 %5246, %v4507_v55   ;;  %v2669_v1 = vsel %vm698_vm6, %v9179_v2, %v9006_v19  ;;  %v2665_v47 = vsel %vm698_vm6, %v9180_v25, %v9008_v4  ;;  %v8171_v2 = vld [vmem:[%s8898_s7] sm:$0xff] }
 0x35d   :  { %v8156_v8 = vpop.permute.xlu0 %5438  ;;  %v8158_v62 = vpop.permute.xlu2 %5508  ;;  %3939 = vmatpush.msrb.mxu2 %v2669_v1  ;;  %v5446_v1 = vunpack.i.h.bf16 %v7955_v43 }
 0x35e   :  { %v5441_v11 = vunpack.i.h.bf16 %v8156_v8  ;;  %v9010_v55 = vunpack.i.l.bf16 %v8156_v8 }
 0x35f   :  { %3940 = vmatpush.msrb.mxu2 %v2665_v47  ;;  %v8187_v47 = vld [vmem:[%s8898_s7 + $0x58] sm:$0xff] }
 0x360   :  { %v2323_v19 = vsel %vm352_vm8, %v5441_v11, %v5380_v61  ;;  %v2316_v58 = vsel %vm352_vm8, %v5431_v17, %v9010_v55  ;;  %v2319_v11 = vsel %vm352_vm8, %v5445_v56, %v5425_v32 }
 0x361   :  { %3774 = vmatpush.msra.mxu0 %v2323_v19  ;;  %3863 = vmatpush.msra.mxu3 %v2316_v58  ;;  %v8182_v25 = vpop.permute.xlu1 %5478  ;;  %v2315_v58 = vsel %vm352_vm8, %v5446_v1, %v5431_v17  ;;  %v9181_v19 = vunpack.i.h.bf16 %v7750_v48  ;;  %v9182_v17 = vunpack.i.l.bf16 %v7733_v36  ;;  %v8214_v48 = vld [vmem:[%s8898_s7 + $0x18] sm:$0xff] }
 0x362   :  { %3864 = vmatmul.f32.vlgmr.msra.gmra.mxu3 %v8171_v2  ;;  %v9011_v43 = vunpack.i.h.bf16 %v8182_v25  ;;  %v9013_v61 = vunpack.i.l.bf16 %v8182_v25  ;;  %4680 = vmatmul.msk.f32.gmra.mxu2 %vm1800_vm9, %v8187_v47 }
 0x363   :  { %3775 = vmatpush.msra.mxu0 %v2319_v11 }
 0x364   :  { %4510 = vperm.xlu2 %5246, %v4504_v37   ;;  %v2661_v4 = vsel %vm698_vm6, %v9181_v19, %v9013_v61  ;;  %v2657_v32 = vsel %vm698_vm6, %v9182_v17, %v9011_v43  ;;  %v5466_v37 = vunpack.i.h.bf16 %v8058_v26  ;;  %v5465_v17 = vunpack.i.l.bf16 %v8058_v26  ;;  %v4574_v26 = vld [vmem:[%s8902_s12] sm:$0xf] }
 0x365   :  { %v8201_v34 = vpop.permute.xlu0 %5458  ;;  %v8203_v55 = vpop.permute.xlu2 %5518  ;;  %3776 = vmatpush.msra.mxu0 %v2315_v58  ;;  %3941 = vmatpush.msrb.mxu2 %v2661_v4 }
 0x366   :  { %3777 = vmatmul.f32.vlgmr.msra.gmra.mxu0 %v8171_v2  ;;  %v9024_v11 = vunpack.i.l.bf16 %v8203_v55  ;;  %v5460_v61 = vunpack.i.l.bf16 %v8201_v34 }
 0x367   :  { %3942 = vmatpush.msrb.mxu2 %v2657_v32 }
 0x368   :  { %v2491_v51 = vsel %vm525_vm5, %v5331_v13, %v9024_v11  ;;  %v9185_v13 = vunpack.i.l.bf16 %v7762_v38  ;;  %v9187_v38 = vunpack.i.h.bf16 %v7744_v42 }
 0x369   :  { %v8216_v1 = vpop.permute.xlu1 %5503 }
 0x36a   :  { %3867 = vmatmul.f32.gmra.mxu3 %v8214_v48  ;;  %v9016_v4 = vunpack.i.h.bf16 %v8216_v1  ;;  %v9012_v56 = vunpack.i.l.bf16 %v8216_v1 }
 0x36c   :  { %v2499_v36 = vsel %vm525_vm5, %v5406_v60, %v9012_v56  ;;  %v2495_v9 = vsel %vm525_vm5, %v5366_v33, %v9016_v4  ;;  %v9019_v60 = vunpack.i.h.bf16 %v8203_v55  ;;  %v5461_v56 = vunpack.i.h.bf16 %v8201_v34 }
 0x36d   :  { %v8228_v58 = vpop.permute.xlu0 %5488  ;;  %v8230_v19 = vpop.permute.xlu2 %5533  ;;  %3943 = vmatpush.msrb.mxu2 %v2499_v36  ;;  %v8245_v36 = vld [vmem:[%s8898_s7 + $0x30] sm:$0xff]  ;;  %v5451_v33 = vunpack.i.h.bf16 %v8012_v6 }
 0x36e   :  { %v9018_v32 = vunpack.i.h.bf16 %v8228_v58  ;;  %v5490_v43 = vunpack.i.l.bf16 %v8228_v58  ;;  %3780 = vmatmul.f32.gmra.mxu0 %v8214_v48  ;;  %v9020_v4 = vunpack.i.l.bf16 %v8230_v19  ;;  %v9023_v20 = vunpack.i.h.bf16 %v8230_v19 }
 0x36f   :  { %3944 = vmatpush.msrb.mxu2 %v2495_v9  ;;  %v5450_v9 = vunpack.i.l.bf16 %v8012_v6 }
 0x370   :  { %v3364_v44 = vsel %vm436_vm2, %v9183_v57, %v5490_v43  ;;  %v3365_v28 = vsel %vm436_vm2, %v5490_v43, %v9018_v32  ;;  %v8268_v57 = vld [vmem:[%s8898_s7 + $0x38] sm:$0xff]  ;;  %v9184_v43 = vunpack.i.h.bf16 %v7746_v35  ;;  %v9186_v35 = vunpack.i.h.bf16 %v7815_v29 }
 0x371   :  { %3877 = vmatpush.msrb.mxu0 %v3364_v44  ;;  %3964 = vmatpush.msrb.mxu3 %v3365_v28  ;;  %v8258_v15 = vpop.permute.xlu1 %5513  ;;  %v3361_v44 = vsel %vm436_vm2, %v5465_v17, %v5466_v37  ;;  %v2487_v28 = vsel %vm525_vm5, %v9185_v13, %v9019_v60  ;;  %v3352_v29 = vsel %vm436_vm2, %v9187_v38, %v5450_v9  ;;  %v9188_v13 = vunpack.i.h.bf16 %v8056_v52 }
 0x372   :  { %v3360_v32 = vsel %vm436_vm2, %v9184_v43, %v5465_v17  ;;  %3945 = vmatpush.msrb.mxu2 %v2491_v51  ;;  %3870 = vmatmul.f32.gmra.mxu3 %v8245_v36  ;;  %v3356_v51 = vsel %vm436_vm2, %v9186_v35, %v5460_v61  ;;  %v3357_v17 = vsel %vm436_vm2, %v5460_v61, %v5461_v56  ;;  %v9189_v52 = vunpack.i.h.bf16 %v7838_v50 }
 0x373   :  { %3878 = vmatpush.msrb.mxu0 %v3360_v32  ;;  %3965 = vmatpush.msrb.mxu3 %v3361_v44  ;;  %v5485_v32 = vunpack.i.l.bf16 %v8108_v3  ;;  %v2329_v61 = vsel %vm352_vm8, %v9188_v13, %v9020_v4  ;;  %v9190_v38 = vunpack.i.h.bf16 %v7817_v31  ;;  %v8333_v31 = vld [vmem:[%s8898_s7 + $0x50] sm:$0xff] }
 0x374   :  { %3946 = vmatpush.msrb.mxu2 %v2487_v28  ;;  %3812 = vmatmul.f32.gmra.mxu1 %v8268_v57  ;;  %v3353_v28 = vsel %vm436_vm2, %v5450_v9, %v5451_v33  ;;  %v2325_v9 = vsel %vm352_vm8, %v9189_v52, %v9023_v20  ;;  %v9193_v52 = vunpack.i.h.bf16 %v7902_v53  ;;  %v9029_v53 = vunpack.i.h.bf16 %v8158_v62 }
 0x375   :  { %v8291_v43 = vpop.permute.xlu0 %5493  ;;  %v8293_v44 = vpop.permute.xlu2 %5548  ;;  %3879 = vmatpush.msrb.mxu0 %v3356_v51  ;;  %3966 = vmatpush.msrb.mxu3 %v3357_v17  ;;  %v5486_v17 = vunpack.i.h.bf16 %v8108_v3 }
 0x376   :  { %v5496_v35 = vunpack.i.h.bf16 %v8291_v43  ;;  %v5495_v60 = vunpack.i.l.bf16 %v8291_v43  ;;  %v9021_v51 = vunpack.i.h.bf16 %v8293_v44  ;;  %v9022_v42 = vunpack.i.l.bf16 %v8293_v44  ;;  %3947 = vmatpush.msrb.mxu2 %v2329_v61  ;;  %3783 = vmatmul.f32.gmra.mxu0 %v8245_v36 }
 0x377   :  { %3880 = vmatpush.msrb.mxu0 %v3352_v29  ;;  %3967 = vmatpush.msrb.mxu3 %v3353_v28  ;;  %v9191_v61 = vunpack.i.h.bf16 %v7856_v45  ;;  %v9192_v45 = vunpack.i.h.bf16 %v7953_v30  ;;  %v9218_v43 = vunpack.i.l.bf16 %v8134_v41 }
 0x378   :  { %v3194_v13 = vsel %vm609_vm3, %v9190_v38, %v5495_v60  ;;  %3948 = vmatpush.msrb.mxu2 %v2325_v9  ;;  %v3195_v29 = vsel %vm609_vm3, %v5495_v60, %v5496_v35  ;;  %v3190_v60 = vsel %vm609_vm3, %v9193_v52, %v5485_v32  ;;  %v3191_v9 = vsel %vm609_vm3, %v5485_v32, %v5486_v17 }
 0x379   :  { %v3534_v4 = vsel %vm263_vm1, %v9191_v61, %v9022_v42  ;;  %3881 = vmatpush.msrb.mxu0 %v3194_v13  ;;  %v8328_v50 = vpop.permute.xlu1 %5528  ;;  %3968 = vmatpush.msrb.mxu3 %v3195_v29  ;;  %v3530_v28 = vsel %vm263_vm1, %v9192_v45, %v9021_v51  ;;  %v5510_v38 = vunpack.i.l.bf16 %v8158_v62  ;;  %v9028_v29 = vunpack.i.h.bf16 %v8258_v15 }
 0x37a   :  { %3918 = vmatpush.msrb.mxu1 %v3534_v4  ;;  %v8346_v4 = vld [vmem:[%s8898_s7 + $0x48] sm:$0xff]  ;;  %v5515_v32 = vunpack.i.l.bf16 %v8258_v15  ;;  %v9194_v45 = vunpack.i.h.bf16 %v7702_v22  ;;  %v9195_v51 = vunpack.i.h.bf16 %v7647_v24  ;;  %v9197_v24 = vunpack.i.h.bf16 %v8106_v54 }
 0x37b   :  { %3882 = vmatpush.msrb.mxu0 %v3190_v60  ;;  %3969 = vmatpush.msrb.mxu3 %v3191_v9  ;;  %v3183_v22 = vsel %vm609_vm3, %v5510_v38, %v9029_v53 }
 0x37c   :  { %3919 = vmatpush.msrb.mxu1 %v3530_v28  ;;  %3873 = vmatmul.f32.gmra.mxu3 %v8346_v4  ;;  %v3182_v42 = vsel %vm609_vm3, %v9195_v51, %v5510_v38  ;;  %v9198_v38 = vld [vmem:[#allocation9_spill] sm:$0xff] }
 0x37d   :  { %3815 = vmatmul.f32.gmra.mxu1 %v8333_v31  ;;  %v8352_v30 = vpop.permute.xlu0 %5498  ;;  %v5564_v11 = vpop.permute.xlu2 %5563 }
 0x37e   :  { %v9031_v13 = vunpack.i.h.bf16 %v8352_v30  ;;  %v5500_v61 = vunpack.i.l.bf16 %v8352_v30  ;;  %3786 = vmatmul.f32.gmra.mxu0 %v8346_v4 }
 0x380   :  { %v3186_v28 = vsel %vm609_vm3, %v9194_v45, %v5500_v61  ;;  %v3187_v52 = vsel %vm609_vm3, %v5500_v61, %v9031_v13  ;;  %v9196_v61 = vunpack.i.h.bf16 %v7836_v59 }
 0x381   :  { %3883 = vmatpush.msrb.mxu0 %v3186_v28  ;;  %3970 = vmatpush.msrb.mxu3 %v3187_v52  ;;  %v8368_v60 = vpop.permute.xlu1 %5543  ;;  %v3025_v52 = vsel %vm782_vm4, %v5515_v32, %v9028_v29 }
 0x382   :  { %v9026_v9 = vunpack.i.l.bf16 %v8368_v60  ;;  %v9025_v45 = vunpack.i.h.bf16 %v8368_v60  ;;  %v3024_v28 = vsel %vm782_vm4, %v9196_v61, %v5515_v32  ;;  %v9199_v32 = vunpack.i.l.bf16 %v8156_v8 }
 0x383   :  { %3884 = vmatpush.msrb.mxu0 %v3182_v42  ;;  %3971 = vmatpush.msrb.mxu3 %v3183_v22  ;;  %v9200_v8 = vunpack.i.h.bf16 %v7729_v46 }
 0x384   :  { %v2321_v51 = vsel %vm352_vm8, %v9197_v24, %v9026_v9  ;;  %v2317_v54 = vsel %vm352_vm8, %v9199_v32, %v9025_v45 }
 0x385   :  { %v3432_v20 = vpop.permute.xlu0 %3431  ;;  %3885 = vmatpush.msrb.mxu0 %v3024_v28  ;;  %3972 = vmatpush.msrb.mxu3 %v3025_v52 }
 0x386   :  { %v3435_v42 = vsel %vm352_vm8, %v9198_v38, %v3432_v20  ;;  %v3445_v22 = vmul.f32 0.0, %v3432_v20  ;;  %3949 = vmatpush.msrb.mxu2 %v2321_v51  ;;  %v5565_v38 = vunpack.i.l.bf16 %v5564_v11 }
 0x387   :  { %v3454_v59 = vmul.f32 %v3435_v42, %v7665_v27  ;;  %v3459_v61 = vmul.f32 %v3435_v42, %v7692_v7 }
 0x388   :  { %3950 = vmatpush.msrb.mxu2 %v2317_v54  ;;  %v5566_v54 = vunpack.i.h.bf16 %v5564_v11  ;;  %v5530_v11 = vunpack.i.l.bf16 %v8328_v50 }
 0x389   :  { %3951 = vmatmul.f32.vlgmr.msrb.gmra.mxu2 %v8171_v2  ;;  %v5627_v28 = vpack.i.bf16 %v3445_v22, %v3454_v59  ;;  %v5617_v52 = vpack.i.bf16 %v3445_v22, %v3459_v61  ;;  %v8399_v24 = vpop.permute.xlu1 %5558  ;;  %v3444_v59 = vmul.f32 %v3435_v42, %v7635_v40  ;;  %v3449_v61 = vmul.f32 %v3435_v42, %v7663_v12 }
 0x38a   :  { %v9030_v20 = vunpack.i.h.bf16 %v8399_v24  ;;  %v9027_v51 = vunpack.i.l.bf16 %v8399_v24  ;;  %v9202_v42 = vunpack.i.l.bf16 %v8092_v10 }
 0x38b   :  { %5628 = vrot.lane.b32.xlu0 %v5627_v28, %s5655_s0  ;;  %5618 = vrot.lane.b32.xlu1 %v5617_v52, %s5655_s0  ;;  %v9201_v52 = vunpack.i.h.bf16 %v7904_v21  ;;  %v5642_v21 = vpack.i.bf16 %v3445_v22, %v3444_v59 }
 0x38c   :  { %v3526_v32 = vsel %vm263_vm1, %v9200_v8, %v9027_v51  ;;  %v5531_v8 = vunpack.i.h.bf16 %v8328_v50  ;;  %v2840_v51 = vsel %vm871_vm7, %v9202_v42, %v5565_v38  ;;  %v3727_v42 = vld [vmem:[%s8899_s8 + $0x10] sm:$0xff]  ;;  %v9228_v50 = vunpack.i.h.bf16 %v8203_v55 }
 0x38d   :  { %v8412_v45 = vpop.permute.xlu0 %5523  ;;  %3920 = vmatpush.msrb.mxu1 %v3526_v32  ;;  %v3522_v46 = vsel %vm263_vm1, %v9201_v52, %v9030_v20  ;;  %v9203_v32 = vunpack.i.h.bf16 %v7764_v5  ;;  %v5632_v52 = vpack.i.bf16 %v3445_v22, %v3449_v61  ;;  %v9208_v61 = vunpack.i.h.bf16 %v7674_v39  ;;  %v9209_v39 = vld [vmem:[#allocation14_spill] sm:$0xff] }
 0x38e   :  { %v5526_v9 = vunpack.i.h.bf16 %v8412_v45  ;;  %v5525_v28 = vunpack.i.l.bf16 %v8412_v45  ;;  %v9227_v45 = vunpack.i.l.bf16 %v8203_v55  ;;  %v9231_v55 = vunpack.i.l.bf16 %v8368_v60 }
 0x38f   :  { %3921 = vmatpush.msrb.mxu1 %v3522_v46  ;;  %v9204_v46 = vunpack.i.h.bf16 %v8092_v10  ;;  %v9206_v10 = vunpack.i.l.bf16 %v8044_v63 }
 0x390   :  { %v3020_v29 = vsel %vm782_vm4, %v9203_v32, %v5525_v28  ;;  %v3021_v53 = vsel %vm782_vm4, %v5525_v28, %v5526_v9  ;;  %4681 = vmatmul.msk.f32.vlgmr.msrb.gmra.mxu1 %vm1800_vm9, %v8008_v14  ;;  %v5579_v32 = vpop.permute.xlu2 %5578  ;;  %v9210_v14 = vld [vmem:[#allocation4_spill] sm:$0xff] }
 0x391   :  { %4022 = vmatpush.msra.mxu1 %v2840_v51  ;;  %3886 = vmatpush.msrb.mxu0 %v3020_v29  ;;  %v5574_v20 = vpop.permute.xlu1 %5573  ;;  %v2836_v13 = vsel %vm871_vm7, %v9204_v46, %v5566_v54  ;;  %v9205_v51 = vunpack.i.h.bf16 %v7768_v18  ;;  %v3017_v29 = vsel %vm782_vm4, %v5530_v11, %v5531_v8  ;;  %v9207_v18 = vunpack.i.h.bf16 %v8044_v63  ;;  %v3725_v63 = vld [vmem:[%s8899_s8] sm:$0xff]  ;;  %v9211_v46 = vld [vmem:[#allocation15_spill] sm:$0xff] }
 0x392   :  { %3973 = vmatpush.msrb.mxu3 %v3021_v53  ;;  %3954 = vmatmul.f32.gmra.mxu2 %v8214_v48  ;;  %v5576_v38 = vunpack.i.h.bf16 %v5574_v20  ;;  %v5575_v5 = vunpack.i.l.bf16 %v5574_v20 }
 0x393   :  { %4023 = vmatpush.msra.mxu1 %v2836_v13  ;;  %5643 = vrot.lane.b32.xlu0 %v5642_v21, %s5655_s0  ;;  %v3016_v53 = vsel %vm782_vm4, %v9205_v51, %v5530_v11  ;;  %v9213_v51 = vld [vmem:[#allocation11_spill] sm:$0xff] }
 0x394   :  { %5633 = vrot.lane.b32.xlu1 %v5632_v52, %s5655_s0  ;;  %3887 = vmatpush.msrb.mxu0 %v3016_v53  ;;  %v2832_v22 = vsel %vm871_vm7, %v9206_v10, %v5575_v5  ;;  %v2828_v59 = vsel %vm871_vm7, %v9207_v18, %v5576_v38  ;;  %v9212_v38 = vld [vmem:[#allocation6_spill] sm:$0xff]  ;;  %v9214_v53 = vld [vmem:[#allocation5_spill] sm:$0xff]  ;;  %v9217_v18 = vld [vmem:[#allocation7_spill] sm:$0xff] }
 0x395   :  { %3974 = vmatpush.msrb.mxu3 %v3017_v29  ;;  %v8447_v20 = vpop.permute.xlu0 %5538  ;;  %4024 = vmatpush.msra.mxu1 %v2832_v22  ;;  %v9215_v29 = vunpack.i.h.bf16 %v8228_v58  ;;  %v4506_v22 = vld [vmem:[%s8900_s10 + $0x10] sm:$0xff] }
 0x396   :  { %v5541_v13 = vunpack.i.h.bf16 %v8447_v20  ;;  %v5540_v54 = vunpack.i.l.bf16 %v8447_v20  ;;  %v9229_v20 = vunpack.i.l.bf16 %v8230_v19 }
 0x397   :  { %4025 = vmatpush.msra.mxu1 %v2828_v59  ;;  %v3728_v59 = vld [vmem:[%s8899_s8 + $0x18] sm:$0xff] }
 0x398   :  { %v3012_v28 = vsel %vm782_vm4, %v9208_v61, %v5540_v54  ;;  %v3013_v11 = vsel %vm782_vm4, %v5540_v54, %v5541_v13  ;;  %4682 = vmatmul.msk.f32.gmra.mxu1 %vm1800_vm9, %v8064_v23  ;;  %v9216_v54 = vld [vmem:[#allocation19_spill] sm:$0xff]  ;;  %v5594_v61 = vpop.permute.xlu2 %5593 }
 0x399   :  { %3888 = vmatpush.msrb.mxu0 %v3012_v28  ;;  %3975 = vmatpush.msrb.mxu3 %v3013_v11  ;;  %v5596_v3 = vunpack.i.h.bf16 %v5594_v61 }
 0x39a   :  { %3957 = vmatmul.f32.gmra.mxu2 %v8245_v36 }
 0x39b   :  { %3741 = vperm.xlu0 %4844, %v3727_v42   ;;  %3889 = vmatpush.msrb.mxu0 %v9209_v39  ;;  %v5580_v39 = vunpack.i.l.bf16 %v5579_v32 }
 0x39c   :  { %3731 = vperm.xlu1 %4845, %v3725_v63   ;;  %3976 = vmatpush.msrb.mxu3 %v9210_v14  ;;  %v5589_v63 = vpop.permute.xlu1 %5588 }
 0x39d   :  { %v5554_v21 = vpop.permute.xlu0 %5553  ;;  %3890 = vmatpush.msrb.mxu0 %v9211_v46  ;;  %v5590_v34 = vunpack.i.l.bf16 %v5589_v63 }
 0x39e   :  { %v5555_v52 = vunpack.i.l.bf16 %v5554_v21  ;;  %3977 = vmatpush.msrb.mxu3 %v9212_v38  ;;  %v5556_v5 = vunpack.i.h.bf16 %v5554_v21  ;;  %v4505_v21 = vld [vmem:[%s8900_s10 + $0x8] sm:$0xff] }
 0x39f   :  { %3891 = vmatpush.msrb.mxu0 %v9213_v51  ;;  %v5595_v51 = vunpack.i.l.bf16 %v5594_v61 }
 0x3a0   :  { %3978 = vmatpush.msrb.mxu3 %v9214_v53  ;;  %v3366_v10 = vsel %vm436_vm2, %v9215_v29, %v5555_v52  ;;  %v3362_v58 = vsel %vm436_vm2, %v5466_v37, %v5556_v5  ;;  %4683 = vmatmul.msk.f32.gmra.mxu1 %vm1800_vm9, %v8147_v16  ;;  %v5581_v37 = vunpack.i.h.bf16 %v5579_v32  ;;  %v5609_v32 = vpop.permute.xlu2 %5608  ;;  %v9219_v53 = vunpack.i.h.bf16 %v8352_v30 }
 0x3a1   :  { %4051 = vmatpush.msra.mxu2 %v3366_v10  ;;  %3892 = vmatpush.msrb.mxu0 %v9216_v54  ;;  %v9221_v54 = vunpack.i.h.bf16 %v8158_v62  ;;  %v9222_v30 = vunpack.i.l.bf16 %v8182_v25 }
 0x3a2   :  { %3979 = vmatpush.msrb.mxu3 %v9217_v18  ;;  %3893 = vmatmul.f32.vlgmr.msrb.gmra.mxu0 %v8076_v49  ;;  %v3192_v6 = vsel %vm609_vm3, %v5486_v17, %v5581_v37  ;;  %v3188_v29 = vsel %vm609_vm3, %v9219_v53, %v5590_v34  ;;  %v9220_v17 = vunpack.i.h.bf16 %v8134_v41  ;;  %v5611_v34 = vunpack.i.h.bf16 %v5609_v32 }
 0x3a3   :  { %3960 = vmatmul.f32.gmra.mxu2 %v8346_v4  ;;  %3980 = vmatmul.f32.vlgmr.msrb.gmra.mxu3 %v8076_v49 }
 0x3a4   :  { %4520 = vperm.xlu0 %4844, %v4506_v22   ;;  %3746 = vperm.xlu1 %4845, %v3728_v59   ;;  %v5604_v10 = vpop.permute.xlu1 %5603 }
 0x3a5   :  { %4052 = vmatpush.msra.mxu2 %v3362_v58  ;;  %v5569_v28 = vpop.permute.xlu0 %5568  ;;  %v5605_v59 = vunpack.i.l.bf16 %v5604_v10  ;;  %v2662_v58 = vsel %vm698_vm6, %v9222_v30, %v5595_v51  ;;  %v5606_v41 = vunpack.i.h.bf16 %v5604_v10 }
 0x3a6   :  { %v5571_v11 = vunpack.i.h.bf16 %v5569_v28  ;;  %v5570_v42 = vunpack.i.l.bf16 %v5569_v28 }
 0x3a8   :  { %v3358_v14 = vsel %vm436_vm2, %v5461_v56, %v5570_v42  ;;  %v3354_v52 = vsel %vm436_vm2, %v5451_v33, %v5571_v11  ;;  %v3196_v56 = vsel %vm609_vm3, %v5496_v35, %v5580_v39  ;;  %v5591_v33 = vunpack.i.h.bf16 %v5589_v63  ;;  %4684 = vmatmul.msk.f32.gmra.mxu1 %vm1800_vm9, %v8187_v47  ;;  %v5624_v63 = vpop.permute.xlu2 %5623 }
 0x3a9   :  { %4053 = vmatpush.msra.mxu2 %v3358_v14  ;;  %v9223_v11 = vunpack.i.h.bf16 %v8182_v25  ;;  %v9224_v39 = vunpack.i.l.bf16 %v8216_v1 }
 0x3aa   :  { %3896 = vmatmul.f32.gmra.mxu0 %v8121_v0  ;;  %v3184_v18 = vsel %vm609_vm3, %v9221_v54, %v5591_v33  ;;  %v5626_v33 = vunpack.i.h.bf16 %v5624_v63 }
 0x3ab   :  { %4054 = vmatpush.msra.mxu2 %v3354_v52  ;;  %3983 = vmatmul.f32.gmra.mxu3 %v8121_v0  ;;  %v2658_v42 = vsel %vm698_vm6, %v9223_v11, %v5596_v3  ;;  %v2500_v14 = vsel %vm525_vm5, %v9224_v39, %v5605_v59  ;;  %v9226_v52 = vunpack.i.h.bf16 %v8216_v1 }
 0x3ac   :  { %4577 = vperm.xlu0 %4844, %v4574_v26   ;;  %4515 = vperm.xlu1 %4845, %v4505_v21   ;;  %v9225_v26 = vunpack.i.h.bf16 %v8258_v15  ;;  %v5610_v21 = vunpack.i.l.bf16 %v5609_v32  ;;  %v3014_v32 = vsel %vm782_vm4, %v5541_v13, %v5611_v34 }
 0x3ad   :  { %v5584_v46 = vpop.permute.xlu0 %5583  ;;  %4055 = vmatpush.msra.mxu2 %v3196_v56  ;;  %v2496_v25 = vsel %vm525_vm5, %v9226_v52, %v5606_v41 }
 0x3ae   :  { %v5586_v38 = vunpack.i.h.bf16 %v5584_v46  ;;  %v5585_v5 = vunpack.i.l.bf16 %v5584_v46  ;;  %v3018_v46 = vsel %vm782_vm4, %v5531_v8, %v5610_v21 }
 0x3af   :  { %4056 = vmatpush.msra.mxu2 %v3192_v6 }
 0x3b0   :  { %v2670_v35 = vsel %vm698_vm6, %v9218_v43, %v5585_v5  ;;  %v2666_v22 = vsel %vm698_vm6, %v9220_v17, %v5586_v38  ;;  %v5625_v5 = vunpack.i.l.bf16 %v5624_v63  ;;  %v5639_v6 = vpop.permute.xlu2 %5638  ;;  %v9234_v63 = vunpack.i.h.bf16 %v8293_v44 }
 0x3b1   :  { %4026 = vmatpush.msra.mxu1 %v2670_v35  ;;  %4057 = vmatpush.msra.mxu2 %v3188_v29  ;;  %v5640_v51 = vunpack.i.l.bf16 %v5639_v6  ;;  %v5641_v43 = vunpack.i.h.bf16 %v5639_v6  ;;  %v9230_v35 = vunpack.i.h.bf16 %v8230_v19  ;;  %v5663_v19 = vmov 1.0  }
 0x3b2   :  { %3899 = vmatmul.f32.gmra.mxu0 %v8268_v57  ;;  %v2330_v13 = vsel %vm352_vm8, %v9229_v20, %v5625_v5 }
 0x3b3   :  { %4027 = vmatpush.msra.mxu1 %v2666_v22  ;;  %3986 = vmatmul.f32.gmra.mxu3 %v8268_v57  ;;  %v2322_v53 = vsel %vm352_vm8, %v9231_v55, %v5640_v51 }
 0x3b4   :  { %4058 = vmatpush.msra.mxu2 %v3184_v18 }
 0x3b5   :  { %v5599_v61 = vpop.permute.xlu0 %5598  ;;  %4028 = vmatpush.msra.mxu1 %v2662_v58 }
 0x3b6   :  { %v5600_v28 = vunpack.i.l.bf16 %v5599_v61  ;;  %v5601_v62 = vunpack.i.h.bf16 %v5599_v61 }
 0x3b7   :  { %4029 = vmatpush.msra.mxu1 %v2658_v42 }
 0x3b8   :  { %v3026_v37 = vsel %vm782_vm4, %v9225_v26, %v5600_v28  ;;  %v3022_v56 = vsel %vm782_vm4, %v5526_v9, %v5601_v62  ;;  %v9233_v28 = vunpack.i.l.bf16 %v8293_v44 }
 0x3b9   :  { %4030 = vmatpush.msra.mxu1 %v2500_v14  ;;  %4059 = vmatpush.msra.mxu2 %v3026_v37 }
 0x3ba   :  { %3902 = vmatmul.f32.gmra.mxu0 %v8333_v31 }
 0x3bb   :  { %4031 = vmatpush.msra.mxu1 %v2496_v25  ;;  %3989 = vmatmul.f32.gmra.mxu3 %v8333_v31 }
 0x3bc   :  { %4060 = vmatpush.msra.mxu2 %v3022_v56 }
 0x3bd   :  { %v5614_v15 = vpop.permute.xlu0 %5613 }
 0x3be   :  { %v5616_v38 = vunpack.i.h.bf16 %v5614_v15  ;;  %v5615_v1 = vunpack.i.l.bf16 %v5614_v15  ;;  %4061 = vmatpush.msra.mxu2 %v3018_v46 }
 0x3c0   :  { %4062 = vmatpush.msra.mxu2 %v3014_v32  ;;  %v2492_v9 = vsel %vm525_vm5, %v9227_v45, %v5615_v1  ;;  %v2488_v8 = vsel %vm525_vm5, %v9228_v50, %v5616_v38  ;;  %v9235_v1 = vunpack.i.l.bf16 %v8399_v24  ;;  %v9236_v50 = vunpack.i.h.bf16 %v8399_v24 }
 0x3c1   :  { %4032 = vmatpush.msra.mxu1 %v2492_v9 }
 0x3c2   :  { %4063 = vmatpush.msra.mxu2 %v7692_v7  ;;  %v2326_v7 = vsel %vm352_vm8, %v9230_v35, %v5626_v33 }
 0x3c3   :  { %4033 = vmatpush.msra.mxu1 %v2488_v8 }
 0x3c4   :  { %4064 = vmatpush.msra.mxu2 %v7665_v27  ;;  %v9232_v27 = vunpack.i.h.bf16 %v8368_v60 }
 0x3c5   :  { %4034 = vmatpush.msra.mxu1 %v2330_v13  ;;  %v5653_v13 = vld [vmem:[%s8898_s7 + $0x10] sm:$0xff] }
 0x3c6   :  { %4065 = vmatpush.msra.mxu2 %v7663_v12  ;;  %v2318_v29 = vsel %vm352_vm8, %v9232_v27, %v5641_v43 }
 0x3c7   :  { %4035 = vmatpush.msra.mxu1 %v2326_v7 }
 0x3c8   :  { %4066 = vmatpush.msra.mxu2 %v7635_v40  ;;  %v4125_v40 = vlaneseq }
 0x3c9   :  { %4067 = vmatmul.f32.vlgmr.msra.gmra.mxu2 %v8076_v49  ;;  %4036 = vmatpush.msra.mxu1 %v2322_v53  ;;  %v8593_v49 = vld [vmem:[%s8901_s2] ss:$0 sm:$0xff] }
 0x3ca   :  { %v8588_v12 = vshrl.u32 %v4125_v40, 7 }
 0x3cb   :  { %4037 = vmatpush.msra.mxu1 %v2318_v29 }
 0x3cc   :  { %4038 = vmatmul.f32.vlgmr.msra.gmra.mxu1 %v8171_v2  ;;  %v4156_v2 = vadd.s32 240, %v8588_v12  ;;  %v4151_v60 = vadd.s32 200, %v8588_v12  ;;  %v4150_v10 = vadd.s32 192, %v8588_v12  ;;  %v4149_v58 = vadd.s32 184, %v8588_v12 }
 0x3cd   :  { %v4148_v61 = vadd.s32 176, %v8588_v12  ;;  %v4147_v14 = vadd.s32 168, %v8588_v12  ;;  %v4146_v26 = vadd.s32 160, %v8588_v12  ;;  %v4145_v37 = vadd.s32 152, %v8588_v12 }
 0x3ce   :  { %vm4222_vm11 = vcmp.eq.s32.totalorder %v4156_v2, %v8593_v49  ;;  %vm4217_vm0 = vcmp.eq.s32.totalorder %v4151_v60, %v8593_v49  ;;  %vm4216_vm2 = vcmp.eq.s32.totalorder %v4150_v10, %v8593_v49  ;;  %vm4215_vm3 = vcmp.eq.s32.totalorder %v4149_v58, %v8593_v49 }
 0x3cf   :  { %vm4214_vm4 = vcmp.eq.s32.totalorder %v4148_v61, %v8593_v49  ;;  %vm4213_vm5 = vcmp.eq.s32.totalorder %v4147_v14, %v8593_v49  ;;  %v4141_v52 = vadd.s32 120, %v8588_v12  ;;  %vm4212_vm6 = vcmp.eq.s32.totalorder %v4146_v26, %v8593_v49  ;;  %v8739_v61 = vpop.permute.xlu2 %3736 }
 0x3d0   :  { %v4144_v25 = vadd.s32 144, %v8588_v12  ;;  %vm4211_vm7 = vcmp.eq.s32.totalorder %v4145_v37, %v8593_v49  ;;  %v4140_v9 = vadd.s32 112, %v8588_v12  ;;  %v4143_v6 = vadd.s32 136, %v8588_v12 }
 0x3d1   :  { %4070 = vmatmul.f32.gmra.mxu2 %v8121_v0  ;;  %v4157_v0 = vadd.s32 248, %v8588_v12  ;;  %vm4207_vm8 = vcmp.eq.s32.totalorder %v4141_v52, %v8593_v49  ;;  %v4139_v33 = vadd.s32 104, %v8588_v12  ;;  %v4142_v20 = vadd.s32 128, %v8588_v12 }
 0x3d2   :  { %v4138_v24 = vadd.s32 96, %v8588_v12  ;;  %v4137_v35 = vadd.s32 88, %v8588_v12  ;;  %v4136_v7 = vadd.s32 80, %v8588_v12  ;;  %v4135_v53 = vadd.s32 72, %v8588_v12 }
 0x3d3   :  { %vm4223_vm10 = vcmp.eq.s32.totalorder %v4157_v0, %v8593_v49  ;;  %v4134_v27 = vadd.s32 64, %v8588_v12  ;;  %v4133_v29 = vadd.s32 56, %v8588_v12  ;;  %v4132_v2 = vadd.s32 48, %v8588_v12 }
 0x3d4   :  { %4041 = vmatmul.f32.gmra.mxu1 %v8214_v48  ;;  %v4155_v48 = vadd.s32 232, %v8588_v12  ;;  %v4129_v60 = vadd.s32 24, %v8588_v12 }
 0x3d5   :  { %4773 = vmatpush.msk.msrb.mxu1 %vm4223_vm10, %v5663_v19  ;;  %vm4210_vm10 = vcmp.eq.s32.totalorder %v4144_v25, %v8593_v49 }
 0x3d6   :  { %vm4221_vm12 = vcmp.eq.s32.totalorder %v4155_v48, %v8593_v49  ;;  %v4131_v48 = vadd.s32 40, %v8588_v12 }
 0x3d7   :  { %4774 = vmatpush.msk.msrb.mxu1 %vm4222_vm11, %v5663_v19  ;;  %vm4206_vm11 = vcmp.eq.s32.totalorder %v4140_v9, %v8593_v49 }
 0x3d9   :  { %4073 = vmatmul.f32.gmra.mxu2 %v8268_v57  ;;  %4775 = vmatpush.msk.msrb.mxu1 %vm4221_vm12, %v5663_v19  ;;  %v4153_v57 = vadd.s32 216, %v8588_v12  ;;  %vm4205_vm12 = vcmp.eq.s32.totalorder %v4139_v33, %v8593_v49 }
 0x3db   :  { %vm4219_vm14 = vcmp.eq.s32.totalorder %v4153_v57, %v8593_v49  ;;  %v4130_v57 = vadd.s32 32, %v8588_v12 }
 0x3dc   :  { %4044 = vmatmul.f32.gmra.mxu1 %v8245_v36  ;;  %v4154_v36 = vadd.s32 224, %v8588_v12 }
 0x3de   :  { %vm4220_vm13 = vcmp.eq.s32.totalorder %v4154_v36, %v8593_v49 }
 0x3df   :  { %4776 = vmatpush.msk.msrb.mxu1 %vm4220_vm13, %v5663_v19  ;;  %vm4208_vm13 = vcmp.eq.s32.totalorder %v4142_v20, %v8593_v49 }
 0x3e1   :  { %4076 = vmatmul.f32.gmra.mxu2 %v8333_v31  ;;  %v4152_v31 = vadd.s32 208, %v8588_v12  ;;  %4777 = vmatpush.msk.msrb.mxu1 %vm4219_vm14, %v5663_v19  ;;  %vm4204_vm14 = vcmp.eq.s32.totalorder %v4138_v24, %v8593_v49 }
 0x3e3   :  { %vm4218_vm15 = vcmp.eq.s32.totalorder %v4152_v31, %v8593_v49  ;;  %v8618_v3 = vpop.f32.mrf.mxu0 }
 0x3e4   :  { %4047 = vmatmul.f32.gmra.mxu1 %v8346_v4  ;;  %v8607_v4 = vpop.f32.mrf.mxu1 }
 0x3e5   :  { %4778 = vmatpush.msk.msrb.mxu1 %vm4218_vm15, %v5663_v19  ;;  %vm4203_vm15 = vcmp.eq.s32.totalorder %v4137_v35, %v8593_v49  ;;  %v3865_v40 = vpop.f32.mrf.mxu3 }
 0x3e7   :  { %4779 = vmatpush.msk.msrb.mxu1 %vm4217_vm0, %v5663_v19  ;;  %vm4202_vm0 = vcmp.eq.s32.totalorder %v4136_v7, %v8593_v49 }
 0x3e9   :  { %4780 = vmatpush.msk.msrb.mxu1 %vm4216_vm2, %v5663_v19  ;;  %vm4201_vm2 = vcmp.eq.s32.totalorder %v4135_v53, %v8593_v49 }
 0x3eb   :  { %4781 = vmatpush.msk.msrb.mxu1 %vm4215_vm3, %v5663_v19  ;;  %v8646_v34 = vpop.f32.mrf.mxu0  ;;  %vm4200_vm3 = vcmp.eq.s32.totalorder %v4134_v27, %v8593_v49 }
 0x3ec   :  { %v8625_v41 = vpop.f32.mrf.mxu1 }
 0x3ed   :  { %4782 = vmatpush.msk.msrb.mxu1 %vm4214_vm4, %v5663_v19  ;;  %vm4199_vm4 = vcmp.eq.s32.totalorder %v4133_v29, %v8593_v49  ;;  %v4173_v29 = vadd.s32 376, %v8588_v12 }
 0x3ef   :  { %4783 = vmatpush.msk.msrb.mxu1 %vm4213_vm5, %v5663_v19  ;;  %vm4198_vm5 = vcmp.eq.s32.totalorder %v4132_v2, %v8593_v49  ;;  %v4189_v2 = vadd.s32 504, %v8588_v12 }
 0x3f1   :  { %4784 = vmatpush.msk.msrb.mxu1 %vm4212_vm6, %v5663_v19  ;;  %vm4197_vm6 = vcmp.eq.s32.totalorder %v4131_v48, %v8593_v49  ;;  %v4169_v48 = vadd.s32 344, %v8588_v12 }
 0x3f3   :  { %4785 = vmatpush.msk.msrb.mxu1 %vm4211_vm7, %v5663_v19  ;;  %v8678_v43 = vpop.f32.mrf.mxu0  ;;  %vm4196_vm7 = vcmp.eq.s32.totalorder %v4130_v57, %v8593_v49  ;;  %v4187_v57 = vadd.s32 488, %v8588_v12 }
 0x3f4   :  { %v8654_v45 = vpop.f32.mrf.mxu1 }
 0x3f5   :  { %4786 = vmatpush.msk.msrb.mxu1 %vm4210_vm10, %v5663_v19 }
 0x3fb   :  { %v8704_v0 = vpop.f32.mrf.mxu0 }
 0x3fc   :  { %v8690_v55 = vpop.f32.mrf.mxu1 }
 0x3fd   :  { %v5629_v17 = vpop.permute.xlu0 %5628  ;;  %v5619_v22 = vpop.permute.xlu1 %5618 }
 0x3fe   :  { %v5631_v54 = vunpack.i.h.bf16 %v5629_v17  ;;  %v5630_v18 = vunpack.i.l.bf16 %v5629_v17  ;;  %v5621_v59 = vunpack.i.h.bf16 %v5619_v22  ;;  %v5620_v30 = vunpack.i.l.bf16 %v5619_v22  ;;  %v3836_v22 = vpop.f32.mrf.mxu2 }
 0x400   :  { %v3535_v11 = vsel %vm263_vm1, %v9233_v28, %v5620_v30  ;;  %v3536_v42 = vsel %vm263_vm1, %v5620_v30, %v5621_v59  ;;  %v3531_v62 = vsel %vm263_vm1, %v9234_v63, %v5630_v18  ;;  %v3532_v39 = vsel %vm263_vm1, %v5630_v18, %v5631_v54  ;;  %v3868_v18 = vpop.f32.mrf.mxu3 }
 0x401   :  { %4005 = vmatpush.msra.mxu0 %v3535_v11  ;;  %4092 = vmatpush.msra.mxu3 %v3536_v42  ;;  %v4127_v59 = vadd.s32 8, %v8588_v12  ;;  %v3869_v42 = vadd.f32 %v3868_v18, %v8739_v61  ;;  %v4182_v18 = vadd.s32 448, %v8588_v12 }
 0x403   :  { %4006 = vmatpush.msra.mxu0 %v3531_v62  ;;  %4093 = vmatpush.msra.mxu3 %v3532_v39 }
 0x405   :  { %v5644_v44 = vpop.permute.xlu0 %5643 }
 0x406   :  { %v5634_v21 = vpop.permute.xlu1 %5633  ;;  %v5646_v56 = vunpack.i.h.bf16 %v5644_v44  ;;  %v5645_v15 = vunpack.i.l.bf16 %v5644_v44  ;;  %v3839_v26 = vpop.f32.mrf.mxu2 }
 0x407   :  { %v5636_v46 = vunpack.i.h.bf16 %v5634_v21  ;;  %v5635_v38 = vunpack.i.l.bf16 %v5634_v21 }
 0x408   :  { %v3523_v8 = vsel %vm263_vm1, %v9236_v50, %v5645_v15  ;;  %v3524_v51 = vsel %vm263_vm1, %v5645_v15, %v5646_v56  ;;  %v3871_v14 = vpop.f32.mrf.mxu3 }
 0x409   :  { %v3527_v32 = vsel %vm263_vm1, %v9235_v1, %v5635_v38  ;;  %v3528_v5 = vsel %vm263_vm1, %v5635_v38, %v5636_v46  ;;  %vm4209_vm1 = vcmp.eq.s32.totalorder %v4143_v6, %v8593_v49 }
 0x40a   :  { %4007 = vmatpush.msra.mxu0 %v3527_v32  ;;  %4094 = vmatpush.msra.mxu3 %v3528_v5 }
 0x40b   :  { %4787 = vmatpush.msk.msrb.mxu1 %vm4209_vm1, %v5663_v19  ;;  %vm4192_vm1 = vcmp.eq.s32.totalorder %v8588_v12, %v8593_v49 }
 0x40c   :  { %4008 = vmatpush.msra.mxu0 %v3523_v8  ;;  %4095 = vmatpush.msra.mxu3 %v3524_v51 }
 0x40d   :  { %4685 = vmatmul.msk.f32.vlgmr.msra.gmra.mxu0 %vm1800_vm9, %v5653_v13  ;;  %4689 = vmatmul.msk.f32.vlgmr.msra.gmra.mxu3 %vm1800_vm9, %v5653_v13  ;;  %v8751_v37 = vpop.permute.xlu0 %3741 }
 0x40e   :  { %4757 = vmatpush.msk.msrb.mxu0 %vm4207_vm8, %v5663_v19  ;;  %4788 = vmatpush.msk.msrb.mxu1 %vm4208_vm13, %v5663_v19  ;;  %v8711_v36 = vpop.permute.xlu1 %3731  ;;  %vm4195_vm8 = vcmp.eq.s32.totalorder %v4129_v60, %v8593_v49  ;;  %v3785_v25 = vadd.f32 %v8678_v43, %v8751_v37  ;;  %v3872_v56 = vadd.f32 %v3871_v14, %v8751_v37  ;;  %v3842_v1 = vpop.f32.mrf.mxu2  ;;  %v4185_v60 = vadd.s32 472, %v8588_v12 }
 0x40f   :  { %v3779_v31 = vadd.f32 %v8618_v3, %v8711_v36  ;;  %v3866_v10 = vadd.f32 %v3865_v40, %v8711_v36  ;;  %v4172_v40 = vadd.s32 368, %v8588_v12  ;;  %v4159_v14 = vadd.s32 264, %v8588_v12 }
 0x410   :  { %4758 = vmatpush.msk.msrb.mxu0 %vm4206_vm11, %v5663_v19  ;;  %vm4193_vm11 = vcmp.eq.s32.totalorder %v4127_v59, %v8593_v49  ;;  %v3814_v38 = vadd.f32 %v8654_v45, %v3785_v25  ;;  %v3874_v9 = vpop.f32.mrf.mxu3  ;;  %v4181_v59 = vadd.s32 440, %v8588_v12 }
 0x411   :  { %v3808_v3 = vadd.f32 %v8607_v4, %v3779_v31  ;;  %v3782_v4 = vadd.f32 %v8646_v34, %v8739_v61  ;;  %vm4238_vm13 = vcmp.eq.s32.totalorder %v4172_v40, %v8593_v49  ;;  %v4186_v31 = vadd.s32 480, %v8588_v12 }
 0x412   :  { %4759 = vmatpush.msk.msrb.mxu0 %vm4205_vm12, %v5663_v19  ;;  %v3843_v33 = vadd.f32 %v3842_v1, %v3814_v38  ;;  %vm4239_vm12 = vcmp.eq.s32.totalorder %v4173_v29, %v8593_v49 }
 0x413   :  { %v3837_v11 = vadd.f32 %v3836_v22, %v3808_v3  ;;  %v3811_v62 = vadd.f32 %v8625_v41, %v3782_v4  ;;  %4789 = vmatpush.msk.msrb.mxu2 %vm4239_vm12, %v5663_v19  ;;  %v4183_v22 = vadd.s32 456, %v8588_v12  ;;  %v4165_v3 = vadd.s32 312, %v8588_v12 }
 0x414   :  { %4760 = vmatpush.msk.msrb.mxu0 %vm4204_vm14, %v5663_v19  ;;  %v4117_v24 = vmax.f32 %v3843_v33, 0.0  ;;  %vm4255_vm14 = vcmp.eq.s32.totalorder %v4189_v2, %v8593_v49  ;;  %vm4248_vm12 = vcmp.eq.s32.totalorder %v4182_v18, %v8593_v49  ;;  %v4162_v4 = vadd.s32 288, %v8588_v12 }
 0x415   :  { %4686 = vmatmul.msk.f32.gmra.mxu0 %vm1800_vm9, %v8064_v23  ;;  %4690 = vmatmul.msk.f32.gmra.mxu3 %vm1800_vm9, %v8064_v23  ;;  %v3923_v23 = vpop.f32.mrf.mxu1  ;;  %v4109_v39 = vmax.f32 %v3837_v11, 0.0  ;;  %v3840_v52 = vadd.f32 %v3839_v26, %v3811_v62  ;;  %v4161_v11 = vadd.s32 280, %v8588_v12  ;;  %v4160_v62 = vadd.s32 272, %v8588_v12 }
 0x416   :  { %4761 = vmatpush.msk.msrb.mxu0 %vm4203_vm15, %v5663_v19  ;;  %v8758_v32 = vpop.permute.xlu1 %3746  ;;  %v3845_v35 = vpop.f32.mrf.mxu2  ;;  %4805 = vmatpush.msk.msrb.mxu3 %vm4255_vm14, %v5663_v19  ;;  %vm4247_vm14 = vcmp.eq.s32.totalorder %v4181_v59, %v8593_v49  ;;  %v4178_v26 = vadd.s32 416, %v8588_v12 }
 0x417   :  { %v4113_v46 = vmax.f32 %v3840_v52, 0.0  ;;  %v3788_v50 = vadd.f32 %v8704_v0, %v8758_v32  ;;  %v3875_v8 = vadd.f32 %v3874_v9, %v8758_v32  ;;  %v4171_v0 = vadd.s32 360, %v8588_v12  ;;  %4790 = vmatpush.msk.msrb.mxu2 %vm4238_vm13, %v5663_v19 }
 0x418   :  { %4762 = vmatpush.msk.msrb.mxu0 %vm4202_vm0, %v5663_v19  ;;  %vm4231_vm13 = vcmp.eq.s32.totalorder %v4165_v3, %v8593_v49  ;;  %v4176_v52 = vadd.s32 400, %v8588_v12 }
 0x419   :  { %v3817_v45 = vadd.f32 %v8690_v55, %v3788_v50  ;;  %v4170_v55 = vadd.s32 352, %v8588_v12  ;;  %vm4237_vm0 = vcmp.eq.s32.totalorder %v4171_v0, %v8593_v49 }
 0x41a   :  { %4763 = vmatpush.msk.msrb.mxu0 %vm4201_vm2, %v5663_v19  ;;  %4791 = vmatpush.msk.msrb.mxu2 %vm4237_vm0, %v5663_v19 }
 0x41b   :  { %v3846_v53 = vadd.f32 %v3845_v35, %v3817_v45  ;;  %vm4236_vm2 = vcmp.eq.s32.totalorder %v4170_v55, %v8593_v49 }
 0x41c   :  { %4764 = vmatpush.msk.msrb.mxu0 %vm4200_vm3, %v5663_v19  ;;  %vm4253_vm3 = vcmp.eq.s32.totalorder %v4187_v57, %v8593_v49  ;;  %4792 = vmatpush.msk.msrb.mxu2 %vm4236_vm2, %v5663_v19 }
 0x41d   :  { %4687 = vmatmul.msk.f32.gmra.mxu0 %vm1800_vm9, %v8147_v16  ;;  %4691 = vmatmul.msk.f32.gmra.mxu3 %vm1800_vm9, %v8147_v16  ;;  %v4128_v16 = vadd.s32 16, %v8588_v12  ;;  %v3926_v58 = vpop.f32.mrf.mxu1  ;;  %v4121_v27 = vmax.f32 %v3846_v53, 0.0 }
 0x41e   :  { %4765 = vmatpush.msk.msrb.mxu0 %vm4199_vm4, %v5663_v19  ;;  %vm4252_vm4 = vcmp.eq.s32.totalorder %v4186_v31, %v8593_v49 }
 0x41f   :  { %v3894_v17 = vpop.f32.mrf.mxu0  ;;  %vm4194_vm10 = vcmp.eq.s32.totalorder %v4128_v16, %v8593_v49  ;;  %v4167_v16 = vadd.s32 328, %v8588_v12 }
 0x420   :  { %4766 = vmatpush.msk.msrb.mxu0 %vm4198_vm5, %v5663_v19  ;;  %v3895_v54 = vadd.f32 %v3894_v17, %v3866_v10  ;;  %v4168_v10 = vadd.s32 336, %v8588_v12  ;;  %v4184_v17 = vadd.s32 464, %v8588_v12  ;;  %vm4235_vm5 = vcmp.eq.s32.totalorder %v4169_v48, %v8593_v49 }
 0x421   :  { %4793 = vmatpush.msk.msrb.mxu2 %vm4235_vm5, %v5663_v19  ;;  %vm4226_vm5 = vcmp.eq.s32.totalorder %v4160_v62, %v8593_v49 }
 0x422   :  { %4767 = vmatpush.msk.msrb.mxu0 %vm4197_vm6, %v5663_v19  ;;  %v3924_v30 = vadd.f32 %v3923_v23, %v3895_v54  ;;  %v4188_v23 = vadd.s32 496, %v8588_v12  ;;  %vm4251_vm6 = vcmp.eq.s32.totalorder %v4185_v60, %v8593_v49  ;;  %v4166_v54 = vadd.s32 320, %v8588_v12 }
 0x424   :  { %4768 = vmatpush.msk.msrb.mxu0 %vm4196_vm7, %v5663_v19  ;;  %v4110_v28 = vmax.f32 %v3924_v30, 0.0  ;;  %vm4254_vm15 = vcmp.eq.s32.totalorder %v4188_v23, %v8593_v49  ;;  %vm4234_vm7 = vcmp.eq.s32.totalorder %v4168_v10, %v8593_v49  ;;  %v4164_v30 = vadd.s32 304, %v8588_v12 }
 0x425   :  { %4688 = vmatmul.msk.f32.gmra.mxu0 %vm1800_vm9, %v8187_v47  ;;  %4692 = vmatmul.msk.f32.gmra.mxu3 %vm1800_vm9, %v8187_v47  ;;  %v3929_v34 = vpop.f32.mrf.mxu1 }
 0x426   :  { %4769 = vmatpush.msk.msrb.mxu0 %vm4195_vm8, %v5663_v19  ;;  %4429 = vmatmul.f32.vlgmr.msrb.gmra.mxu1 %v4110_v28  ;;  %vm4250_vm8 = vcmp.eq.s32.totalorder %v4184_v17, %v8593_v49  ;;  %v4163_v28 = vadd.s32 296, %v8588_v12 }
 0x427   :  { %v3897_v47 = vpop.f32.mrf.mxu0  ;;  %4806 = vmatpush.msk.msrb.mxu3 %vm4254_vm15, %v5663_v19  ;;  %4794 = vmatpush.msk.msrb.mxu2 %vm4234_vm7, %v5663_v19  ;;  %vm4230_vm15 = vcmp.eq.s32.totalorder %v4164_v30, %v8593_v49  ;;  %vm4225_vm7 = vcmp.eq.s32.totalorder %v4159_v14, %v8593_v49 }
 0x428   :  { %4770 = vmatpush.msk.msrb.mxu0 %vm4194_vm10, %v5663_v19  ;;  %v3898_v63 = vadd.f32 %v3897_v47, %v3869_v42  ;;  %vm4233_vm10 = vcmp.eq.s32.totalorder %v4167_v16, %v8593_v49  ;;  %vm4229_vm2 = vcmp.eq.s32.totalorder %v4163_v28, %v8593_v49  ;;  %v3952_v42 = vpop.f32.mrf.mxu2 }
 0x429   :  { %4807 = vmatpush.msk.msrb.mxu3 %vm4253_vm3, %v5663_v19  ;;  %4795 = vmatpush.msk.msrb.mxu2 %vm4233_vm10, %v5663_v19  ;;  %vm4228_vm3 = vcmp.eq.s32.totalorder %v4162_v4, %v8593_v49 }
 0x42a   :  { %4771 = vmatpush.msk.msrb.mxu0 %vm4193_vm11, %v5663_v19  ;;  %v3927_v44 = vadd.f32 %v3926_v58, %v3898_v63  ;;  %vm4249_vm11 = vcmp.eq.s32.totalorder %v4183_v22, %v8593_v49  ;;  %v4180_v58 = vadd.s32 432, %v8588_v12  ;;  %v3981_v63 = vpop.f32.mrf.mxu3 }
 0x42b   :  { %4808 = vmatpush.msk.msrb.mxu3 %vm4252_vm4, %v5663_v19  ;;  %vm4227_vm4 = vcmp.eq.s32.totalorder %v4161_v11, %v8593_v49 }
 0x42c   :  { %4772 = vmatpush.msk.msrb.mxu0 %vm4192_vm1, %v5663_v19  ;;  %v4114_v21 = vmax.f32 %v3927_v44, 0.0  ;;  %vm4232_vm1 = vcmp.eq.s32.totalorder %v4166_v54, %v8593_v49  ;;  %vm4246_vm0 = vcmp.eq.s32.totalorder %v4180_v58, %v8593_v49  ;;  %v4158_v44 = vadd.s32 256, %v8588_v12 }
 0x42d   :  { %4400 = vmatmul.f32.vlgmr.msrb.gmra.mxu0 %v4109_v39  ;;  %v3932_v20 = vpop.f32.mrf.mxu1  ;;  %4809 = vmatpush.msk.msrb.mxu3 %vm4251_vm6, %v5663_v19  ;;  %v4179_v39 = vadd.s32 424, %v8588_v12 }
 0x42e   :  { %4432 = vmatmul.f32.gmra.mxu1 %v4114_v21  ;;  %4796 = vmatpush.msk.msrb.mxu2 %vm4232_vm1, %v5663_v19  ;;  %v4177_v21 = vadd.s32 408, %v8588_v12  ;;  %vm4224_vm10 = vcmp.eq.s32.totalorder %v4158_v44, %v8593_v49  ;;  %vm4242_vm1 = vcmp.eq.s32.totalorder %v4176_v52, %v8593_v49 }
 0x42f   :  { %v3900_v15 = vpop.f32.mrf.mxu0  ;;  %4810 = vmatpush.msk.msrb.mxu3 %vm4250_vm8, %v5663_v19  ;;  %vm4245_vm6 = vcmp.eq.s32.totalorder %v4179_v39, %v8593_v49  ;;  %vm4244_vm8 = vcmp.eq.s32.totalorder %v4178_v26, %v8593_v49 }
 0x430   :  { %v3901_v41 = vadd.f32 %v3900_v15, %v3872_v56  ;;  %4797 = vmatpush.msk.msrb.mxu2 %vm4231_vm13, %v5663_v19  ;;  %v3955_v47 = vpop.f32.mrf.mxu2  ;;  %v4175_v56 = vadd.s32 392, %v8588_v12  ;;  %v4174_v15 = vadd.s32 384, %v8588_v12 }
 0x431   :  { %4811 = vmatpush.msk.msrb.mxu3 %vm4249_vm11, %v5663_v19  ;;  %vm4243_vm11 = vcmp.eq.s32.totalorder %v4177_v21, %v8593_v49 }
 0x432   :  { %v3930_v5 = vadd.f32 %v3929_v34, %v3901_v41  ;;  %4798 = vmatpush.msk.msrb.mxu2 %vm4230_vm15, %v5663_v19  ;;  %v3984_v34 = vpop.f32.mrf.mxu3  ;;  %vm4240_vm13 = vcmp.eq.s32.totalorder %v4174_v15, %v8593_v49  ;;  %vm4603_vm15 = vcmp.lt.s32.totalorder %v8588_v12, 2 }
 0x433   :  { %4812 = vmatpush.msk.msrb.mxu3 %vm4248_vm12, %v5663_v19  ;;  %vm4241_vm12 = vcmp.eq.s32.totalorder %v4175_v56, %v8593_v49  ;;  %v3956_v49 = vadd.f32 %v3955_v47, %v8739_v61 }
 0x434   :  { %v4118_v6 = vmax.f32 %v3930_v5, 0.0  ;;  %4799 = vmatpush.msk.msrb.mxu2 %vm4229_vm2, %v5663_v19  ;;  %v3953_v5 = vadd.f32 %v3952_v42, %v8711_v36 }
 0x435   :  { %4403 = vmatmul.f32.gmra.mxu0 %v4113_v46  ;;  %4813 = vmatpush.msk.msrb.mxu3 %vm4247_vm14, %v5663_v19  ;;  %v3985_v45 = vadd.f32 %v3984_v34, %v3956_v49 }
 0x436   :  { %4435 = vmatmul.f32.gmra.mxu1 %v4118_v6  ;;  %4800 = vmatpush.msk.msrb.mxu2 %vm4228_vm3, %v5663_v19  ;;  %v3982_v6 = vadd.f32 %v3981_v63, %v3953_v5 }
 0x437   :  { %v3903_v51 = vpop.f32.mrf.mxu0  ;;  %4814 = vmatpush.msk.msrb.mxu3 %vm4246_vm0, %v5663_v19  ;;  %vm4625_vm0 = vcmask 125952  }
 0x438   :  { %v3904_v13 = vadd.f32 %v3903_v51, %v3875_v8  ;;  %4801 = vmatpush.msk.msrb.mxu2 %vm4227_vm4, %v5663_v19  ;;  %v3958_v25 = vpop.f32.mrf.mxu2 }
 0x439   :  { %4815 = vmatpush.msk.msrb.mxu3 %vm4245_vm6, %v5663_v19 }
 0x43a   :  { %v3933_v43 = vadd.f32 %v3932_v20, %v3904_v13  ;;  %4802 = vmatpush.msk.msrb.mxu2 %vm4226_vm5, %v5663_v19  ;;  %v3987_v46 = vpop.f32.mrf.mxu3 }
 0x43b   :  { %4816 = vmatpush.msk.msrb.mxu3 %vm4244_vm8, %v5663_v19 }
 0x43c   :  { %v4122_v7 = vmax.f32 %v3933_v43, 0.0  ;;  %4803 = vmatpush.msk.msrb.mxu2 %vm4225_vm7, %v5663_v19 }
 0x43d   :  { %4406 = vmatmul.f32.gmra.mxu0 %v4117_v24  ;;  %4817 = vmatpush.msk.msrb.mxu3 %vm4243_vm11, %v5663_v19 }
 0x43e   :  { %4438 = vmatmul.f32.gmra.mxu1 %v4122_v7  ;;  %4804 = vmatpush.msk.msrb.mxu2 %vm4224_vm10, %v5663_v19 }
 0x43f   :  { %4818 = vmatpush.msk.msrb.mxu3 %vm4242_vm1, %v5663_v19 }
 0x440   :  { %v3961_v41 = vpop.f32.mrf.mxu2 }
 0x441   :  { %4819 = vmatpush.msk.msrb.mxu3 %vm4241_vm12, %v5663_v19 }
 0x442   :  { %v3990_v9 = vpop.f32.mrf.mxu3 }
 0x443   :  { %4820 = vmatpush.msk.msrb.mxu3 %vm4240_vm13, %v5663_v19 }
 0x445   :  { %4409 = vmatmul.f32.gmra.mxu0 %v4121_v27 }
 0x449   :  { %v4039_v38 = vpop.f32.mrf.mxu1 }
 0x44a   :  { %v4040_v50 = vadd.f32 %v4039_v38, %v8711_v36  ;;  %v3959_v36 = vadd.f32 %v3958_v25, %v8751_v37 }
 0x44c   :  { %v4068_v1 = vpop.f32.mrf.mxu2  ;;  %v3988_v23 = vadd.f32 %v3987_v46, %v3959_v36 }
 0x44d   :  { %v4069_v13 = vadd.f32 %v4068_v1, %v4040_v50 }
 0x451   :  { %v4042_v51 = vpop.f32.mrf.mxu1 }
 0x452   :  { %v4043_v7 = vadd.f32 %v4042_v51, %v8739_v61  ;;  %v3962_v61 = vadd.f32 %v3961_v41, %v8758_v32 }
 0x454   :  { %v4071_v24 = vpop.f32.mrf.mxu2  ;;  %v3991_v18 = vadd.f32 %v3990_v9, %v3962_v61 }
 0x455   :  { %v4072_v0 = vadd.f32 %v4071_v24, %v4043_v7  ;;  %v4502_v7 = vld [vmem:[%s8903_s9 + $0x10] sm:$0xff] }
 0x459   :  { %v4045_v40 = vpop.f32.mrf.mxu1 }
 0x45a   :  { %v4046_v31 = vadd.f32 %v4045_v40, %v8751_v37 }
 0x45c   :  { %v4074_v48 = vpop.f32.mrf.mxu2 }
 0x45d   :  { %v4075_v16 = vadd.f32 %v4074_v48, %v4046_v31 }
 0x461   :  { %v4048_v22 = vpop.f32.mrf.mxu1 }
 0x462   :  { %v4049_v30 = vadd.f32 %v4048_v22, %v8758_v32 }
 0x464   :  { %v4077_v4 = vpop.f32.mrf.mxu2 }
 0x465   :  { %v4078_v37 = vadd.f32 %v4077_v4, %v4049_v30 }
 0x48a   :  { %v4010_v33 = vpop.f32.mrf.mxu0 }
 0x48b   :  { %v4011_v8 = vadd.f32 %v4010_v33, %v3982_v6 }
 0x48d   :  { %v4111_v20 = vmax.f32 %v4011_v8, 0.0 }
 0x48f   :  { %4458 = vmatmul.f32.vlgmr.msrb.gmra.mxu2 %v4111_v20 }
 0x490   :  { %v4097_v19 = vpop.f32.mrf.mxu3 }
 0x491   :  { %v4098_v43 = vadd.f32 %v4097_v19, %v4069_v13 }
 0x492   :  { %v4013_v35 = vpop.f32.mrf.mxu0 }
 0x493   :  { %v4112_v53 = vmax.f32 %v4098_v43, 0.0  ;;  %v4014_v27 = vadd.f32 %v4013_v35, %v3985_v45  ;;  %v4500_v45 = vld [vmem:[%s8903_s9] sm:$0xff]  ;;  %v4501_v43 = vld [vmem:[%s8903_s9 + $0x8] sm:$0xff]  ;;  %v4503_v35 = vld [vmem:[%s8903_s9 + $0x18] sm:$0xff] }
 0x495   :  { %v4115_v29 = vmax.f32 %v4014_v27, 0.0  ;;  %4487 = vmatmul.f32.vlgmr.msrb.gmra.mxu3 %v4112_v53  ;;  %v4526_v53 = vpop.permute.xlu2 %4525 }
 0x497   :  { %4461 = vmatmul.f32.gmra.mxu2 %v4115_v29 }
 0x498   :  { %v4100_v2 = vpop.f32.mrf.mxu3 }
 0x499   :  { %v4101_v55 = vadd.f32 %v4100_v2, %v4072_v0  ;;  %v4521_v0 = vpop.permute.xlu0 %4520  ;;  %v4516_v2 = vpop.permute.xlu1 %4515 }
 0x49a   :  { %v4016_v57 = vpop.f32.mrf.mxu0 }
 0x49b   :  { %v4116_v60 = vmax.f32 %v4101_v55, 0.0  ;;  %v4017_v10 = vadd.f32 %v4016_v57, %v3988_v23 }
 0x49d   :  { %v4119_v17 = vmax.f32 %v4017_v10, 0.0  ;;  %4490 = vmatmul.f32.gmra.mxu3 %v4116_v60  ;;  %v4511_v31 = vpop.permute.xlu2 %4510 }
 0x49f   :  { %4464 = vmatmul.f32.gmra.mxu2 %v4119_v17 }
 0x4a0   :  { %v4103_v54 = vpop.f32.mrf.mxu3 }
 0x4a1   :  { %v4104_v3 = vadd.f32 %v4103_v54, %v4075_v16  ;;  %v4573_v16 = vld [vmem:[%s8904_s11] sm:$0xf]  ;;  %v4578_v22 = vpop.permute.xlu0 %4577 }
 0x4a2   :  { %v4019_v59 = vpop.f32.mrf.mxu0 }
 0x4a3   :  { %v4120_v58 = vmax.f32 %v4104_v3, 0.0  ;;  %v4020_v28 = vadd.f32 %v4019_v59, %v3991_v18  ;;  %v4430_v39 = vpop.f32.mrf.mxu1 }
 0x4a5   :  { %v4123_v11 = vmax.f32 %v4020_v28, 0.0  ;;  %4493 = vmatmul.f32.gmra.mxu3 %v4120_v58 }
 0x4a7   :  { %4467 = vmatmul.f32.gmra.mxu2 %v4123_v11 }
 0x4a8   :  { %v4106_v42 = vpop.f32.mrf.mxu3 }
 0x4a9   :  { %v4107_v47 = vadd.f32 %v4106_v42, %v4078_v37 }
 0x4aa   :  { %v4401_v62 = vpop.f32.mrf.mxu0 }
 0x4ab   :  { %v4124_v63 = vmax.f32 %v4107_v47, 0.0  ;;  %v4433_v44 = vpop.f32.mrf.mxu1  ;;  %v4431_v51 = vadd.f32 %v4430_v39, %v4401_v62 }
 0x4ad   :  { %4496 = vmatmul.f32.gmra.mxu3 %v4124_v63 }
 0x4b2   :  { %v4404_v26 = vpop.f32.mrf.mxu0 }
 0x4b3   :  { %v4436_v34 = vpop.f32.mrf.mxu1  ;;  %v4434_v33 = vadd.f32 %v4433_v44, %v4404_v26 }
 0x4ba   :  { %v4407_v25 = vpop.f32.mrf.mxu0 }
 0x4bb   :  { %v4439_v46 = vpop.f32.mrf.mxu1  ;;  %v4437_v5 = vadd.f32 %v4436_v34, %v4407_v25 }
 0x4c2   :  { %v4410_v41 = vpop.f32.mrf.mxu0 }
 0x4c3   :  { %v4440_v1 = vadd.f32 %v4439_v46, %v4410_v41 }
 0x512   :  { %v4459_v14 = vpop.f32.mrf.mxu2 }
 0x513   :  { %v4460_v13 = vadd.f32 %v4459_v14, %v4431_v51 }
 0x518   :  { %v4488_v21 = vpop.f32.mrf.mxu3 }
 0x519   :  { %v4489_v19 = vadd.f32 %v4488_v21, %v4460_v13 }
 0x51a   :  { %v4462_v52 = vpop.f32.mrf.mxu2 }
 0x51b   :  { %v4463_v20 = vadd.f32 %v4462_v52, %v4434_v33 }
 0x520   :  { %v4491_v32 = vpop.f32.mrf.mxu3 }
 0x521   :  { %v4492_v24 = vadd.f32 %v4491_v32, %v4463_v20 }
 0x522   :  { %v4465_v56 = vpop.f32.mrf.mxu2 }
 0x523   :  { %v4466_v50 = vadd.f32 %v4465_v56, %v4437_v5 }
 0x528   :  { %v4494_v15 = vpop.f32.mrf.mxu3 }
 0x529   :  { %v4495_v49 = vadd.f32 %v4494_v15, %v4466_v50 }
 0x52a   :  { %v4468_v38 = vpop.f32.mrf.mxu2 }
 0x52b   :  { %v4469_v9 = vadd.f32 %v4468_v38, %v4440_v1 }
 0x530   :  { %v4497_v6 = vpop.f32.mrf.mxu3 }
 0x531   :  { %v4498_v8 = vadd.f32 %v4497_v6, %v4469_v9 }
 0x533   :  { %4552 = vmatpush.msra.mxu0 %v4498_v8  ;;  %4826 = vmatpush.msra.mxu2 %v4498_v8 }
 0x534   :  { %4827 = vmatpush.msra.mxu3 %v4498_v8 }
 0x535   :  { %4553 = vmatpush.msra.mxu0 %v4495_v49  ;;  %4828 = vmatpush.msra.mxu2 %v4495_v49 }
 0x536   :  { %4829 = vmatpush.msra.mxu3 %v4495_v49 }
 0x537   :  { %4554 = vmatpush.msra.mxu0 %v4492_v24  ;;  %4830 = vmatpush.msra.mxu2 %v4492_v24 }
 0x538   :  { %4831 = vmatpush.msra.mxu3 %v4492_v24 }
 0x539   :  { %4555 = vmatpush.msra.mxu0 %v4489_v19  ;;  %4832 = vmatpush.msra.mxu2 %v4489_v19 }
 0x53a   :  { %4833 = vmatpush.msra.mxu3 %v4489_v19  ;;  %4821 = vmatmul.msk.f32.vlgmr.msra.gmra.mxu0 %vm1800_vm9, %v4500_v45 }
 0x53b   :  { %4822 = vmatmul.msk.f32.vlgmr.msra.gmra.mxu2 %vm1800_vm9, %v4501_v43  ;;  %4824 = vmatmul.msk.f32.vlgmr.msra.gmra.mxu3 %vm1800_vm9, %v4503_v35 }
 0x543   :  { %4823 = vmatmul.msk.f32.gmra.mxu2 %vm1800_vm9, %v4502_v7 }
 0x5b7   :  { %v4557_v23 = vpop.f32.mrf.mxu0 }
 0x5b8   :  { %v4558_v60 = vadd.f32 %v4557_v23, %v4511_v31 }
 0x5ba   :  { %v4569_v61 = vmax.f32 %v4558_v60, 0.0 }
 0x5be   :  { %v4560_v27 = vpop.f32.mrf.mxu2  ;;  %v4566_v29 = vpop.f32.mrf.mxu3 }
 0x5bf   :  { %v4567_v40 = vadd.f32 %v4566_v29, %v4526_v53  ;;  %v4561_v48 = vadd.f32 %v4560_v27, %v4516_v2 }
 0x5c1   :  { %v4572_v36 = vmax.f32 %v4567_v40, 0.0  ;;  %v4570_v17 = vmax.f32 %v4561_v48, 0.0 }
 0x5c3   :  { %4595 = vmatpush.msra.mxu1 %v4572_v36 }
 0x5c6   :  { %v4563_v55 = vpop.f32.mrf.mxu2 }
 0x5c7   :  { %v4564_v57 = vadd.f32 %v4563_v55, %v4521_v0 }
 0x5c9   :  { %v4571_v10 = vmax.f32 %v4564_v57, 0.0 }
 0x5cb   :  { %4596 = vmatpush.msra.mxu1 %v4571_v10 }
 0x5cd   :  { %4597 = vmatpush.msra.mxu1 %v4570_v17 }
 0x5cf   :  { %4598 = vmatpush.msra.mxu1 %v4569_v61 }
 0x5d0   :  { %4825 = vmatmul.msk.f32.vlgmr.msra.gmra.mxu1 %vm1800_vm9, %v4573_v16 }
 0x64d   :  { %v4600_v54 = vpop.f32.mrf.mxu1 }
 0x64e   :  { %v4601_v18 = vadd.f32 %v4600_v54, %v4578_v22 }
 0x650   :  { %v4607_v3 = vand.u32 2147483647, %v4601_v18  ;;  %v4604_v62 = vmax.f32 %v4601_v18, 0.0  ;;  %vm4605_vm9 = vcmp.ne.f32.partialorder %v4601_v18, %v4601_v18 }
 0x652   :  { %v4608_v59 = vsub.f32 0.0, %v4607_v3 }
 0x654   :  { %v4609_v30 = vmul.f32 1.442695, %v4608_v59 }
 0x656   :  { %5648 = vpow2.f32 %v4609_v30 }
 0x65c   :  { %v5649_v58 = vpop.eup %5648 }
 0x65d   :  { %v4611_v28 = vadd.f32 1.0, %v5649_v58  ;;  %v4614_v4 = vmul.f32 -0.5, %v5649_v58  ;;  %v4617_v37 = vand.u32 2147483647, %v5649_v58 }
 0x65f   :  { %5650 = vlog2.f32 %v4611_v28  ;;  %v4615_v11 = vadd.f32 1.0, %v4614_v4  ;;  %vm4618_vm14 = vcmp.lt.f32.partialorder %v4617_v37, 0.0004427343 }
 0x661   :  { %v4616_v63 = vmul.f32 %v5649_v58, %v4615_v11 }
 0x665   :  { %v5651_v42 = vpop.eup %5650 }
 0x666   :  { %v4613_v47 = vmul.f32 0.6931472, %v5651_v42 }
 0x668   :  { %v4619_v39 = vsel %vm4618_vm14, %v4616_v63, %v4613_v47 }
 0x669   :  { %v4620_v14 = vadd.f32 %v4619_v39, %v4604_v62 }
 0x66b   :  { %v4621_v26 = vsel %vm4605_vm9, %v4601_v18, %v4620_v14 }
 0x66c   :  { %v4622_v44 = vmul.f32 0.99, %v4621_v26 }
 0x66e   :  { %v4623_v21 = vadd.f32 0.01, %v4622_v44 }
 0x670   :  { %v4624_v52 = vsel %vm4603_vm15, %v4601_v18, %v4623_v21 }
 0x671   :  { %4626 = vst.msk [vmem:[%s8905_s13] sm:$0xf] %vm4625_vm0, %v4624_v52 }

</bundles_post_ra>
